<compile_context>
chip_gen: v7x
topology: tpu7x:2x2x1
jax: 0.10.0
libtpu: 0.0.40
codegen_flags: <defaults>
</compile_context>

<pallas_src>
import jax
import jax.numpy as jnp
from jax.experimental import pallas as pl
from jax.experimental.pallas import tpu as pltpu


# ----------------------------------------------------------------------------
# graph preprocessing (glue, plain JAX)
# ----------------------------------------------------------------------------
def adj_to_laplace(adj):
    # TODO(synk): adj_to_laplace definition not provided; using symmetric
    # normalization D^-1/2 (A + I) D^-1/2 applied per time slice.
    c = adj.shape[-1]
    a_hat = adj + jnp.eye(c, dtype=adj.dtype)
    deg = jnp.sum(a_hat, axis=-1)
    dinv = jax.lax.rsqrt(jnp.maximum(deg, 1e-12))
    return dinv[..., :, None] * a_hat * dinv[..., None, :]


# ----------------------------------------------------------------------------
# parameter packing (wrapper-side; keeps the kernel to 3 weight operands)
# ----------------------------------------------------------------------------
ALIGN = 16  # sublane-tile height for bf16-packed slabs (slice offsets stay aligned)


def _layout(F, H, dest, E):
    assert F <= ALIGN, "w_g0 region must fit in the leading 16-row tile"
    assert dest <= ALIGN, "fused GRU input-weight blocks must fit their 16-row tiles"
    assert 1 <= E <= H and dest <= H
    A = dict(G0=0, GF=ALIGN, GB=ALIGN + H, MF=ALIGN + 2 * H,
             MB=ALIGN + 3 * H, OUT=ALIGN + 4 * H, ROWS=ALIGN + 5 * H)
    Bo = dict(IF=0, IB=ALIGN, HH=2 * ALIGN, ROWS=2 * ALIGN + H)
    M_ROWS = 11
    return A, Bo, M_ROWS


def pack_params(params, F, H, dest):
    E = F - dest
    A, Bo, M_ROWS = _layout(F, H, dest, E)

    # --- slab A: all H-col weight matrices (bf16, MXU operands) ---------------
    wA = jnp.zeros((A["ROWS"], H), jnp.float32)
    wA = wA.at[A["G0"]:A["G0"] + F].set(params["w_g0"])
    wA = wA.at[A["GF"]:A["GF"] + H].set(params["w_gf"])
    wA = wA.at[A["GB"]:A["GB"] + H].set(params["w_gb"])
    wA = wA.at[A["MF"]:A["MF"] + H].set(params["w_mf"])
    wA = wA.at[A["MB"]:A["MB"] + H].set(params["w_mb"])
    wA = wA.at[A["OUT"]:A["OUT"] + H, :dest].set(params["w_out"])

    # --- slab B: fused GRU gate matrices (columns = [r | z | n], 3H wide) ------
    wB = jnp.zeros((Bo["ROWS"], 3 * H), jnp.float32)
    w_i_f = jnp.concatenate([params["w_ir_f"], params["w_iz_f"], params["w_in_f"]], axis=1)
    w_i_b = jnp.concatenate([params["w_ir_b"], params["w_iz_b"], params["w_in_b"]], axis=1)
    wB = wB.at[Bo["IF"]:Bo["IF"] + dest].set(w_i_f)
    wB = wB.at[Bo["IB"]:Bo["IB"] + dest].set(w_i_b)
    wB = wB.at[Bo["HH"]:Bo["HH"] + H].set(
        jnp.concatenate([params["w_hr"], params["w_hz"], params["w_hn"]], axis=1))

    # --- misc slab: biases + tiny vectors (f32, added post-accumulation) ------
    misc = jnp.zeros((M_ROWS, H), jnp.float32)
    misc = misc.at[0].set(params["b_g0"][0])
    misc = misc.at[1].set(params["b_gf"][0])
    misc = misc.at[2].set(params["b_gb"][0])
    misc = misc.at[3].set(params["b_m"][0])
    misc = misc.at[4].set(params["b_r"][0])
    misc = misc.at[5].set(params["b_z"][0])
    misc = misc.at[6].set(params["b_in"][0])
    misc = misc.at[7].set(params["b_hn"][0])
    misc = misc.at[8, :E].set(params["w_att"][:, 0])
    misc = misc.at[9, 0].set(params["b_att"][0, 0])
    misc = misc.at[10, :dest].set(params["b_out"][0])

    # NOTE: when loading real checkpoint weights, b_r/b_z/b_in/b_hn must be the
    # SUM of PyTorch's paired input/hidden gate biases (b_ir+b_hr etc.).
    return wA.astype(jnp.bfloat16), wB.astype(jnp.bfloat16), misc


# ----------------------------------------------------------------------------
# fused Pallas kernel: init GCN + full recurrence + output masking
# ----------------------------------------------------------------------------
def _make_fused_forward(B, T, C, F, H, dest, init_length, Bb):
    E = F - dest
    Tp = T - init_length - 1
    R = Bb * C                             # stacked rows per grid step
    assert Tp >= 1, "need temporal - 1 > init_length"
    assert B % Bb == 0
    A, Bo, M_ROWS = _layout(F, H, dest, E)
    f32, bf16 = jnp.float32, jnp.bfloat16

    def kernel(x_ref, lf_ref, lb_ref, wA_ref, wB_ref, misc_ref, mask_ref, out_ref):
        # ---- one-time loads (weights are small & resident); x/lf/lb are
        #      ref-indexed per time step to keep live ranges short -------------
        wA = wA_ref[...]                          # (A_ROWS, H)  bf16
        wB = wB_ref[...]                          # (B_ROWS, 3H) bf16
        misc = misc_ref[...]                      # (M_ROWS, H)  f32

        w_g0 = wA[A["G0"]:A["G0"] + F]            # (F, H)
        w_gf = wA[A["GF"]:A["GF"] + H]            # (H, H)
        w_gb = wA[A["GB"]:A["GB"] + H]            # (H, H)
        w_mf = wA[A["MF"]:A["MF"] + H]            # (H, H)
        w_mb = wA[A["MB"]:A["MB"] + H]            # (H, H)
        w_out = wA[A["OUT"]:A["OUT"] + H, :dest]  # (H, dest)
        w_i3f = wB[Bo["IF"]:Bo["IF"] + dest]      # (dest, 3H)
        w_i3b = wB[Bo["IB"]:Bo["IB"] + dest]      # (dest, 3H)
        w_h3 = wB[Bo["HH"]:Bo["HH"] + H]          # (H, 3H)

        # bias / vector broadcasts hoisted out of the unrolled time loop
        bcast = lambda row, n: jnp.broadcast_to(misc[row:row + 1, :n], (R, n))
        b_g0, b_gf, b_gb, b_m = bcast(0, H), bcast(1, H), bcast(2, H), bcast(3, H)
        b_r, b_z, b_in, b_hn = bcast(4, H), bcast(5, H), bcast(6, H), bcast(7, H)
        w_att = bcast(8, E)                                      # (R, E)
        b_att = jnp.broadcast_to(misc[9:10, 0:1], (R, 1))        # (R, 1)
        b_out = bcast(10, dest)                                  # (R, dest)
        mask = jnp.broadcast_to(mask_ref[...].reshape(1, C, 1), (Bb, C, dest))
        inv_mask = 1.0 - mask

        def wdot(a, w):      # (R, K) f32 x (K, N) bf16 -> (R, N) f32 on the MXU
            return jnp.dot(a.astype(bf16), w, preferred_element_type=f32)

        def lagg(L, m):      # per-batch (C,C)@(C,K), restacked along sublanes
            parts = [jnp.dot(L, m[b * C:(b + 1) * C].astype(bf16),
                             preferred_element_type=f32) for b in range(Bb)]
            return parts[0] if Bb == 1 else jnp.concatenate(parts, axis=0)

        # ---- init_graph: gcn(input_size -> hidden_size) on x[0] --------------
        # TODO(synk): gcn definition not provided; using relu(L @ x @ W + b).
        lf0 = lf_ref[0].astype(bf16)
        x0 = x_ref[0].reshape(R, F)
        hidden = jnp.maximum(wdot(lagg(lf0, x0), w_g0) + b_g0, 0.0)     # (R, H) f32

        # ---- recurrence, fully unrolled (T static & small) -------------------
        # TODO(synk): convert to two lax.fori_loop phases if T grows beyond ~16.
        outs = []
        for i in range(T - 1):
            xi = x_ref[i].reshape(R, F)          # train mode => teacher forcing
            lfi = lf_ref[i].astype(bf16)
            lbi = lb_ref[i].astype(bf16)
            dyn = xi[:, :dest]                   # (R, dest)
            emb = xi[:, dest:]                   # (R, E)

            # attention_on_node (single attention, non-gated), on the VPU
            # TODO(synk): attention_on_node definition not provided; node-wise
            # sigmoid attention from encoding feats, then fwd/bwd aggregation.
            att = jax.nn.sigmoid(jnp.sum(emb * w_att, axis=-1, keepdims=True) + b_att)
            wdyn = att * dyn                                            # (R, dest)
            agg_f = lagg(lfi, wdyn)                                     # (R, dest)
            agg_b = lagg(lbi, wdyn)

            # forward / backward GCN over the hidden state
            fh = jnp.maximum(wdot(lagg(lfi, hidden), w_gf) + b_gf, 0.0)  # (R, H)
            bh = jnp.maximum(wdot(lagg(lbi, hidden), w_gb) + b_gb, 0.0)  # (R, H)

            # sptial_merge: Linear(concat(fh, bh)) as two concat-free GEMMs
            h_space = wdot(fh, w_mf) + wdot(bh, w_mb) + b_m              # (R, H)

            # GRUCell (PyTorch semantics); fused 3H gate GEMMs, concat-free input
            gx = wdot(agg_f, w_i3f) + wdot(agg_b, w_i3b)                 # (R, 3H)
            gh = wdot(h_space, w_h3)                                     # (R, 3H)
            r = jax.nn.sigmoid(gx[:, 0:H] + gh[:, 0:H] + b_r)
            z = jax.nn.sigmoid(gx[:, H:2 * H] + gh[:, H:2 * H] + b_z)
            n = jnp.tanh(gx[:, 2 * H:] + b_in + r * (gh[:, 2 * H:] + b_hn))
            hidden = (1.0 - z) * n + z * h_space

            if i >= init_length:
                pred = wdot(hidden, w_out) + b_out                       # (R, dest) MXU
                gt = x_ref[i + 1][:, :, :dest]                           # (Bb, C, dest)
                outs.append(mask * gt + inv_mask * pred.reshape(Bb, C, dest))

        # single batched store per grid step (no per-step masked stores)
        out_ref[...] = jnp.stack(outs, axis=0)

    return pl.pallas_call(
        kernel,
        grid=(B // Bb,),
        in_specs=[
            pl.BlockSpec((T, Bb, C, F), lambda g: (0, g, 0, 0)),   # x, time-major
            pl.BlockSpec((T, C, C), lambda g: (0, 0, 0)),          # forward Laplacians
            pl.BlockSpec((T, C, C), lambda g: (0, 0, 0)),          # backward Laplacians
            pl.BlockSpec((A["ROWS"], H), lambda g: (0, 0)),        # H-wide weight slab
            pl.BlockSpec((Bo["ROWS"], 3 * H), lambda g: (0, 0)),   # fused GRU-gate slab
            pl.BlockSpec((M_ROWS, H), lambda g: (0, 0)),           # bias / vector slab
            pl.BlockSpec((C, 1), lambda g: (0, 0)),                # input-cell mask
        ],
        out_specs=pl.BlockSpec((Tp, Bb, C, dest), lambda g: (0, g, 0, 0)),
        out_shape=jax.ShapeDtypeStruct((Tp, B, C, dest), jnp.float32),
        compiler_params=pltpu.CompilerParams(dimension_semantics=("parallel",)),
    )


# ----------------------------------------------------------------------------
# parameters (deterministic, synthetic)
# ----------------------------------------------------------------------------
def init_params(key, F, H, dest):
    E = F - dest
    ks = jax.random.split(key, 26)

    def w(k, shape, scale=0.1):
        return (scale * jax.random.normal(k, shape)).astype(jnp.float32)

    p = {}
    p["w_att"] = w(ks[0], (E, 1)); p["b_att"] = w(ks[1], (1, 1))
    p["w_g0"] = w(ks[2], (F, H)); p["b_g0"] = w(ks[3], (1, H))
    p["w_gf"] = w(ks[4], (H, H)); p["b_gf"] = w(ks[5], (1, H))
    p["w_gb"] = w(ks[6], (H, H)); p["b_gb"] = w(ks[7], (1, H))
    p["w_mf"] = w(ks[8], (H, H)); p["w_mb"] = w(ks[9], (H, H)); p["b_m"] = w(ks[10], (1, H))
    p["w_ir_f"] = w(ks[11], (dest, H)); p["w_ir_b"] = w(ks[12], (dest, H))
    p["w_iz_f"] = w(ks[13], (dest, H)); p["w_iz_b"] = w(ks[14], (dest, H))
    p["w_in_f"] = w(ks[15], (dest, H)); p["w_in_b"] = w(ks[16], (dest, H))
    p["w_hr"] = w(ks[17], (H, H)); p["w_hz"] = w(ks[18], (H, H)); p["w_hn"] = w(ks[19], (H, H))
    p["b_r"] = w(ks[20], (1, H)); p["b_z"] = w(ks[21], (1, H))
    p["b_in"] = w(ks[22], (1, H)); p["b_hn"] = w(ks[23], (1, H))
    p["w_out"] = w(ks[24], (H, dest)); p["b_out"] = w(ks[25], (1, dest))
    return p


# ----------------------------------------------------------------------------
# forward pass (train mode of `single_attention_non_gate.infer`)
# ----------------------------------------------------------------------------
def make_forward(B, T, C, F, H, dest, init_length, input_cells, batch_block=None):
    if batch_block is None:
        # keep >= 2 grid steps when B allows it (v7x has 2 TCs); otherwise fold all of B
        batch_block = B // 2 if (B >= 2 and B % 2 == 0) else B
    assert B % batch_block == 0
    fused = _make_fused_forward(B, T, C, F, H, dest, init_length, batch_block)
    mask_f = jnp.zeros((C, 1), jnp.float32).at[jnp.asarray(input_cells), 0].set(1.0)

    def forward(params, input_data, adj_list):
        lf = adj_to_laplace(adj_list)
        lb = adj_to_laplace(jnp.swapaxes(adj_list, 1, 2))
        wA, wB, misc = pack_params(params, F, H, dest)
        x_t = jnp.transpose(input_data, (1, 0, 2, 3))        # (T, B, C, F) time-major
        out_t = fused(x_t, lf, lb, wA, wB, misc, mask_f)      # (Tp, B, C, dest)
        return jnp.transpose(out_t, (1, 0, 2, 3))             # (B, Tp, C, dest)

    return jax.jit(forward)


# ----------------------------------------------------------------------------
if __name__ == "__main__":
    B, T, C = 4, 8, 8
    dest, E = 2, 4
    F = dest + E            # input_size
    H = 32                  # hidden_size
    init_length = 4
    input_cells = (0, 2, 5)

    key = jax.random.PRNGKey(0)
    kx, ka, kp = jax.random.split(key, 3)
    input_data = jax.random.normal(kx, (B, T, C, F), dtype=jnp.float32)
    adj_list = (jax.random.uniform(ka, (T, C, C)) < 0.4).astype(jnp.float32)
    params = init_params(kp, F, H, dest)

    forward = make_forward(B, T, C, F, H, dest, init_length, input_cells)
    out = forward(params, input_data, adj_list)
    out = jax.block_until_ready(out)

    assert out.shape == (B, T - init_length - 1, C, dest), out.shape
    assert bool(jnp.all(jnp.isfinite(out)))
    print("KERNEL_OK")
</pallas_src>

<mosaic_0001>
module attributes {stable_mosaic.version = 11 : i64} {
  func.func @kernel(%arg0: i32, %arg1: memref<8x2x8x6xf32, #tpu.memory_space<vmem>>, %arg2: memref<8x8x8xf32, #tpu.memory_space<vmem>>, %arg3: memref<8x8x8xf32, #tpu.memory_space<vmem>>, %arg4: memref<176x32xbf16, #tpu.memory_space<vmem>>, %arg5: memref<64x96xbf16, #tpu.memory_space<vmem>>, %arg6: memref<11x32xf32, #tpu.memory_space<vmem>>, %arg7: memref<8x1xf32, #tpu.memory_space<vmem>>, %arg8: memref<3x2x8x2xf32, #tpu.memory_space<vmem>>) attributes {dimension_semantics = [#tpu.dimension_semantics<parallel>], iteration_bounds = array<i64: 2>, scalar_prefetch = 0 : i64, scratch_operands = 0 : i64, tpu.core_type = #tpu.core_type<tc>, window_params = [{transform_indices = @transform_0, window_bounds = array<i64: 8, 2, 8, 6>}, {pipeline_mode = #tpu.pipeline_mode<synchronous>, transform_indices = @transform_1, window_bounds = array<i64: 8, 8, 8>}, {pipeline_mode = #tpu.pipeline_mode<synchronous>, transform_indices = @transform_2, window_bounds = array<i64: 8, 8, 8>}, {pipeline_mode = #tpu.pipeline_mode<synchronous>, transform_indices = @transform_3, window_bounds = array<i64: 176, 32>}, {pipeline_mode = #tpu.pipeline_mode<synchronous>, transform_indices = @transform_4, window_bounds = array<i64: 64, 96>}, {pipeline_mode = #tpu.pipeline_mode<synchronous>, transform_indices = @transform_5, window_bounds = array<i64: 11, 32>}, {pipeline_mode = #tpu.pipeline_mode<synchronous>, transform_indices = @transform_6, window_bounds = array<i64: 8, 1>}, {transform_indices = @transform_7, window_bounds = array<i64: 3, 2, 8, 2>}]} {
    %c0 = arith.constant 0 : index
    %c0_0 = arith.constant 0 : index
    %0 = vector.load %arg4[%c0, %c0_0] : memref<176x32xbf16, #tpu.memory_space<vmem>>, vector<176x32xbf16>
    %c0_1 = arith.constant 0 : index
    %c0_2 = arith.constant 0 : index
    %1 = vector.load %arg5[%c0_1, %c0_2] : memref<64x96xbf16, #tpu.memory_space<vmem>>, vector<64x96xbf16>
    %c0_3 = arith.constant 0 : index
    %c0_4 = arith.constant 0 : index
    %2 = vector.load %arg6[%c0_3, %c0_4] : memref<11x32xf32, #tpu.memory_space<vmem>>, vector<11x32xf32>
    %3 = vector.extract_strided_slice %0 {offsets = [0, 0], sizes = [6, 32], strides = [1, 1]} : vector<176x32xbf16> to vector<6x32xbf16>
    %4 = vector.extract_strided_slice %0 {offsets = [16, 0], sizes = [32, 32], strides = [1, 1]} : vector<176x32xbf16> to vector<32x32xbf16>
    %5 = vector.extract_strided_slice %0 {offsets = [48, 0], sizes = [32, 32], strides = [1, 1]} : vector<176x32xbf16> to vector<32x32xbf16>
    %6 = vector.extract_strided_slice %0 {offsets = [80, 0], sizes = [32, 32], strides = [1, 1]} : vector<176x32xbf16> to vector<32x32xbf16>
    %7 = vector.extract_strided_slice %0 {offsets = [112, 0], sizes = [32, 32], strides = [1, 1]} : vector<176x32xbf16> to vector<32x32xbf16>
    %8 = vector.extract_strided_slice %0 {offsets = [144, 0], sizes = [32, 2], strides = [1, 1]} : vector<176x32xbf16> to vector<32x2xbf16>
    %9 = vector.extract_strided_slice %1 {offsets = [0, 0], sizes = [2, 96], strides = [1, 1]} : vector<64x96xbf16> to vector<2x96xbf16>
    %10 = vector.extract_strided_slice %1 {offsets = [16, 0], sizes = [2, 96], strides = [1, 1]} : vector<64x96xbf16> to vector<2x96xbf16>
    %11 = vector.extract_strided_slice %1 {offsets = [32, 0], sizes = [32, 96], strides = [1, 1]} : vector<64x96xbf16> to vector<32x96xbf16>
    %12 = vector.extract_strided_slice %2 {offsets = [0, 0], sizes = [1, 32], strides = [1, 1]} : vector<11x32xf32> to vector<1x32xf32>
    %13 = vector.shape_cast %12 : vector<1x32xf32> to vector<1x32xf32>
    %14 = vector.broadcast %13 : vector<1x32xf32> to vector<16x32xf32>
    %15 = vector.extract_strided_slice %2 {offsets = [1, 0], sizes = [1, 32], strides = [1, 1]} : vector<11x32xf32> to vector<1x32xf32>
    %16 = vector.shape_cast %15 : vector<1x32xf32> to vector<1x32xf32>
    %17 = vector.broadcast %16 : vector<1x32xf32> to vector<16x32xf32>
    %18 = vector.extract_strided_slice %2 {offsets = [2, 0], sizes = [1, 32], strides = [1, 1]} : vector<11x32xf32> to vector<1x32xf32>
    %19 = vector.shape_cast %18 : vector<1x32xf32> to vector<1x32xf32>
    %20 = vector.broadcast %19 : vector<1x32xf32> to vector<16x32xf32>
    %21 = vector.extract_strided_slice %2 {offsets = [3, 0], sizes = [1, 32], strides = [1, 1]} : vector<11x32xf32> to vector<1x32xf32>
    %22 = vector.shape_cast %21 : vector<1x32xf32> to vector<1x32xf32>
    %23 = vector.broadcast %22 : vector<1x32xf32> to vector<16x32xf32>
    %24 = vector.extract_strided_slice %2 {offsets = [4, 0], sizes = [1, 32], strides = [1, 1]} : vector<11x32xf32> to vector<1x32xf32>
    %25 = vector.shape_cast %24 : vector<1x32xf32> to vector<1x32xf32>
    %26 = vector.broadcast %25 : vector<1x32xf32> to vector<16x32xf32>
    %27 = vector.extract_strided_slice %2 {offsets = [5, 0], sizes = [1, 32], strides = [1, 1]} : vector<11x32xf32> to vector<1x32xf32>
    %28 = vector.shape_cast %27 : vector<1x32xf32> to vector<1x32xf32>
    %29 = vector.broadcast %28 : vector<1x32xf32> to vector<16x32xf32>
    %30 = vector.extract_strided_slice %2 {offsets = [6, 0], sizes = [1, 32], strides = [1, 1]} : vector<11x32xf32> to vector<1x32xf32>
    %31 = vector.shape_cast %30 : vector<1x32xf32> to vector<1x32xf32>
    %32 = vector.broadcast %31 : vector<1x32xf32> to vector<16x32xf32>
    %33 = vector.extract_strided_slice %2 {offsets = [7, 0], sizes = [1, 32], strides = [1, 1]} : vector<11x32xf32> to vector<1x32xf32>
    %34 = vector.shape_cast %33 : vector<1x32xf32> to vector<1x32xf32>
    %35 = vector.broadcast %34 : vector<1x32xf32> to vector<16x32xf32>
    %36 = vector.extract_strided_slice %2 {offsets = [8, 0], sizes = [1, 4], strides = [1, 1]} : vector<11x32xf32> to vector<1x4xf32>
    %37 = vector.shape_cast %36 : vector<1x4xf32> to vector<1x4xf32>
    %38 = vector.broadcast %37 : vector<1x4xf32> to vector<16x4xf32>
    %39 = vector.extract_strided_slice %2 {offsets = [9, 0], sizes = [1, 1], strides = [1, 1]} : vector<11x32xf32> to vector<1x1xf32>
    %40 = vector.shape_cast %39 : vector<1x1xf32> to vector<1x1xf32>
    %41 = vector.broadcast %40 : vector<1x1xf32> to vector<16x1xf32>
    %42 = vector.extract_strided_slice %2 {offsets = [10, 0], sizes = [1, 2], strides = [1, 1]} : vector<11x32xf32> to vector<1x2xf32>
    %43 = vector.shape_cast %42 : vector<1x2xf32> to vector<1x2xf32>
    %44 = vector.broadcast %43 : vector<1x2xf32> to vector<16x2xf32>
    %c0_5 = arith.constant 0 : index
    %c0_6 = arith.constant 0 : index
    %45 = vector.load %arg7[%c0_5, %c0_6] : memref<8x1xf32, #tpu.memory_space<vmem>>, vector<8x1xf32>
    %46 = vector.shape_cast %45 : vector<8x1xf32> to vector<1x8x1xf32>
    %47 = vector.shape_cast %46 : vector<1x8x1xf32> to vector<1x8x1xf32>
    %48 = vector.broadcast %47 : vector<1x8x1xf32> to vector<2x8x2xf32>
    %cst = arith.constant 1.000000e+00 : f32
    %49 = vector.broadcast %cst : f32 to vector<2x8x2xf32>
    %50 = arith.subf %49, %48 : vector<2x8x2xf32>
    %c0_7 = arith.constant 0 : index
    %c0_8 = arith.constant 0 : index
    %c0_9 = arith.constant 0 : index
    %51 = vector.load %arg2[%c0_7, %c0_8, %c0_9] : memref<8x8x8xf32, #tpu.memory_space<vmem>>, vector<1x8x8xf32>
    %52 = vector.shape_cast %51 : vector<1x8x8xf32> to vector<8x8xf32>
    %53 = arith.truncf %52 : vector<8x8xf32> to vector<8x8xbf16>
    %c0_10 = arith.constant 0 : index
    %c0_11 = arith.constant 0 : index
    %c0_12 = arith.constant 0 : index
    %c0_13 = arith.constant 0 : index
    %54 = vector.load %arg1[%c0_10, %c0_11, %c0_12, %c0_13] : memref<8x2x8x6xf32, #tpu.memory_space<vmem>>, vector<1x2x8x6xf32>
    %55 = vector.shape_cast %54 : vector<1x2x8x6xf32> to vector<2x8x6xf32>
    %56 = vector.shape_cast %55 : vector<2x8x6xf32> to vector<16x6xf32>
    %57 = vector.extract_strided_slice %56 {offsets = [0, 0], sizes = [8, 6], strides = [1, 1]} : vector<16x6xf32> to vector<8x6xf32>
    %58 = arith.truncf %57 : vector<8x6xf32> to vector<8x6xbf16>
    %cst_14 = arith.constant dense<0.000000e+00> : vector<8x6xf32>
    %59 = tpu.matmul %53, %58, %cst_14 {dimension_numbers = #tpu.dot_dimension_numbers<[1], [0], [0], [1], [0, 0, 1, 1], [], []>} : vector<8x8xbf16>, vector<8x6xbf16>, vector<8x6xf32> -> vector<8x6xf32>
    %60 = vector.extract_strided_slice %56 {offsets = [8, 0], sizes = [8, 6], strides = [1, 1]} : vector<16x6xf32> to vector<8x6xf32>
    %61 = arith.truncf %60 : vector<8x6xf32> to vector<8x6xbf16>
    %cst_15 = arith.constant dense<0.000000e+00> : vector<8x6xf32>
    %62 = tpu.matmul %53, %61, %cst_15 {dimension_numbers = #tpu.dot_dimension_numbers<[1], [0], [0], [1], [0, 0, 1, 1], [], []>} : vector<8x8xbf16>, vector<8x6xbf16>, vector<8x6xf32> -> vector<8x6xf32>
    %63 = tpu.concatenate %59, %62 in 0 : vector<8x6xf32>, vector<8x6xf32> -> vector<16x6xf32>
    %64 = arith.truncf %63 : vector<16x6xf32> to vector<16x6xbf16>
    %cst_16 = arith.constant dense<0.000000e+00> : vector<16x32xf32>
    %65 = tpu.matmul %64, %3, %cst_16 {dimension_numbers = #tpu.dot_dimension_numbers<[1], [0], [0], [1], [0, 0, 1, 1], [], []>} : vector<16x6xbf16>, vector<6x32xbf16>, vector<16x32xf32> -> vector<16x32xf32>
    %66 = arith.addf %65, %14 : vector<16x32xf32>
    %cst_17 = arith.constant 0.000000e+00 : f32
    %67 = vector.broadcast %cst_17 : f32 to vector<16x32xf32>
    %68 = arith.maximumf %66, %67 : vector<16x32xf32>
    %c0_18 = arith.constant 0 : index
    %c0_19 = arith.constant 0 : index
    %c0_20 = arith.constant 0 : index
    %c0_21 = arith.constant 0 : index
    %69 = vector.load %arg1[%c0_18, %c0_19, %c0_20, %c0_21] : memref<8x2x8x6xf32, #tpu.memory_space<vmem>>, vector<1x2x8x6xf32>
    %70 = vector.shape_cast %69 : vector<1x2x8x6xf32> to vector<2x8x6xf32>
    %71 = vector.shape_cast %70 : vector<2x8x6xf32> to vector<16x6xf32>
    %c0_22 = arith.constant 0 : index
    %c0_23 = arith.constant 0 : index
    %c0_24 = arith.constant 0 : index
    %72 = vector.load %arg2[%c0_22, %c0_23, %c0_24] : memref<8x8x8xf32, #tpu.memory_space<vmem>>, vector<1x8x8xf32>
    %73 = vector.shape_cast %72 : vector<1x8x8xf32> to vector<8x8xf32>
    %74 = arith.truncf %73 : vector<8x8xf32> to vector<8x8xbf16>
    %c0_25 = arith.constant 0 : index
    %c0_26 = arith.constant 0 : index
    %c0_27 = arith.constant 0 : index
    %75 = vector.load %arg3[%c0_25, %c0_26, %c0_27] : memref<8x8x8xf32, #tpu.memory_space<vmem>>, vector<1x8x8xf32>
    %76 = vector.shape_cast %75 : vector<1x8x8xf32> to vector<8x8xf32>
    %77 = arith.truncf %76 : vector<8x8xf32> to vector<8x8xbf16>
    %78 = vector.extract_strided_slice %71 {offsets = [0, 0], sizes = [16, 2], strides = [1, 1]} : vector<16x6xf32> to vector<16x2xf32>
    %79 = vector.extract_strided_slice %71 {offsets = [0, 2], sizes = [16, 4], strides = [1, 1]} : vector<16x6xf32> to vector<16x4xf32>
    %80 = arith.mulf %79, %38 : vector<16x4xf32>
    %cst_28 = arith.constant dense<0.000000e+00> : vector<16xf32>
    %81 = vector.multi_reduction <add>, %80, %cst_28 [1] : vector<16x4xf32> to vector<16xf32>
    %82 = vector.shape_cast %81 : vector<16xf32> to vector<16x1xf32>
    %83 = arith.addf %82, %41 : vector<16x1xf32>
    %84 = arith.negf %83 : vector<16x1xf32>
    %85 = math.exp %84 : vector<16x1xf32>
    %cst_29 = arith.constant 1.000000e+00 : f32
    %86 = vector.broadcast %cst_29 : f32 to vector<16x1xf32>
    %87 = arith.addf %86, %85 : vector<16x1xf32>
    %88 = arith.divf %86, %87 : vector<16x1xf32>
    %89 = vector.broadcast %88 : vector<16x1xf32> to vector<16x2xf32>
    %90 = arith.mulf %89, %78 : vector<16x2xf32>
    %91 = vector.extract_strided_slice %90 {offsets = [0, 0], sizes = [8, 2], strides = [1, 1]} : vector<16x2xf32> to vector<8x2xf32>
    %92 = arith.truncf %91 : vector<8x2xf32> to vector<8x2xbf16>
    %cst_30 = arith.constant dense<0.000000e+00> : vector<8x2xf32>
    %93 = tpu.matmul %74, %92, %cst_30 {dimension_numbers = #tpu.dot_dimension_numbers<[1], [0], [0], [1], [0, 0, 1, 1], [], []>} : vector<8x8xbf16>, vector<8x2xbf16>, vector<8x2xf32> -> vector<8x2xf32>
    %94 = vector.extract_strided_slice %90 {offsets = [8, 0], sizes = [8, 2], strides = [1, 1]} : vector<16x2xf32> to vector<8x2xf32>
    %95 = arith.truncf %94 : vector<8x2xf32> to vector<8x2xbf16>
    %cst_31 = arith.constant dense<0.000000e+00> : vector<8x2xf32>
    %96 = tpu.matmul %74, %95, %cst_31 {dimension_numbers = #tpu.dot_dimension_numbers<[1], [0], [0], [1], [0, 0, 1, 1], [], []>} : vector<8x8xbf16>, vector<8x2xbf16>, vector<8x2xf32> -> vector<8x2xf32>
    %97 = tpu.concatenate %93, %96 in 0 : vector<8x2xf32>, vector<8x2xf32> -> vector<16x2xf32>
    %98 = vector.extract_strided_slice %90 {offsets = [0, 0], sizes = [8, 2], strides = [1, 1]} : vector<16x2xf32> to vector<8x2xf32>
    %99 = arith.truncf %98 : vector<8x2xf32> to vector<8x2xbf16>
    %cst_32 = arith.constant dense<0.000000e+00> : vector<8x2xf32>
    %100 = tpu.matmul %77, %99, %cst_32 {dimension_numbers = #tpu.dot_dimension_numbers<[1], [0], [0], [1], [0, 0, 1, 1], [], []>} : vector<8x8xbf16>, vector<8x2xbf16>, vector<8x2xf32> -> vector<8x2xf32>
    %101 = vector.extract_strided_slice %90 {offsets = [8, 0], sizes = [8, 2], strides = [1, 1]} : vector<16x2xf32> to vector<8x2xf32>
    %102 = arith.truncf %101 : vector<8x2xf32> to vector<8x2xbf16>
    %cst_33 = arith.constant dense<0.000000e+00> : vector<8x2xf32>
    %103 = tpu.matmul %77, %102, %cst_33 {dimension_numbers = #tpu.dot_dimension_numbers<[1], [0], [0], [1], [0, 0, 1, 1], [], []>} : vector<8x8xbf16>, vector<8x2xbf16>, vector<8x2xf32> -> vector<8x2xf32>
    %104 = tpu.concatenate %100, %103 in 0 : vector<8x2xf32>, vector<8x2xf32> -> vector<16x2xf32>
    %105 = vector.extract_strided_slice %68 {offsets = [0, 0], sizes = [8, 32], strides = [1, 1]} : vector<16x32xf32> to vector<8x32xf32>
    %106 = arith.truncf %105 : vector<8x32xf32> to vector<8x32xbf16>
    %cst_34 = arith.constant dense<0.000000e+00> : vector<8x32xf32>
    %107 = tpu.matmul %74, %106, %cst_34 {dimension_numbers = #tpu.dot_dimension_numbers<[1], [0], [0], [1], [0, 0, 1, 1], [], []>} : vector<8x8xbf16>, vector<8x32xbf16>, vector<8x32xf32> -> vector<8x32xf32>
    %108 = vector.extract_strided_slice %68 {offsets = [8, 0], sizes = [8, 32], strides = [1, 1]} : vector<16x32xf32> to vector<8x32xf32>
    %109 = arith.truncf %108 : vector<8x32xf32> to vector<8x32xbf16>
    %cst_35 = arith.constant dense<0.000000e+00> : vector<8x32xf32>
    %110 = tpu.matmul %74, %109, %cst_35 {dimension_numbers = #tpu.dot_dimension_numbers<[1], [0], [0], [1], [0, 0, 1, 1], [], []>} : vector<8x8xbf16>, vector<8x32xbf16>, vector<8x32xf32> -> vector<8x32xf32>
    %111 = tpu.concatenate %107, %110 in 0 : vector<8x32xf32>, vector<8x32xf32> -> vector<16x32xf32>
    %112 = arith.truncf %111 : vector<16x32xf32> to vector<16x32xbf16>
    %cst_36 = arith.constant dense<0.000000e+00> : vector<16x32xf32>
    %113 = tpu.matmul %112, %4, %cst_36 {dimension_numbers = #tpu.dot_dimension_numbers<[1], [0], [0], [1], [0, 0, 1, 1], [], []>} : vector<16x32xbf16>, vector<32x32xbf16>, vector<16x32xf32> -> vector<16x32xf32>
    %114 = arith.addf %113, %17 : vector<16x32xf32>
    %cst_37 = arith.constant 0.000000e+00 : f32
    %115 = vector.broadcast %cst_37 : f32 to vector<16x32xf32>
    %116 = arith.maximumf %114, %115 : vector<16x32xf32>
    %117 = vector.extract_strided_slice %68 {offsets = [0, 0], sizes = [8, 32], strides = [1, 1]} : vector<16x32xf32> to vector<8x32xf32>
    %118 = arith.truncf %117 : vector<8x32xf32> to vector<8x32xbf16>
    %cst_38 = arith.constant dense<0.000000e+00> : vector<8x32xf32>
    %119 = tpu.matmul %77, %118, %cst_38 {dimension_numbers = #tpu.dot_dimension_numbers<[1], [0], [0], [1], [0, 0, 1, 1], [], []>} : vector<8x8xbf16>, vector<8x32xbf16>, vector<8x32xf32> -> vector<8x32xf32>
    %120 = vector.extract_strided_slice %68 {offsets = [8, 0], sizes = [8, 32], strides = [1, 1]} : vector<16x32xf32> to vector<8x32xf32>
    %121 = arith.truncf %120 : vector<8x32xf32> to vector<8x32xbf16>
    %cst_39 = arith.constant dense<0.000000e+00> : vector<8x32xf32>
    %122 = tpu.matmul %77, %121, %cst_39 {dimension_numbers = #tpu.dot_dimension_numbers<[1], [0], [0], [1], [0, 0, 1, 1], [], []>} : vector<8x8xbf16>, vector<8x32xbf16>, vector<8x32xf32> -> vector<8x32xf32>
    %123 = tpu.concatenate %119, %122 in 0 : vector<8x32xf32>, vector<8x32xf32> -> vector<16x32xf32>
    %124 = arith.truncf %123 : vector<16x32xf32> to vector<16x32xbf16>
    %cst_40 = arith.constant dense<0.000000e+00> : vector<16x32xf32>
    %125 = tpu.matmul %124, %5, %cst_40 {dimension_numbers = #tpu.dot_dimension_numbers<[1], [0], [0], [1], [0, 0, 1, 1], [], []>} : vector<16x32xbf16>, vector<32x32xbf16>, vector<16x32xf32> -> vector<16x32xf32>
    %126 = arith.addf %125, %20 : vector<16x32xf32>
    %cst_41 = arith.constant 0.000000e+00 : f32
    %127 = vector.broadcast %cst_41 : f32 to vector<16x32xf32>
    %128 = arith.maximumf %126, %127 : vector<16x32xf32>
    %129 = arith.truncf %116 : vector<16x32xf32> to vector<16x32xbf16>
    %cst_42 = arith.constant dense<0.000000e+00> : vector<16x32xf32>
    %130 = tpu.matmul %129, %6, %cst_42 {dimension_numbers = #tpu.dot_dimension_numbers<[1], [0], [0], [1], [0, 0, 1, 1], [], []>} : vector<16x32xbf16>, vector<32x32xbf16>, vector<16x32xf32> -> vector<16x32xf32>
    %131 = arith.truncf %128 : vector<16x32xf32> to vector<16x32xbf16>
    %cst_43 = arith.constant dense<0.000000e+00> : vector<16x32xf32>
    %132 = tpu.matmul %131, %7, %cst_43 {dimension_numbers = #tpu.dot_dimension_numbers<[1], [0], [0], [1], [0, 0, 1, 1], [], []>} : vector<16x32xbf16>, vector<32x32xbf16>, vector<16x32xf32> -> vector<16x32xf32>
    %133 = arith.addf %130, %132 : vector<16x32xf32>
    %134 = arith.addf %133, %23 : vector<16x32xf32>
    %135 = arith.truncf %97 : vector<16x2xf32> to vector<16x2xbf16>
    %cst_44 = arith.constant dense<0.000000e+00> : vector<16x96xf32>
    %136 = tpu.matmul %135, %9, %cst_44 {dimension_numbers = #tpu.dot_dimension_numbers<[1], [0], [0], [1], [0, 0, 1, 1], [], []>} : vector<16x2xbf16>, vector<2x96xbf16>, vector<16x96xf32> -> vector<16x96xf32>
    %137 = arith.truncf %104 : vector<16x2xf32> to vector<16x2xbf16>
    %cst_45 = arith.constant dense<0.000000e+00> : vector<16x96xf32>
    %138 = tpu.matmul %137, %10, %cst_45 {dimension_numbers = #tpu.dot_dimension_numbers<[1], [0], [0], [1], [0, 0, 1, 1], [], []>} : vector<16x2xbf16>, vector<2x96xbf16>, vector<16x96xf32> -> vector<16x96xf32>
    %139 = arith.addf %136, %138 : vector<16x96xf32>
    %140 = arith.truncf %134 : vector<16x32xf32> to vector<16x32xbf16>
    %cst_46 = arith.constant dense<0.000000e+00> : vector<16x96xf32>
    %141 = tpu.matmul %140, %11, %cst_46 {dimension_numbers = #tpu.dot_dimension_numbers<[1], [0], [0], [1], [0, 0, 1, 1], [], []>} : vector<16x32xbf16>, vector<32x96xbf16>, vector<16x96xf32> -> vector<16x96xf32>
    %142 = vector.extract_strided_slice %139 {offsets = [0, 0], sizes = [16, 32], strides = [1, 1]} : vector<16x96xf32> to vector<16x32xf32>
    %143 = vector.extract_strided_slice %141 {offsets = [0, 0], sizes = [16, 32], strides = [1, 1]} : vector<16x96xf32> to vector<16x32xf32>
    %144 = arith.addf %142, %143 : vector<16x32xf32>
    %145 = arith.addf %144, %26 : vector<16x32xf32>
    %146 = arith.negf %145 : vector<16x32xf32>
    %147 = math.exp %146 : vector<16x32xf32>
    %cst_47 = arith.constant 1.000000e+00 : f32
    %148 = vector.broadcast %cst_47 : f32 to vector<16x32xf32>
    %149 = arith.addf %148, %147 : vector<16x32xf32>
    %150 = arith.divf %148, %149 : vector<16x32xf32>
    %151 = vector.extract_strided_slice %139 {offsets = [0, 32], sizes = [16, 32], strides = [1, 1]} : vector<16x96xf32> to vector<16x32xf32>
    %152 = vector.extract_strided_slice %141 {offsets = [0, 32], sizes = [16, 32], strides = [1, 1]} : vector<16x96xf32> to vector<16x32xf32>
    %153 = arith.addf %151, %152 : vector<16x32xf32>
    %154 = arith.addf %153, %29 : vector<16x32xf32>
    %155 = arith.negf %154 : vector<16x32xf32>
    %156 = math.exp %155 : vector<16x32xf32>
    %cst_48 = arith.constant 1.000000e+00 : f32
    %157 = vector.broadcast %cst_48 : f32 to vector<16x32xf32>
    %158 = arith.addf %157, %156 : vector<16x32xf32>
    %159 = arith.divf %157, %158 : vector<16x32xf32>
    %160 = vector.extract_strided_slice %139 {offsets = [0, 64], sizes = [16, 32], strides = [1, 1]} : vector<16x96xf32> to vector<16x32xf32>
    %161 = arith.addf %160, %32 : vector<16x32xf32>
    %162 = vector.extract_strided_slice %141 {offsets = [0, 64], sizes = [16, 32], strides = [1, 1]} : vector<16x96xf32> to vector<16x32xf32>
    %163 = arith.addf %162, %35 : vector<16x32xf32>
    %164 = arith.mulf %150, %163 : vector<16x32xf32>
    %165 = arith.addf %161, %164 : vector<16x32xf32>
    %166 = math.tanh %165 : vector<16x32xf32>
    %cst_49 = arith.constant 1.000000e+00 : f32
    %167 = vector.broadcast %cst_49 : f32 to vector<16x32xf32>
    %168 = arith.subf %167, %159 : vector<16x32xf32>
    %169 = arith.mulf %168, %166 : vector<16x32xf32>
    %170 = arith.mulf %159, %134 : vector<16x32xf32>
    %171 = arith.addf %169, %170 : vector<16x32xf32>
    %c1 = arith.constant 1 : index
    %c0_50 = arith.constant 0 : index
    %c0_51 = arith.constant 0 : index
    %c0_52 = arith.constant 0 : index
    %172 = vector.load %arg1[%c1, %c0_50, %c0_51, %c0_52] : memref<8x2x8x6xf32, #tpu.memory_space<vmem>>, vector<1x2x8x6xf32>
    %173 = vector.shape_cast %172 : vector<1x2x8x6xf32> to vector<2x8x6xf32>
    %174 = vector.shape_cast %173 : vector<2x8x6xf32> to vector<16x6xf32>
    %c1_53 = arith.constant 1 : index
    %c0_54 = arith.constant 0 : index
    %c0_55 = arith.constant 0 : index
    %175 = vector.load %arg2[%c1_53, %c0_54, %c0_55] : memref<8x8x8xf32, #tpu.memory_space<vmem>>, vector<1x8x8xf32>
    %176 = vector.shape_cast %175 : vector<1x8x8xf32> to vector<8x8xf32>
    %177 = arith.truncf %176 : vector<8x8xf32> to vector<8x8xbf16>
    %c1_56 = arith.constant 1 : index
    %c0_57 = arith.constant 0 : index
    %c0_58 = arith.constant 0 : index
    %178 = vector.load %arg3[%c1_56, %c0_57, %c0_58] : memref<8x8x8xf32, #tpu.memory_space<vmem>>, vector<1x8x8xf32>
    %179 = vector.shape_cast %178 : vector<1x8x8xf32> to vector<8x8xf32>
    %180 = arith.truncf %179 : vector<8x8xf32> to vector<8x8xbf16>
    %181 = vector.extract_strided_slice %174 {offsets = [0, 0], sizes = [16, 2], strides = [1, 1]} : vector<16x6xf32> to vector<16x2xf32>
    %182 = vector.extract_strided_slice %174 {offsets = [0, 2], sizes = [16, 4], strides = [1, 1]} : vector<16x6xf32> to vector<16x4xf32>
    %183 = arith.mulf %182, %38 : vector<16x4xf32>
    %cst_59 = arith.constant dense<0.000000e+00> : vector<16xf32>
    %184 = vector.multi_reduction <add>, %183, %cst_59 [1] : vector<16x4xf32> to vector<16xf32>
    %185 = vector.shape_cast %184 : vector<16xf32> to vector<16x1xf32>
    %186 = arith.addf %185, %41 : vector<16x1xf32>
    %187 = arith.negf %186 : vector<16x1xf32>
    %188 = math.exp %187 : vector<16x1xf32>
    %cst_60 = arith.constant 1.000000e+00 : f32
    %189 = vector.broadcast %cst_60 : f32 to vector<16x1xf32>
    %190 = arith.addf %189, %188 : vector<16x1xf32>
    %191 = arith.divf %189, %190 : vector<16x1xf32>
    %192 = vector.broadcast %191 : vector<16x1xf32> to vector<16x2xf32>
    %193 = arith.mulf %192, %181 : vector<16x2xf32>
    %194 = vector.extract_strided_slice %193 {offsets = [0, 0], sizes = [8, 2], strides = [1, 1]} : vector<16x2xf32> to vector<8x2xf32>
    %195 = arith.truncf %194 : vector<8x2xf32> to vector<8x2xbf16>
    %cst_61 = arith.constant dense<0.000000e+00> : vector<8x2xf32>
    %196 = tpu.matmul %177, %195, %cst_61 {dimension_numbers = #tpu.dot_dimension_numbers<[1], [0], [0], [1], [0, 0, 1, 1], [], []>} : vector<8x8xbf16>, vector<8x2xbf16>, vector<8x2xf32> -> vector<8x2xf32>
    %197 = vector.extract_strided_slice %193 {offsets = [8, 0], sizes = [8, 2], strides = [1, 1]} : vector<16x2xf32> to vector<8x2xf32>
    %198 = arith.truncf %197 : vector<8x2xf32> to vector<8x2xbf16>
    %cst_62 = arith.constant dense<0.000000e+00> : vector<8x2xf32>
    %199 = tpu.matmul %177, %198, %cst_62 {dimension_numbers = #tpu.dot_dimension_numbers<[1], [0], [0], [1], [0, 0, 1, 1], [], []>} : vector<8x8xbf16>, vector<8x2xbf16>, vector<8x2xf32> -> vector<8x2xf32>
    %200 = tpu.concatenate %196, %199 in 0 : vector<8x2xf32>, vector<8x2xf32> -> vector<16x2xf32>
    %201 = vector.extract_strided_slice %193 {offsets = [0, 0], sizes = [8, 2], strides = [1, 1]} : vector<16x2xf32> to vector<8x2xf32>
    %202 = arith.truncf %201 : vector<8x2xf32> to vector<8x2xbf16>
    %cst_63 = arith.constant dense<0.000000e+00> : vector<8x2xf32>
    %203 = tpu.matmul %180, %202, %cst_63 {dimension_numbers = #tpu.dot_dimension_numbers<[1], [0], [0], [1], [0, 0, 1, 1], [], []>} : vector<8x8xbf16>, vector<8x2xbf16>, vector<8x2xf32> -> vector<8x2xf32>
    %204 = vector.extract_strided_slice %193 {offsets = [8, 0], sizes = [8, 2], strides = [1, 1]} : vector<16x2xf32> to vector<8x2xf32>
    %205 = arith.truncf %204 : vector<8x2xf32> to vector<8x2xbf16>
    %cst_64 = arith.constant dense<0.000000e+00> : vector<8x2xf32>
    %206 = tpu.matmul %180, %205, %cst_64 {dimension_numbers = #tpu.dot_dimension_numbers<[1], [0], [0], [1], [0, 0, 1, 1], [], []>} : vector<8x8xbf16>, vector<8x2xbf16>, vector<8x2xf32> -> vector<8x2xf32>
    %207 = tpu.concatenate %203, %206 in 0 : vector<8x2xf32>, vector<8x2xf32> -> vector<16x2xf32>
    %208 = vector.extract_strided_slice %171 {offsets = [0, 0], sizes = [8, 32], strides = [1, 1]} : vector<16x32xf32> to vector<8x32xf32>
    %209 = arith.truncf %208 : vector<8x32xf32> to vector<8x32xbf16>
    %cst_65 = arith.constant dense<0.000000e+00> : vector<8x32xf32>
    %210 = tpu.matmul %177, %209, %cst_65 {dimension_numbers = #tpu.dot_dimension_numbers<[1], [0], [0], [1], [0, 0, 1, 1], [], []>} : vector<8x8xbf16>, vector<8x32xbf16>, vector<8x32xf32> -> vector<8x32xf32>
    %211 = vector.extract_strided_slice %171 {offsets = [8, 0], sizes = [8, 32], strides = [1, 1]} : vector<16x32xf32> to vector<8x32xf32>
    %212 = arith.truncf %211 : vector<8x32xf32> to vector<8x32xbf16>
    %cst_66 = arith.constant dense<0.000000e+00> : vector<8x32xf32>
    %213 = tpu.matmul %177, %212, %cst_66 {dimension_numbers = #tpu.dot_dimension_numbers<[1], [0], [0], [1], [0, 0, 1, 1], [], []>} : vector<8x8xbf16>, vector<8x32xbf16>, vector<8x32xf32> -> vector<8x32xf32>
    %214 = tpu.concatenate %210, %213 in 0 : vector<8x32xf32>, vector<8x32xf32> -> vector<16x32xf32>
    %215 = arith.truncf %214 : vector<16x32xf32> to vector<16x32xbf16>
    %cst_67 = arith.constant dense<0.000000e+00> : vector<16x32xf32>
    %216 = tpu.matmul %215, %4, %cst_67 {dimension_numbers = #tpu.dot_dimension_numbers<[1], [0], [0], [1], [0, 0, 1, 1], [], []>} : vector<16x32xbf16>, vector<32x32xbf16>, vector<16x32xf32> -> vector<16x32xf32>
    %217 = arith.addf %216, %17 : vector<16x32xf32>
    %cst_68 = arith.constant 0.000000e+00 : f32
    %218 = vector.broadcast %cst_68 : f32 to vector<16x32xf32>
    %219 = arith.maximumf %217, %218 : vector<16x32xf32>
    %220 = vector.extract_strided_slice %171 {offsets = [0, 0], sizes = [8, 32], strides = [1, 1]} : vector<16x32xf32> to vector<8x32xf32>
    %221 = arith.truncf %220 : vector<8x32xf32> to vector<8x32xbf16>
    %cst_69 = arith.constant dense<0.000000e+00> : vector<8x32xf32>
    %222 = tpu.matmul %180, %221, %cst_69 {dimension_numbers = #tpu.dot_dimension_numbers<[1], [0], [0], [1], [0, 0, 1, 1], [], []>} : vector<8x8xbf16>, vector<8x32xbf16>, vector<8x32xf32> -> vector<8x32xf32>
    %223 = vector.extract_strided_slice %171 {offsets = [8, 0], sizes = [8, 32], strides = [1, 1]} : vector<16x32xf32> to vector<8x32xf32>
    %224 = arith.truncf %223 : vector<8x32xf32> to vector<8x32xbf16>
    %cst_70 = arith.constant dense<0.000000e+00> : vector<8x32xf32>
    %225 = tpu.matmul %180, %224, %cst_70 {dimension_numbers = #tpu.dot_dimension_numbers<[1], [0], [0], [1], [0, 0, 1, 1], [], []>} : vector<8x8xbf16>, vector<8x32xbf16>, vector<8x32xf32> -> vector<8x32xf32>
    %226 = tpu.concatenate %222, %225 in 0 : vector<8x32xf32>, vector<8x32xf32> -> vector<16x32xf32>
    %227 = arith.truncf %226 : vector<16x32xf32> to vector<16x32xbf16>
    %cst_71 = arith.constant dense<0.000000e+00> : vector<16x32xf32>
    %228 = tpu.matmul %227, %5, %cst_71 {dimension_numbers = #tpu.dot_dimension_numbers<[1], [0], [0], [1], [0, 0, 1, 1], [], []>} : vector<16x32xbf16>, vector<32x32xbf16>, vector<16x32xf32> -> vector<16x32xf32>
    %229 = arith.addf %228, %20 : vector<16x32xf32>
    %cst_72 = arith.constant 0.000000e+00 : f32
    %230 = vector.broadcast %cst_72 : f32 to vector<16x32xf32>
    %231 = arith.maximumf %229, %230 : vector<16x32xf32>
    %232 = arith.truncf %219 : vector<16x32xf32> to vector<16x32xbf16>
    %cst_73 = arith.constant dense<0.000000e+00> : vector<16x32xf32>
    %233 = tpu.matmul %232, %6, %cst_73 {dimension_numbers = #tpu.dot_dimension_numbers<[1], [0], [0], [1], [0, 0, 1, 1], [], []>} : vector<16x32xbf16>, vector<32x32xbf16>, vector<16x32xf32> -> vector<16x32xf32>
    %234 = arith.truncf %231 : vector<16x32xf32> to vector<16x32xbf16>
    %cst_74 = arith.constant dense<0.000000e+00> : vector<16x32xf32>
    %235 = tpu.matmul %234, %7, %cst_74 {dimension_numbers = #tpu.dot_dimension_numbers<[1], [0], [0], [1], [0, 0, 1, 1], [], []>} : vector<16x32xbf16>, vector<32x32xbf16>, vector<16x32xf32> -> vector<16x32xf32>
    %236 = arith.addf %233, %235 : vector<16x32xf32>
    %237 = arith.addf %236, %23 : vector<16x32xf32>
    %238 = arith.truncf %200 : vector<16x2xf32> to vector<16x2xbf16>
    %cst_75 = arith.constant dense<0.000000e+00> : vector<16x96xf32>
    %239 = tpu.matmul %238, %9, %cst_75 {dimension_numbers = #tpu.dot_dimension_numbers<[1], [0], [0], [1], [0, 0, 1, 1], [], []>} : vector<16x2xbf16>, vector<2x96xbf16>, vector<16x96xf32> -> vector<16x96xf32>
    %240 = arith.truncf %207 : vector<16x2xf32> to vector<16x2xbf16>
    %cst_76 = arith.constant dense<0.000000e+00> : vector<16x96xf32>
    %241 = tpu.matmul %240, %10, %cst_76 {dimension_numbers = #tpu.dot_dimension_numbers<[1], [0], [0], [1], [0, 0, 1, 1], [], []>} : vector<16x2xbf16>, vector<2x96xbf16>, vector<16x96xf32> -> vector<16x96xf32>
    %242 = arith.addf %239, %241 : vector<16x96xf32>
    %243 = arith.truncf %237 : vector<16x32xf32> to vector<16x32xbf16>
    %cst_77 = arith.constant dense<0.000000e+00> : vector<16x96xf32>
    %244 = tpu.matmul %243, %11, %cst_77 {dimension_numbers = #tpu.dot_dimension_numbers<[1], [0], [0], [1], [0, 0, 1, 1], [], []>} : vector<16x32xbf16>, vector<32x96xbf16>, vector<16x96xf32> -> vector<16x96xf32>
    %245 = vector.extract_strided_slice %242 {offsets = [0, 0], sizes = [16, 32], strides = [1, 1]} : vector<16x96xf32> to vector<16x32xf32>
    %246 = vector.extract_strided_slice %244 {offsets = [0, 0], sizes = [16, 32], strides = [1, 1]} : vector<16x96xf32> to vector<16x32xf32>
    %247 = arith.addf %245, %246 : vector<16x32xf32>
    %248 = arith.addf %247, %26 : vector<16x32xf32>
    %249 = arith.negf %248 : vector<16x32xf32>
    %250 = math.exp %249 : vector<16x32xf32>
    %cst_78 = arith.constant 1.000000e+00 : f32
    %251 = vector.broadcast %cst_78 : f32 to vector<16x32xf32>
    %252 = arith.addf %251, %250 : vector<16x32xf32>
    %253 = arith.divf %251, %252 : vector<16x32xf32>
    %254 = vector.extract_strided_slice %242 {offsets = [0, 32], sizes = [16, 32], strides = [1, 1]} : vector<16x96xf32> to vector<16x32xf32>
    %255 = vector.extract_strided_slice %244 {offsets = [0, 32], sizes = [16, 32], strides = [1, 1]} : vector<16x96xf32> to vector<16x32xf32>
    %256 = arith.addf %254, %255 : vector<16x32xf32>
    %257 = arith.addf %256, %29 : vector<16x32xf32>
    %258 = arith.negf %257 : vector<16x32xf32>
    %259 = math.exp %258 : vector<16x32xf32>
    %cst_79 = arith.constant 1.000000e+00 : f32
    %260 = vector.broadcast %cst_79 : f32 to vector<16x32xf32>
    %261 = arith.addf %260, %259 : vector<16x32xf32>
    %262 = arith.divf %260, %261 : vector<16x32xf32>
    %263 = vector.extract_strided_slice %242 {offsets = [0, 64], sizes = [16, 32], strides = [1, 1]} : vector<16x96xf32> to vector<16x32xf32>
    %264 = arith.addf %263, %32 : vector<16x32xf32>
    %265 = vector.extract_strided_slice %244 {offsets = [0, 64], sizes = [16, 32], strides = [1, 1]} : vector<16x96xf32> to vector<16x32xf32>
    %266 = arith.addf %265, %35 : vector<16x32xf32>
    %267 = arith.mulf %253, %266 : vector<16x32xf32>
    %268 = arith.addf %264, %267 : vector<16x32xf32>
    %269 = math.tanh %268 : vector<16x32xf32>
    %cst_80 = arith.constant 1.000000e+00 : f32
    %270 = vector.broadcast %cst_80 : f32 to vector<16x32xf32>
    %271 = arith.subf %270, %262 : vector<16x32xf32>
    %272 = arith.mulf %271, %269 : vector<16x32xf32>
    %273 = arith.mulf %262, %237 : vector<16x32xf32>
    %274 = arith.addf %272, %273 : vector<16x32xf32>
    %c2 = arith.constant 2 : index
    %c0_81 = arith.constant 0 : index
    %c0_82 = arith.constant 0 : index
    %c0_83 = arith.constant 0 : index
    %275 = vector.load %arg1[%c2, %c0_81, %c0_82, %c0_83] : memref<8x2x8x6xf32, #tpu.memory_space<vmem>>, vector<1x2x8x6xf32>
    %276 = vector.shape_cast %275 : vector<1x2x8x6xf32> to vector<2x8x6xf32>
    %277 = vector.shape_cast %276 : vector<2x8x6xf32> to vector<16x6xf32>
    %c2_84 = arith.constant 2 : index
    %c0_85 = arith.constant 0 : index
    %c0_86 = arith.constant 0 : index
    %278 = vector.load %arg2[%c2_84, %c0_85, %c0_86] : memref<8x8x8xf32, #tpu.memory_space<vmem>>, vector<1x8x8xf32>
    %279 = vector.shape_cast %278 : vector<1x8x8xf32> to vector<8x8xf32>
    %280 = arith.truncf %279 : vector<8x8xf32> to vector<8x8xbf16>
    %c2_87 = arith.constant 2 : index
    %c0_88 = arith.constant 0 : index
    %c0_89 = arith.constant 0 : index
    %281 = vector.load %arg3[%c2_87, %c0_88, %c0_89] : memref<8x8x8xf32, #tpu.memory_space<vmem>>, vector<1x8x8xf32>
    %282 = vector.shape_cast %281 : vector<1x8x8xf32> to vector<8x8xf32>
    %283 = arith.truncf %282 : vector<8x8xf32> to vector<8x8xbf16>
    %284 = vector.extract_strided_slice %277 {offsets = [0, 0], sizes = [16, 2], strides = [1, 1]} : vector<16x6xf32> to vector<16x2xf32>
    %285 = vector.extract_strided_slice %277 {offsets = [0, 2], sizes = [16, 4], strides = [1, 1]} : vector<16x6xf32> to vector<16x4xf32>
    %286 = arith.mulf %285, %38 : vector<16x4xf32>
    %cst_90 = arith.constant dense<0.000000e+00> : vector<16xf32>
    %287 = vector.multi_reduction <add>, %286, %cst_90 [1] : vector<16x4xf32> to vector<16xf32>
    %288 = vector.shape_cast %287 : vector<16xf32> to vector<16x1xf32>
    %289 = arith.addf %288, %41 : vector<16x1xf32>
    %290 = arith.negf %289 : vector<16x1xf32>
    %291 = math.exp %290 : vector<16x1xf32>
    %cst_91 = arith.constant 1.000000e+00 : f32
    %292 = vector.broadcast %cst_91 : f32 to vector<16x1xf32>
    %293 = arith.addf %292, %291 : vector<16x1xf32>
    %294 = arith.divf %292, %293 : vector<16x1xf32>
    %295 = vector.broadcast %294 : vector<16x1xf32> to vector<16x2xf32>
    %296 = arith.mulf %295, %284 : vector<16x2xf32>
    %297 = vector.extract_strided_slice %296 {offsets = [0, 0], sizes = [8, 2], strides = [1, 1]} : vector<16x2xf32> to vector<8x2xf32>
    %298 = arith.truncf %297 : vector<8x2xf32> to vector<8x2xbf16>
    %cst_92 = arith.constant dense<0.000000e+00> : vector<8x2xf32>
    %299 = tpu.matmul %280, %298, %cst_92 {dimension_numbers = #tpu.dot_dimension_numbers<[1], [0], [0], [1], [0, 0, 1, 1], [], []>} : vector<8x8xbf16>, vector<8x2xbf16>, vector<8x2xf32> -> vector<8x2xf32>
    %300 = vector.extract_strided_slice %296 {offsets = [8, 0], sizes = [8, 2], strides = [1, 1]} : vector<16x2xf32> to vector<8x2xf32>
    %301 = arith.truncf %300 : vector<8x2xf32> to vector<8x2xbf16>
    %cst_93 = arith.constant dense<0.000000e+00> : vector<8x2xf32>
    %302 = tpu.matmul %280, %301, %cst_93 {dimension_numbers = #tpu.dot_dimension_numbers<[1], [0], [0], [1], [0, 0, 1, 1], [], []>} : vector<8x8xbf16>, vector<8x2xbf16>, vector<8x2xf32> -> vector<8x2xf32>
    %303 = tpu.concatenate %299, %302 in 0 : vector<8x2xf32>, vector<8x2xf32> -> vector<16x2xf32>
    %304 = vector.extract_strided_slice %296 {offsets = [0, 0], sizes = [8, 2], strides = [1, 1]} : vector<16x2xf32> to vector<8x2xf32>
    %305 = arith.truncf %304 : vector<8x2xf32> to vector<8x2xbf16>
    %cst_94 = arith.constant dense<0.000000e+00> : vector<8x2xf32>
    %306 = tpu.matmul %283, %305, %cst_94 {dimension_numbers = #tpu.dot_dimension_numbers<[1], [0], [0], [1], [0, 0, 1, 1], [], []>} : vector<8x8xbf16>, vector<8x2xbf16>, vector<8x2xf32> -> vector<8x2xf32>
    %307 = vector.extract_strided_slice %296 {offsets = [8, 0], sizes = [8, 2], strides = [1, 1]} : vector<16x2xf32> to vector<8x2xf32>
    %308 = arith.truncf %307 : vector<8x2xf32> to vector<8x2xbf16>
    %cst_95 = arith.constant dense<0.000000e+00> : vector<8x2xf32>
    %309 = tpu.matmul %283, %308, %cst_95 {dimension_numbers = #tpu.dot_dimension_numbers<[1], [0], [0], [1], [0, 0, 1, 1], [], []>} : vector<8x8xbf16>, vector<8x2xbf16>, vector<8x2xf32> -> vector<8x2xf32>
    %310 = tpu.concatenate %306, %309 in 0 : vector<8x2xf32>, vector<8x2xf32> -> vector<16x2xf32>
    %311 = vector.extract_strided_slice %274 {offsets = [0, 0], sizes = [8, 32], strides = [1, 1]} : vector<16x32xf32> to vector<8x32xf32>
    %312 = arith.truncf %311 : vector<8x32xf32> to vector<8x32xbf16>
    %cst_96 = arith.constant dense<0.000000e+00> : vector<8x32xf32>
    %313 = tpu.matmul %280, %312, %cst_96 {dimension_numbers = #tpu.dot_dimension_numbers<[1], [0], [0], [1], [0, 0, 1, 1], [], []>} : vector<8x8xbf16>, vector<8x32xbf16>, vector<8x32xf32> -> vector<8x32xf32>
    %314 = vector.extract_strided_slice %274 {offsets = [8, 0], sizes = [8, 32], strides = [1, 1]} : vector<16x32xf32> to vector<8x32xf32>
    %315 = arith.truncf %314 : vector<8x32xf32> to vector<8x32xbf16>
    %cst_97 = arith.constant dense<0.000000e+00> : vector<8x32xf32>
    %316 = tpu.matmul %280, %315, %cst_97 {dimension_numbers = #tpu.dot_dimension_numbers<[1], [0], [0], [1], [0, 0, 1, 1], [], []>} : vector<8x8xbf16>, vector<8x32xbf16>, vector<8x32xf32> -> vector<8x32xf32>
    %317 = tpu.concatenate %313, %316 in 0 : vector<8x32xf32>, vector<8x32xf32> -> vector<16x32xf32>
    %318 = arith.truncf %317 : vector<16x32xf32> to vector<16x32xbf16>
    %cst_98 = arith.constant dense<0.000000e+00> : vector<16x32xf32>
    %319 = tpu.matmul %318, %4, %cst_98 {dimension_numbers = #tpu.dot_dimension_numbers<[1], [0], [0], [1], [0, 0, 1, 1], [], []>} : vector<16x32xbf16>, vector<32x32xbf16>, vector<16x32xf32> -> vector<16x32xf32>
    %320 = arith.addf %319, %17 : vector<16x32xf32>
    %cst_99 = arith.constant 0.000000e+00 : f32
    %321 = vector.broadcast %cst_99 : f32 to vector<16x32xf32>
    %322 = arith.maximumf %320, %321 : vector<16x32xf32>
    %323 = vector.extract_strided_slice %274 {offsets = [0, 0], sizes = [8, 32], strides = [1, 1]} : vector<16x32xf32> to vector<8x32xf32>
    %324 = arith.truncf %323 : vector<8x32xf32> to vector<8x32xbf16>
    %cst_100 = arith.constant dense<0.000000e+00> : vector<8x32xf32>
    %325 = tpu.matmul %283, %324, %cst_100 {dimension_numbers = #tpu.dot_dimension_numbers<[1], [0], [0], [1], [0, 0, 1, 1], [], []>} : vector<8x8xbf16>, vector<8x32xbf16>, vector<8x32xf32> -> vector<8x32xf32>
    %326 = vector.extract_strided_slice %274 {offsets = [8, 0], sizes = [8, 32], strides = [1, 1]} : vector<16x32xf32> to vector<8x32xf32>
    %327 = arith.truncf %326 : vector<8x32xf32> to vector<8x32xbf16>
    %cst_101 = arith.constant dense<0.000000e+00> : vector<8x32xf32>
    %328 = tpu.matmul %283, %327, %cst_101 {dimension_numbers = #tpu.dot_dimension_numbers<[1], [0], [0], [1], [0, 0, 1, 1], [], []>} : vector<8x8xbf16>, vector<8x32xbf16>, vector<8x32xf32> -> vector<8x32xf32>
    %329 = tpu.concatenate %325, %328 in 0 : vector<8x32xf32>, vector<8x32xf32> -> vector<16x32xf32>
    %330 = arith.truncf %329 : vector<16x32xf32> to vector<16x32xbf16>
    %cst_102 = arith.constant dense<0.000000e+00> : vector<16x32xf32>
    %331 = tpu.matmul %330, %5, %cst_102 {dimension_numbers = #tpu.dot_dimension_numbers<[1], [0], [0], [1], [0, 0, 1, 1], [], []>} : vector<16x32xbf16>, vector<32x32xbf16>, vector<16x32xf32> -> vector<16x32xf32>
    %332 = arith.addf %331, %20 : vector<16x32xf32>
    %cst_103 = arith.constant 0.000000e+00 : f32
    %333 = vector.broadcast %cst_103 : f32 to vector<16x32xf32>
    %334 = arith.maximumf %332, %333 : vector<16x32xf32>
    %335 = arith.truncf %322 : vector<16x32xf32> to vector<16x32xbf16>
    %cst_104 = arith.constant dense<0.000000e+00> : vector<16x32xf32>
    %336 = tpu.matmul %335, %6, %cst_104 {dimension_numbers = #tpu.dot_dimension_numbers<[1], [0], [0], [1], [0, 0, 1, 1], [], []>} : vector<16x32xbf16>, vector<32x32xbf16>, vector<16x32xf32> -> vector<16x32xf32>
    %337 = arith.truncf %334 : vector<16x32xf32> to vector<16x32xbf16>
    %cst_105 = arith.constant dense<0.000000e+00> : vector<16x32xf32>
    %338 = tpu.matmul %337, %7, %cst_105 {dimension_numbers = #tpu.dot_dimension_numbers<[1], [0], [0], [1], [0, 0, 1, 1], [], []>} : vector<16x32xbf16>, vector<32x32xbf16>, vector<16x32xf32> -> vector<16x32xf32>
    %339 = arith.addf %336, %338 : vector<16x32xf32>
    %340 = arith.addf %339, %23 : vector<16x32xf32>
    %341 = arith.truncf %303 : vector<16x2xf32> to vector<16x2xbf16>
    %cst_106 = arith.constant dense<0.000000e+00> : vector<16x96xf32>
    %342 = tpu.matmul %341, %9, %cst_106 {dimension_numbers = #tpu.dot_dimension_numbers<[1], [0], [0], [1], [0, 0, 1, 1], [], []>} : vector<16x2xbf16>, vector<2x96xbf16>, vector<16x96xf32> -> vector<16x96xf32>
    %343 = arith.truncf %310 : vector<16x2xf32> to vector<16x2xbf16>
    %cst_107 = arith.constant dense<0.000000e+00> : vector<16x96xf32>
    %344 = tpu.matmul %343, %10, %cst_107 {dimension_numbers = #tpu.dot_dimension_numbers<[1], [0], [0], [1], [0, 0, 1, 1], [], []>} : vector<16x2xbf16>, vector<2x96xbf16>, vector<16x96xf32> -> vector<16x96xf32>
    %345 = arith.addf %342, %344 : vector<16x96xf32>
    %346 = arith.truncf %340 : vector<16x32xf32> to vector<16x32xbf16>
    %cst_108 = arith.constant dense<0.000000e+00> : vector<16x96xf32>
    %347 = tpu.matmul %346, %11, %cst_108 {dimension_numbers = #tpu.dot_dimension_numbers<[1], [0], [0], [1], [0, 0, 1, 1], [], []>} : vector<16x32xbf16>, vector<32x96xbf16>, vector<16x96xf32> -> vector<16x96xf32>
    %348 = vector.extract_strided_slice %345 {offsets = [0, 0], sizes = [16, 32], strides = [1, 1]} : vector<16x96xf32> to vector<16x32xf32>
    %349 = vector.extract_strided_slice %347 {offsets = [0, 0], sizes = [16, 32], strides = [1, 1]} : vector<16x96xf32> to vector<16x32xf32>
    %350 = arith.addf %348, %349 : vector<16x32xf32>
    %351 = arith.addf %350, %26 : vector<16x32xf32>
    %352 = arith.negf %351 : vector<16x32xf32>
    %353 = math.exp %352 : vector<16x32xf32>
    %cst_109 = arith.constant 1.000000e+00 : f32
    %354 = vector.broadcast %cst_109 : f32 to vector<16x32xf32>
    %355 = arith.addf %354, %353 : vector<16x32xf32>
    %356 = arith.divf %354, %355 : vector<16x32xf32>
    %357 = vector.extract_strided_slice %345 {offsets = [0, 32], sizes = [16, 32], strides = [1, 1]} : vector<16x96xf32> to vector<16x32xf32>
    %358 = vector.extract_strided_slice %347 {offsets = [0, 32], sizes = [16, 32], strides = [1, 1]} : vector<16x96xf32> to vector<16x32xf32>
    %359 = arith.addf %357, %358 : vector<16x32xf32>
    %360 = arith.addf %359, %29 : vector<16x32xf32>
    %361 = arith.negf %360 : vector<16x32xf32>
    %362 = math.exp %361 : vector<16x32xf32>
    %cst_110 = arith.constant 1.000000e+00 : f32
    %363 = vector.broadcast %cst_110 : f32 to vector<16x32xf32>
    %364 = arith.addf %363, %362 : vector<16x32xf32>
    %365 = arith.divf %363, %364 : vector<16x32xf32>
    %366 = vector.extract_strided_slice %345 {offsets = [0, 64], sizes = [16, 32], strides = [1, 1]} : vector<16x96xf32> to vector<16x32xf32>
    %367 = arith.addf %366, %32 : vector<16x32xf32>
    %368 = vector.extract_strided_slice %347 {offsets = [0, 64], sizes = [16, 32], strides = [1, 1]} : vector<16x96xf32> to vector<16x32xf32>
    %369 = arith.addf %368, %35 : vector<16x32xf32>
    %370 = arith.mulf %356, %369 : vector<16x32xf32>
    %371 = arith.addf %367, %370 : vector<16x32xf32>
    %372 = math.tanh %371 : vector<16x32xf32>
    %cst_111 = arith.constant 1.000000e+00 : f32
    %373 = vector.broadcast %cst_111 : f32 to vector<16x32xf32>
    %374 = arith.subf %373, %365 : vector<16x32xf32>
    %375 = arith.mulf %374, %372 : vector<16x32xf32>
    %376 = arith.mulf %365, %340 : vector<16x32xf32>
    %377 = arith.addf %375, %376 : vector<16x32xf32>
    %c3 = arith.constant 3 : index
    %c0_112 = arith.constant 0 : index
    %c0_113 = arith.constant 0 : index
    %c0_114 = arith.constant 0 : index
    %378 = vector.load %arg1[%c3, %c0_112, %c0_113, %c0_114] : memref<8x2x8x6xf32, #tpu.memory_space<vmem>>, vector<1x2x8x6xf32>
    %379 = vector.shape_cast %378 : vector<1x2x8x6xf32> to vector<2x8x6xf32>
    %380 = vector.shape_cast %379 : vector<2x8x6xf32> to vector<16x6xf32>
    %c3_115 = arith.constant 3 : index
    %c0_116 = arith.constant 0 : index
    %c0_117 = arith.constant 0 : index
    %381 = vector.load %arg2[%c3_115, %c0_116, %c0_117] : memref<8x8x8xf32, #tpu.memory_space<vmem>>, vector<1x8x8xf32>
    %382 = vector.shape_cast %381 : vector<1x8x8xf32> to vector<8x8xf32>
    %383 = arith.truncf %382 : vector<8x8xf32> to vector<8x8xbf16>
    %c3_118 = arith.constant 3 : index
    %c0_119 = arith.constant 0 : index
    %c0_120 = arith.constant 0 : index
    %384 = vector.load %arg3[%c3_118, %c0_119, %c0_120] : memref<8x8x8xf32, #tpu.memory_space<vmem>>, vector<1x8x8xf32>
    %385 = vector.shape_cast %384 : vector<1x8x8xf32> to vector<8x8xf32>
    %386 = arith.truncf %385 : vector<8x8xf32> to vector<8x8xbf16>
    %387 = vector.extract_strided_slice %380 {offsets = [0, 0], sizes = [16, 2], strides = [1, 1]} : vector<16x6xf32> to vector<16x2xf32>
    %388 = vector.extract_strided_slice %380 {offsets = [0, 2], sizes = [16, 4], strides = [1, 1]} : vector<16x6xf32> to vector<16x4xf32>
    %389 = arith.mulf %388, %38 : vector<16x4xf32>
    %cst_121 = arith.constant dense<0.000000e+00> : vector<16xf32>
    %390 = vector.multi_reduction <add>, %389, %cst_121 [1] : vector<16x4xf32> to vector<16xf32>
    %391 = vector.shape_cast %390 : vector<16xf32> to vector<16x1xf32>
    %392 = arith.addf %391, %41 : vector<16x1xf32>
    %393 = arith.negf %392 : vector<16x1xf32>
    %394 = math.exp %393 : vector<16x1xf32>
    %cst_122 = arith.constant 1.000000e+00 : f32
    %395 = vector.broadcast %cst_122 : f32 to vector<16x1xf32>
    %396 = arith.addf %395, %394 : vector<16x1xf32>
    %397 = arith.divf %395, %396 : vector<16x1xf32>
    %398 = vector.broadcast %397 : vector<16x1xf32> to vector<16x2xf32>
    %399 = arith.mulf %398, %387 : vector<16x2xf32>
    %400 = vector.extract_strided_slice %399 {offsets = [0, 0], sizes = [8, 2], strides = [1, 1]} : vector<16x2xf32> to vector<8x2xf32>
    %401 = arith.truncf %400 : vector<8x2xf32> to vector<8x2xbf16>
    %cst_123 = arith.constant dense<0.000000e+00> : vector<8x2xf32>
    %402 = tpu.matmul %383, %401, %cst_123 {dimension_numbers = #tpu.dot_dimension_numbers<[1], [0], [0], [1], [0, 0, 1, 1], [], []>} : vector<8x8xbf16>, vector<8x2xbf16>, vector<8x2xf32> -> vector<8x2xf32>
    %403 = vector.extract_strided_slice %399 {offsets = [8, 0], sizes = [8, 2], strides = [1, 1]} : vector<16x2xf32> to vector<8x2xf32>
    %404 = arith.truncf %403 : vector<8x2xf32> to vector<8x2xbf16>
    %cst_124 = arith.constant dense<0.000000e+00> : vector<8x2xf32>
    %405 = tpu.matmul %383, %404, %cst_124 {dimension_numbers = #tpu.dot_dimension_numbers<[1], [0], [0], [1], [0, 0, 1, 1], [], []>} : vector<8x8xbf16>, vector<8x2xbf16>, vector<8x2xf32> -> vector<8x2xf32>
    %406 = tpu.concatenate %402, %405 in 0 : vector<8x2xf32>, vector<8x2xf32> -> vector<16x2xf32>
    %407 = vector.extract_strided_slice %399 {offsets = [0, 0], sizes = [8, 2], strides = [1, 1]} : vector<16x2xf32> to vector<8x2xf32>
    %408 = arith.truncf %407 : vector<8x2xf32> to vector<8x2xbf16>
    %cst_125 = arith.constant dense<0.000000e+00> : vector<8x2xf32>
    %409 = tpu.matmul %386, %408, %cst_125 {dimension_numbers = #tpu.dot_dimension_numbers<[1], [0], [0], [1], [0, 0, 1, 1], [], []>} : vector<8x8xbf16>, vector<8x2xbf16>, vector<8x2xf32> -> vector<8x2xf32>
    %410 = vector.extract_strided_slice %399 {offsets = [8, 0], sizes = [8, 2], strides = [1, 1]} : vector<16x2xf32> to vector<8x2xf32>
    %411 = arith.truncf %410 : vector<8x2xf32> to vector<8x2xbf16>
    %cst_126 = arith.constant dense<0.000000e+00> : vector<8x2xf32>
    %412 = tpu.matmul %386, %411, %cst_126 {dimension_numbers = #tpu.dot_dimension_numbers<[1], [0], [0], [1], [0, 0, 1, 1], [], []>} : vector<8x8xbf16>, vector<8x2xbf16>, vector<8x2xf32> -> vector<8x2xf32>
    %413 = tpu.concatenate %409, %412 in 0 : vector<8x2xf32>, vector<8x2xf32> -> vector<16x2xf32>
    %414 = vector.extract_strided_slice %377 {offsets = [0, 0], sizes = [8, 32], strides = [1, 1]} : vector<16x32xf32> to vector<8x32xf32>
    %415 = arith.truncf %414 : vector<8x32xf32> to vector<8x32xbf16>
    %cst_127 = arith.constant dense<0.000000e+00> : vector<8x32xf32>
    %416 = tpu.matmul %383, %415, %cst_127 {dimension_numbers = #tpu.dot_dimension_numbers<[1], [0], [0], [1], [0, 0, 1, 1], [], []>} : vector<8x8xbf16>, vector<8x32xbf16>, vector<8x32xf32> -> vector<8x32xf32>
    %417 = vector.extract_strided_slice %377 {offsets = [8, 0], sizes = [8, 32], strides = [1, 1]} : vector<16x32xf32> to vector<8x32xf32>
    %418 = arith.truncf %417 : vector<8x32xf32> to vector<8x32xbf16>
    %cst_128 = arith.constant dense<0.000000e+00> : vector<8x32xf32>
    %419 = tpu.matmul %383, %418, %cst_128 {dimension_numbers = #tpu.dot_dimension_numbers<[1], [0], [0], [1], [0, 0, 1, 1], [], []>} : vector<8x8xbf16>, vector<8x32xbf16>, vector<8x32xf32> -> vector<8x32xf32>
    %420 = tpu.concatenate %416, %419 in 0 : vector<8x32xf32>, vector<8x32xf32> -> vector<16x32xf32>
    %421 = arith.truncf %420 : vector<16x32xf32> to vector<16x32xbf16>
    %cst_129 = arith.constant dense<0.000000e+00> : vector<16x32xf32>
    %422 = tpu.matmul %421, %4, %cst_129 {dimension_numbers = #tpu.dot_dimension_numbers<[1], [0], [0], [1], [0, 0, 1, 1], [], []>} : vector<16x32xbf16>, vector<32x32xbf16>, vector<16x32xf32> -> vector<16x32xf32>
    %423 = arith.addf %422, %17 : vector<16x32xf32>
    %cst_130 = arith.constant 0.000000e+00 : f32
    %424 = vector.broadcast %cst_130 : f32 to vector<16x32xf32>
    %425 = arith.maximumf %423, %424 : vector<16x32xf32>
    %426 = vector.extract_strided_slice %377 {offsets = [0, 0], sizes = [8, 32], strides = [1, 1]} : vector<16x32xf32> to vector<8x32xf32>
    %427 = arith.truncf %426 : vector<8x32xf32> to vector<8x32xbf16>
    %cst_131 = arith.constant dense<0.000000e+00> : vector<8x32xf32>
    %428 = tpu.matmul %386, %427, %cst_131 {dimension_numbers = #tpu.dot_dimension_numbers<[1], [0], [0], [1], [0, 0, 1, 1], [], []>} : vector<8x8xbf16>, vector<8x32xbf16>, vector<8x32xf32> -> vector<8x32xf32>
    %429 = vector.extract_strided_slice %377 {offsets = [8, 0], sizes = [8, 32], strides = [1, 1]} : vector<16x32xf32> to vector<8x32xf32>
    %430 = arith.truncf %429 : vector<8x32xf32> to vector<8x32xbf16>
    %cst_132 = arith.constant dense<0.000000e+00> : vector<8x32xf32>
    %431 = tpu.matmul %386, %430, %cst_132 {dimension_numbers = #tpu.dot_dimension_numbers<[1], [0], [0], [1], [0, 0, 1, 1], [], []>} : vector<8x8xbf16>, vector<8x32xbf16>, vector<8x32xf32> -> vector<8x32xf32>
    %432 = tpu.concatenate %428, %431 in 0 : vector<8x32xf32>, vector<8x32xf32> -> vector<16x32xf32>
    %433 = arith.truncf %432 : vector<16x32xf32> to vector<16x32xbf16>
    %cst_133 = arith.constant dense<0.000000e+00> : vector<16x32xf32>
    %434 = tpu.matmul %433, %5, %cst_133 {dimension_numbers = #tpu.dot_dimension_numbers<[1], [0], [0], [1], [0, 0, 1, 1], [], []>} : vector<16x32xbf16>, vector<32x32xbf16>, vector<16x32xf32> -> vector<16x32xf32>
    %435 = arith.addf %434, %20 : vector<16x32xf32>
    %cst_134 = arith.constant 0.000000e+00 : f32
    %436 = vector.broadcast %cst_134 : f32 to vector<16x32xf32>
    %437 = arith.maximumf %435, %436 : vector<16x32xf32>
    %438 = arith.truncf %425 : vector<16x32xf32> to vector<16x32xbf16>
    %cst_135 = arith.constant dense<0.000000e+00> : vector<16x32xf32>
    %439 = tpu.matmul %438, %6, %cst_135 {dimension_numbers = #tpu.dot_dimension_numbers<[1], [0], [0], [1], [0, 0, 1, 1], [], []>} : vector<16x32xbf16>, vector<32x32xbf16>, vector<16x32xf32> -> vector<16x32xf32>
    %440 = arith.truncf %437 : vector<16x32xf32> to vector<16x32xbf16>
    %cst_136 = arith.constant dense<0.000000e+00> : vector<16x32xf32>
    %441 = tpu.matmul %440, %7, %cst_136 {dimension_numbers = #tpu.dot_dimension_numbers<[1], [0], [0], [1], [0, 0, 1, 1], [], []>} : vector<16x32xbf16>, vector<32x32xbf16>, vector<16x32xf32> -> vector<16x32xf32>
    %442 = arith.addf %439, %441 : vector<16x32xf32>
    %443 = arith.addf %442, %23 : vector<16x32xf32>
    %444 = arith.truncf %406 : vector<16x2xf32> to vector<16x2xbf16>
    %cst_137 = arith.constant dense<0.000000e+00> : vector<16x96xf32>
    %445 = tpu.matmul %444, %9, %cst_137 {dimension_numbers = #tpu.dot_dimension_numbers<[1], [0], [0], [1], [0, 0, 1, 1], [], []>} : vector<16x2xbf16>, vector<2x96xbf16>, vector<16x96xf32> -> vector<16x96xf32>
    %446 = arith.truncf %413 : vector<16x2xf32> to vector<16x2xbf16>
    %cst_138 = arith.constant dense<0.000000e+00> : vector<16x96xf32>
    %447 = tpu.matmul %446, %10, %cst_138 {dimension_numbers = #tpu.dot_dimension_numbers<[1], [0], [0], [1], [0, 0, 1, 1], [], []>} : vector<16x2xbf16>, vector<2x96xbf16>, vector<16x96xf32> -> vector<16x96xf32>
    %448 = arith.addf %445, %447 : vector<16x96xf32>
    %449 = arith.truncf %443 : vector<16x32xf32> to vector<16x32xbf16>
    %cst_139 = arith.constant dense<0.000000e+00> : vector<16x96xf32>
    %450 = tpu.matmul %449, %11, %cst_139 {dimension_numbers = #tpu.dot_dimension_numbers<[1], [0], [0], [1], [0, 0, 1, 1], [], []>} : vector<16x32xbf16>, vector<32x96xbf16>, vector<16x96xf32> -> vector<16x96xf32>
    %451 = vector.extract_strided_slice %448 {offsets = [0, 0], sizes = [16, 32], strides = [1, 1]} : vector<16x96xf32> to vector<16x32xf32>
    %452 = vector.extract_strided_slice %450 {offsets = [0, 0], sizes = [16, 32], strides = [1, 1]} : vector<16x96xf32> to vector<16x32xf32>
    %453 = arith.addf %451, %452 : vector<16x32xf32>
    %454 = arith.addf %453, %26 : vector<16x32xf32>
    %455 = arith.negf %454 : vector<16x32xf32>
    %456 = math.exp %455 : vector<16x32xf32>
    %cst_140 = arith.constant 1.000000e+00 : f32
    %457 = vector.broadcast %cst_140 : f32 to vector<16x32xf32>
    %458 = arith.addf %457, %456 : vector<16x32xf32>
    %459 = arith.divf %457, %458 : vector<16x32xf32>
    %460 = vector.extract_strided_slice %448 {offsets = [0, 32], sizes = [16, 32], strides = [1, 1]} : vector<16x96xf32> to vector<16x32xf32>
    %461 = vector.extract_strided_slice %450 {offsets = [0, 32], sizes = [16, 32], strides = [1, 1]} : vector<16x96xf32> to vector<16x32xf32>
    %462 = arith.addf %460, %461 : vector<16x32xf32>
    %463 = arith.addf %462, %29 : vector<16x32xf32>
    %464 = arith.negf %463 : vector<16x32xf32>
    %465 = math.exp %464 : vector<16x32xf32>
    %cst_141 = arith.constant 1.000000e+00 : f32
    %466 = vector.broadcast %cst_141 : f32 to vector<16x32xf32>
    %467 = arith.addf %466, %465 : vector<16x32xf32>
    %468 = arith.divf %466, %467 : vector<16x32xf32>
    %469 = vector.extract_strided_slice %448 {offsets = [0, 64], sizes = [16, 32], strides = [1, 1]} : vector<16x96xf32> to vector<16x32xf32>
    %470 = arith.addf %469, %32 : vector<16x32xf32>
    %471 = vector.extract_strided_slice %450 {offsets = [0, 64], sizes = [16, 32], strides = [1, 1]} : vector<16x96xf32> to vector<16x32xf32>
    %472 = arith.addf %471, %35 : vector<16x32xf32>
    %473 = arith.mulf %459, %472 : vector<16x32xf32>
    %474 = arith.addf %470, %473 : vector<16x32xf32>
    %475 = math.tanh %474 : vector<16x32xf32>
    %cst_142 = arith.constant 1.000000e+00 : f32
    %476 = vector.broadcast %cst_142 : f32 to vector<16x32xf32>
    %477 = arith.subf %476, %468 : vector<16x32xf32>
    %478 = arith.mulf %477, %475 : vector<16x32xf32>
    %479 = arith.mulf %468, %443 : vector<16x32xf32>
    %480 = arith.addf %478, %479 : vector<16x32xf32>
    %c4 = arith.constant 4 : index
    %c0_143 = arith.constant 0 : index
    %c0_144 = arith.constant 0 : index
    %c0_145 = arith.constant 0 : index
    %481 = vector.load %arg1[%c4, %c0_143, %c0_144, %c0_145] : memref<8x2x8x6xf32, #tpu.memory_space<vmem>>, vector<1x2x8x6xf32>
    %482 = vector.shape_cast %481 : vector<1x2x8x6xf32> to vector<2x8x6xf32>
    %483 = vector.shape_cast %482 : vector<2x8x6xf32> to vector<16x6xf32>
    %c4_146 = arith.constant 4 : index
    %c0_147 = arith.constant 0 : index
    %c0_148 = arith.constant 0 : index
    %484 = vector.load %arg2[%c4_146, %c0_147, %c0_148] : memref<8x8x8xf32, #tpu.memory_space<vmem>>, vector<1x8x8xf32>
    %485 = vector.shape_cast %484 : vector<1x8x8xf32> to vector<8x8xf32>
    %486 = arith.truncf %485 : vector<8x8xf32> to vector<8x8xbf16>
    %c4_149 = arith.constant 4 : index
    %c0_150 = arith.constant 0 : index
    %c0_151 = arith.constant 0 : index
    %487 = vector.load %arg3[%c4_149, %c0_150, %c0_151] : memref<8x8x8xf32, #tpu.memory_space<vmem>>, vector<1x8x8xf32>
    %488 = vector.shape_cast %487 : vector<1x8x8xf32> to vector<8x8xf32>
    %489 = arith.truncf %488 : vector<8x8xf32> to vector<8x8xbf16>
    %490 = vector.extract_strided_slice %483 {offsets = [0, 0], sizes = [16, 2], strides = [1, 1]} : vector<16x6xf32> to vector<16x2xf32>
    %491 = vector.extract_strided_slice %483 {offsets = [0, 2], sizes = [16, 4], strides = [1, 1]} : vector<16x6xf32> to vector<16x4xf32>
    %492 = arith.mulf %491, %38 : vector<16x4xf32>
    %cst_152 = arith.constant dense<0.000000e+00> : vector<16xf32>
    %493 = vector.multi_reduction <add>, %492, %cst_152 [1] : vector<16x4xf32> to vector<16xf32>
    %494 = vector.shape_cast %493 : vector<16xf32> to vector<16x1xf32>
    %495 = arith.addf %494, %41 : vector<16x1xf32>
    %496 = arith.negf %495 : vector<16x1xf32>
    %497 = math.exp %496 : vector<16x1xf32>
    %cst_153 = arith.constant 1.000000e+00 : f32
    %498 = vector.broadcast %cst_153 : f32 to vector<16x1xf32>
    %499 = arith.addf %498, %497 : vector<16x1xf32>
    %500 = arith.divf %498, %499 : vector<16x1xf32>
    %501 = vector.broadcast %500 : vector<16x1xf32> to vector<16x2xf32>
    %502 = arith.mulf %501, %490 : vector<16x2xf32>
    %503 = vector.extract_strided_slice %502 {offsets = [0, 0], sizes = [8, 2], strides = [1, 1]} : vector<16x2xf32> to vector<8x2xf32>
    %504 = arith.truncf %503 : vector<8x2xf32> to vector<8x2xbf16>
    %cst_154 = arith.constant dense<0.000000e+00> : vector<8x2xf32>
    %505 = tpu.matmul %486, %504, %cst_154 {dimension_numbers = #tpu.dot_dimension_numbers<[1], [0], [0], [1], [0, 0, 1, 1], [], []>} : vector<8x8xbf16>, vector<8x2xbf16>, vector<8x2xf32> -> vector<8x2xf32>
    %506 = vector.extract_strided_slice %502 {offsets = [8, 0], sizes = [8, 2], strides = [1, 1]} : vector<16x2xf32> to vector<8x2xf32>
    %507 = arith.truncf %506 : vector<8x2xf32> to vector<8x2xbf16>
    %cst_155 = arith.constant dense<0.000000e+00> : vector<8x2xf32>
    %508 = tpu.matmul %486, %507, %cst_155 {dimension_numbers = #tpu.dot_dimension_numbers<[1], [0], [0], [1], [0, 0, 1, 1], [], []>} : vector<8x8xbf16>, vector<8x2xbf16>, vector<8x2xf32> -> vector<8x2xf32>
    %509 = tpu.concatenate %505, %508 in 0 : vector<8x2xf32>, vector<8x2xf32> -> vector<16x2xf32>
    %510 = vector.extract_strided_slice %502 {offsets = [0, 0], sizes = [8, 2], strides = [1, 1]} : vector<16x2xf32> to vector<8x2xf32>
    %511 = arith.truncf %510 : vector<8x2xf32> to vector<8x2xbf16>
    %cst_156 = arith.constant dense<0.000000e+00> : vector<8x2xf32>
    %512 = tpu.matmul %489, %511, %cst_156 {dimension_numbers = #tpu.dot_dimension_numbers<[1], [0], [0], [1], [0, 0, 1, 1], [], []>} : vector<8x8xbf16>, vector<8x2xbf16>, vector<8x2xf32> -> vector<8x2xf32>
    %513 = vector.extract_strided_slice %502 {offsets = [8, 0], sizes = [8, 2], strides = [1, 1]} : vector<16x2xf32> to vector<8x2xf32>
    %514 = arith.truncf %513 : vector<8x2xf32> to vector<8x2xbf16>
    %cst_157 = arith.constant dense<0.000000e+00> : vector<8x2xf32>
    %515 = tpu.matmul %489, %514, %cst_157 {dimension_numbers = #tpu.dot_dimension_numbers<[1], [0], [0], [1], [0, 0, 1, 1], [], []>} : vector<8x8xbf16>, vector<8x2xbf16>, vector<8x2xf32> -> vector<8x2xf32>
    %516 = tpu.concatenate %512, %515 in 0 : vector<8x2xf32>, vector<8x2xf32> -> vector<16x2xf32>
    %517 = vector.extract_strided_slice %480 {offsets = [0, 0], sizes = [8, 32], strides = [1, 1]} : vector<16x32xf32> to vector<8x32xf32>
    %518 = arith.truncf %517 : vector<8x32xf32> to vector<8x32xbf16>
    %cst_158 = arith.constant dense<0.000000e+00> : vector<8x32xf32>
    %519 = tpu.matmul %486, %518, %cst_158 {dimension_numbers = #tpu.dot_dimension_numbers<[1], [0], [0], [1], [0, 0, 1, 1], [], []>} : vector<8x8xbf16>, vector<8x32xbf16>, vector<8x32xf32> -> vector<8x32xf32>
    %520 = vector.extract_strided_slice %480 {offsets = [8, 0], sizes = [8, 32], strides = [1, 1]} : vector<16x32xf32> to vector<8x32xf32>
    %521 = arith.truncf %520 : vector<8x32xf32> to vector<8x32xbf16>
    %cst_159 = arith.constant dense<0.000000e+00> : vector<8x32xf32>
    %522 = tpu.matmul %486, %521, %cst_159 {dimension_numbers = #tpu.dot_dimension_numbers<[1], [0], [0], [1], [0, 0, 1, 1], [], []>} : vector<8x8xbf16>, vector<8x32xbf16>, vector<8x32xf32> -> vector<8x32xf32>
    %523 = tpu.concatenate %519, %522 in 0 : vector<8x32xf32>, vector<8x32xf32> -> vector<16x32xf32>
    %524 = arith.truncf %523 : vector<16x32xf32> to vector<16x32xbf16>
    %cst_160 = arith.constant dense<0.000000e+00> : vector<16x32xf32>
    %525 = tpu.matmul %524, %4, %cst_160 {dimension_numbers = #tpu.dot_dimension_numbers<[1], [0], [0], [1], [0, 0, 1, 1], [], []>} : vector<16x32xbf16>, vector<32x32xbf16>, vector<16x32xf32> -> vector<16x32xf32>
    %526 = arith.addf %525, %17 : vector<16x32xf32>
    %cst_161 = arith.constant 0.000000e+00 : f32
    %527 = vector.broadcast %cst_161 : f32 to vector<16x32xf32>
    %528 = arith.maximumf %526, %527 : vector<16x32xf32>
    %529 = vector.extract_strided_slice %480 {offsets = [0, 0], sizes = [8, 32], strides = [1, 1]} : vector<16x32xf32> to vector<8x32xf32>
    %530 = arith.truncf %529 : vector<8x32xf32> to vector<8x32xbf16>
    %cst_162 = arith.constant dense<0.000000e+00> : vector<8x32xf32>
    %531 = tpu.matmul %489, %530, %cst_162 {dimension_numbers = #tpu.dot_dimension_numbers<[1], [0], [0], [1], [0, 0, 1, 1], [], []>} : vector<8x8xbf16>, vector<8x32xbf16>, vector<8x32xf32> -> vector<8x32xf32>
    %532 = vector.extract_strided_slice %480 {offsets = [8, 0], sizes = [8, 32], strides = [1, 1]} : vector<16x32xf32> to vector<8x32xf32>
    %533 = arith.truncf %532 : vector<8x32xf32> to vector<8x32xbf16>
    %cst_163 = arith.constant dense<0.000000e+00> : vector<8x32xf32>
    %534 = tpu.matmul %489, %533, %cst_163 {dimension_numbers = #tpu.dot_dimension_numbers<[1], [0], [0], [1], [0, 0, 1, 1], [], []>} : vector<8x8xbf16>, vector<8x32xbf16>, vector<8x32xf32> -> vector<8x32xf32>
    %535 = tpu.concatenate %531, %534 in 0 : vector<8x32xf32>, vector<8x32xf32> -> vector<16x32xf32>
    %536 = arith.truncf %535 : vector<16x32xf32> to vector<16x32xbf16>
    %cst_164 = arith.constant dense<0.000000e+00> : vector<16x32xf32>
    %537 = tpu.matmul %536, %5, %cst_164 {dimension_numbers = #tpu.dot_dimension_numbers<[1], [0], [0], [1], [0, 0, 1, 1], [], []>} : vector<16x32xbf16>, vector<32x32xbf16>, vector<16x32xf32> -> vector<16x32xf32>
    %538 = arith.addf %537, %20 : vector<16x32xf32>
    %cst_165 = arith.constant 0.000000e+00 : f32
    %539 = vector.broadcast %cst_165 : f32 to vector<16x32xf32>
    %540 = arith.maximumf %538, %539 : vector<16x32xf32>
    %541 = arith.truncf %528 : vector<16x32xf32> to vector<16x32xbf16>
    %cst_166 = arith.constant dense<0.000000e+00> : vector<16x32xf32>
    %542 = tpu.matmul %541, %6, %cst_166 {dimension_numbers = #tpu.dot_dimension_numbers<[1], [0], [0], [1], [0, 0, 1, 1], [], []>} : vector<16x32xbf16>, vector<32x32xbf16>, vector<16x32xf32> -> vector<16x32xf32>
    %543 = arith.truncf %540 : vector<16x32xf32> to vector<16x32xbf16>
    %cst_167 = arith.constant dense<0.000000e+00> : vector<16x32xf32>
    %544 = tpu.matmul %543, %7, %cst_167 {dimension_numbers = #tpu.dot_dimension_numbers<[1], [0], [0], [1], [0, 0, 1, 1], [], []>} : vector<16x32xbf16>, vector<32x32xbf16>, vector<16x32xf32> -> vector<16x32xf32>
    %545 = arith.addf %542, %544 : vector<16x32xf32>
    %546 = arith.addf %545, %23 : vector<16x32xf32>
    %547 = arith.truncf %509 : vector<16x2xf32> to vector<16x2xbf16>
    %cst_168 = arith.constant dense<0.000000e+00> : vector<16x96xf32>
    %548 = tpu.matmul %547, %9, %cst_168 {dimension_numbers = #tpu.dot_dimension_numbers<[1], [0], [0], [1], [0, 0, 1, 1], [], []>} : vector<16x2xbf16>, vector<2x96xbf16>, vector<16x96xf32> -> vector<16x96xf32>
    %549 = arith.truncf %516 : vector<16x2xf32> to vector<16x2xbf16>
    %cst_169 = arith.constant dense<0.000000e+00> : vector<16x96xf32>
    %550 = tpu.matmul %549, %10, %cst_169 {dimension_numbers = #tpu.dot_dimension_numbers<[1], [0], [0], [1], [0, 0, 1, 1], [], []>} : vector<16x2xbf16>, vector<2x96xbf16>, vector<16x96xf32> -> vector<16x96xf32>
    %551 = arith.addf %548, %550 : vector<16x96xf32>
    %552 = arith.truncf %546 : vector<16x32xf32> to vector<16x32xbf16>
    %cst_170 = arith.constant dense<0.000000e+00> : vector<16x96xf32>
    %553 = tpu.matmul %552, %11, %cst_170 {dimension_numbers = #tpu.dot_dimension_numbers<[1], [0], [0], [1], [0, 0, 1, 1], [], []>} : vector<16x32xbf16>, vector<32x96xbf16>, vector<16x96xf32> -> vector<16x96xf32>
    %554 = vector.extract_strided_slice %551 {offsets = [0, 0], sizes = [16, 32], strides = [1, 1]} : vector<16x96xf32> to vector<16x32xf32>
    %555 = vector.extract_strided_slice %553 {offsets = [0, 0], sizes = [16, 32], strides = [1, 1]} : vector<16x96xf32> to vector<16x32xf32>
    %556 = arith.addf %554, %555 : vector<16x32xf32>
    %557 = arith.addf %556, %26 : vector<16x32xf32>
    %558 = arith.negf %557 : vector<16x32xf32>
    %559 = math.exp %558 : vector<16x32xf32>
    %cst_171 = arith.constant 1.000000e+00 : f32
    %560 = vector.broadcast %cst_171 : f32 to vector<16x32xf32>
    %561 = arith.addf %560, %559 : vector<16x32xf32>
    %562 = arith.divf %560, %561 : vector<16x32xf32>
    %563 = vector.extract_strided_slice %551 {offsets = [0, 32], sizes = [16, 32], strides = [1, 1]} : vector<16x96xf32> to vector<16x32xf32>
    %564 = vector.extract_strided_slice %553 {offsets = [0, 32], sizes = [16, 32], strides = [1, 1]} : vector<16x96xf32> to vector<16x32xf32>
    %565 = arith.addf %563, %564 : vector<16x32xf32>
    %566 = arith.addf %565, %29 : vector<16x32xf32>
    %567 = arith.negf %566 : vector<16x32xf32>
    %568 = math.exp %567 : vector<16x32xf32>
    %cst_172 = arith.constant 1.000000e+00 : f32
    %569 = vector.broadcast %cst_172 : f32 to vector<16x32xf32>
    %570 = arith.addf %569, %568 : vector<16x32xf32>
    %571 = arith.divf %569, %570 : vector<16x32xf32>
    %572 = vector.extract_strided_slice %551 {offsets = [0, 64], sizes = [16, 32], strides = [1, 1]} : vector<16x96xf32> to vector<16x32xf32>
    %573 = arith.addf %572, %32 : vector<16x32xf32>
    %574 = vector.extract_strided_slice %553 {offsets = [0, 64], sizes = [16, 32], strides = [1, 1]} : vector<16x96xf32> to vector<16x32xf32>
    %575 = arith.addf %574, %35 : vector<16x32xf32>
    %576 = arith.mulf %562, %575 : vector<16x32xf32>
    %577 = arith.addf %573, %576 : vector<16x32xf32>
    %578 = math.tanh %577 : vector<16x32xf32>
    %cst_173 = arith.constant 1.000000e+00 : f32
    %579 = vector.broadcast %cst_173 : f32 to vector<16x32xf32>
    %580 = arith.subf %579, %571 : vector<16x32xf32>
    %581 = arith.mulf %580, %578 : vector<16x32xf32>
    %582 = arith.mulf %571, %546 : vector<16x32xf32>
    %583 = arith.addf %581, %582 : vector<16x32xf32>
    %584 = arith.truncf %583 : vector<16x32xf32> to vector<16x32xbf16>
    %cst_174 = arith.constant dense<0.000000e+00> : vector<16x2xf32>
    %585 = tpu.matmul %584, %8, %cst_174 {dimension_numbers = #tpu.dot_dimension_numbers<[1], [0], [0], [1], [0, 0, 1, 1], [], []>} : vector<16x32xbf16>, vector<32x2xbf16>, vector<16x2xf32> -> vector<16x2xf32>
    %586 = arith.addf %585, %44 : vector<16x2xf32>
    %c5 = arith.constant 5 : index
    %c0_175 = arith.constant 0 : index
    %c0_176 = arith.constant 0 : index
    %c0_177 = arith.constant 0 : index
    %587 = vector.load %arg1[%c5, %c0_175, %c0_176, %c0_177] : memref<8x2x8x6xf32, #tpu.memory_space<vmem>>, vector<1x2x8x6xf32>
    %588 = vector.shape_cast %587 : vector<1x2x8x6xf32> to vector<2x8x6xf32>
    %589 = vector.extract_strided_slice %588 {offsets = [0, 0, 0], sizes = [2, 8, 2], strides = [1, 1, 1]} : vector<2x8x6xf32> to vector<2x8x2xf32>
    %590 = arith.mulf %48, %589 : vector<2x8x2xf32>
    %591 = vector.shape_cast %586 : vector<16x2xf32> to vector<2x8x2xf32>
    %592 = arith.mulf %50, %591 : vector<2x8x2xf32>
    %593 = arith.addf %590, %592 : vector<2x8x2xf32>
    %c5_178 = arith.constant 5 : index
    %c0_179 = arith.constant 0 : index
    %c0_180 = arith.constant 0 : index
    %c0_181 = arith.constant 0 : index
    %594 = vector.load %arg1[%c5_178, %c0_179, %c0_180, %c0_181] : memref<8x2x8x6xf32, #tpu.memory_space<vmem>>, vector<1x2x8x6xf32>
    %595 = vector.shape_cast %594 : vector<1x2x8x6xf32> to vector<2x8x6xf32>
    %596 = vector.shape_cast %595 : vector<2x8x6xf32> to vector<16x6xf32>
    %c5_182 = arith.constant 5 : index
    %c0_183 = arith.constant 0 : index
    %c0_184 = arith.constant 0 : index
    %597 = vector.load %arg2[%c5_182, %c0_183, %c0_184] : memref<8x8x8xf32, #tpu.memory_space<vmem>>, vector<1x8x8xf32>
    %598 = vector.shape_cast %597 : vector<1x8x8xf32> to vector<8x8xf32>
    %599 = arith.truncf %598 : vector<8x8xf32> to vector<8x8xbf16>
    %c5_185 = arith.constant 5 : index
    %c0_186 = arith.constant 0 : index
    %c0_187 = arith.constant 0 : index
    %600 = vector.load %arg3[%c5_185, %c0_186, %c0_187] : memref<8x8x8xf32, #tpu.memory_space<vmem>>, vector<1x8x8xf32>
    %601 = vector.shape_cast %600 : vector<1x8x8xf32> to vector<8x8xf32>
    %602 = arith.truncf %601 : vector<8x8xf32> to vector<8x8xbf16>
    %603 = vector.extract_strided_slice %596 {offsets = [0, 0], sizes = [16, 2], strides = [1, 1]} : vector<16x6xf32> to vector<16x2xf32>
    %604 = vector.extract_strided_slice %596 {offsets = [0, 2], sizes = [16, 4], strides = [1, 1]} : vector<16x6xf32> to vector<16x4xf32>
    %605 = arith.mulf %604, %38 : vector<16x4xf32>
    %cst_188 = arith.constant dense<0.000000e+00> : vector<16xf32>
    %606 = vector.multi_reduction <add>, %605, %cst_188 [1] : vector<16x4xf32> to vector<16xf32>
    %607 = vector.shape_cast %606 : vector<16xf32> to vector<16x1xf32>
    %608 = arith.addf %607, %41 : vector<16x1xf32>
    %609 = arith.negf %608 : vector<16x1xf32>
    %610 = math.exp %609 : vector<16x1xf32>
    %cst_189 = arith.constant 1.000000e+00 : f32
    %611 = vector.broadcast %cst_189 : f32 to vector<16x1xf32>
    %612 = arith.addf %611, %610 : vector<16x1xf32>
    %613 = arith.divf %611, %612 : vector<16x1xf32>
    %614 = vector.broadcast %613 : vector<16x1xf32> to vector<16x2xf32>
    %615 = arith.mulf %614, %603 : vector<16x2xf32>
    %616 = vector.extract_strided_slice %615 {offsets = [0, 0], sizes = [8, 2], strides = [1, 1]} : vector<16x2xf32> to vector<8x2xf32>
    %617 = arith.truncf %616 : vector<8x2xf32> to vector<8x2xbf16>
    %cst_190 = arith.constant dense<0.000000e+00> : vector<8x2xf32>
    %618 = tpu.matmul %599, %617, %cst_190 {dimension_numbers = #tpu.dot_dimension_numbers<[1], [0], [0], [1], [0, 0, 1, 1], [], []>} : vector<8x8xbf16>, vector<8x2xbf16>, vector<8x2xf32> -> vector<8x2xf32>
    %619 = vector.extract_strided_slice %615 {offsets = [8, 0], sizes = [8, 2], strides = [1, 1]} : vector<16x2xf32> to vector<8x2xf32>
    %620 = arith.truncf %619 : vector<8x2xf32> to vector<8x2xbf16>
    %cst_191 = arith.constant dense<0.000000e+00> : vector<8x2xf32>
    %621 = tpu.matmul %599, %620, %cst_191 {dimension_numbers = #tpu.dot_dimension_numbers<[1], [0], [0], [1], [0, 0, 1, 1], [], []>} : vector<8x8xbf16>, vector<8x2xbf16>, vector<8x2xf32> -> vector<8x2xf32>
    %622 = tpu.concatenate %618, %621 in 0 : vector<8x2xf32>, vector<8x2xf32> -> vector<16x2xf32>
    %623 = vector.extract_strided_slice %615 {offsets = [0, 0], sizes = [8, 2], strides = [1, 1]} : vector<16x2xf32> to vector<8x2xf32>
    %624 = arith.truncf %623 : vector<8x2xf32> to vector<8x2xbf16>
    %cst_192 = arith.constant dense<0.000000e+00> : vector<8x2xf32>
    %625 = tpu.matmul %602, %624, %cst_192 {dimension_numbers = #tpu.dot_dimension_numbers<[1], [0], [0], [1], [0, 0, 1, 1], [], []>} : vector<8x8xbf16>, vector<8x2xbf16>, vector<8x2xf32> -> vector<8x2xf32>
    %626 = vector.extract_strided_slice %615 {offsets = [8, 0], sizes = [8, 2], strides = [1, 1]} : vector<16x2xf32> to vector<8x2xf32>
    %627 = arith.truncf %626 : vector<8x2xf32> to vector<8x2xbf16>
    %cst_193 = arith.constant dense<0.000000e+00> : vector<8x2xf32>
    %628 = tpu.matmul %602, %627, %cst_193 {dimension_numbers = #tpu.dot_dimension_numbers<[1], [0], [0], [1], [0, 0, 1, 1], [], []>} : vector<8x8xbf16>, vector<8x2xbf16>, vector<8x2xf32> -> vector<8x2xf32>
    %629 = tpu.concatenate %625, %628 in 0 : vector<8x2xf32>, vector<8x2xf32> -> vector<16x2xf32>
    %630 = vector.extract_strided_slice %583 {offsets = [0, 0], sizes = [8, 32], strides = [1, 1]} : vector<16x32xf32> to vector<8x32xf32>
    %631 = arith.truncf %630 : vector<8x32xf32> to vector<8x32xbf16>
    %cst_194 = arith.constant dense<0.000000e+00> : vector<8x32xf32>
    %632 = tpu.matmul %599, %631, %cst_194 {dimension_numbers = #tpu.dot_dimension_numbers<[1], [0], [0], [1], [0, 0, 1, 1], [], []>} : vector<8x8xbf16>, vector<8x32xbf16>, vector<8x32xf32> -> vector<8x32xf32>
    %633 = vector.extract_strided_slice %583 {offsets = [8, 0], sizes = [8, 32], strides = [1, 1]} : vector<16x32xf32> to vector<8x32xf32>
    %634 = arith.truncf %633 : vector<8x32xf32> to vector<8x32xbf16>
    %cst_195 = arith.constant dense<0.000000e+00> : vector<8x32xf32>
    %635 = tpu.matmul %599, %634, %cst_195 {dimension_numbers = #tpu.dot_dimension_numbers<[1], [0], [0], [1], [0, 0, 1, 1], [], []>} : vector<8x8xbf16>, vector<8x32xbf16>, vector<8x32xf32> -> vector<8x32xf32>
    %636 = tpu.concatenate %632, %635 in 0 : vector<8x32xf32>, vector<8x32xf32> -> vector<16x32xf32>
    %637 = arith.truncf %636 : vector<16x32xf32> to vector<16x32xbf16>
    %cst_196 = arith.constant dense<0.000000e+00> : vector<16x32xf32>
    %638 = tpu.matmul %637, %4, %cst_196 {dimension_numbers = #tpu.dot_dimension_numbers<[1], [0], [0], [1], [0, 0, 1, 1], [], []>} : vector<16x32xbf16>, vector<32x32xbf16>, vector<16x32xf32> -> vector<16x32xf32>
    %639 = arith.addf %638, %17 : vector<16x32xf32>
    %cst_197 = arith.constant 0.000000e+00 : f32
    %640 = vector.broadcast %cst_197 : f32 to vector<16x32xf32>
    %641 = arith.maximumf %639, %640 : vector<16x32xf32>
    %642 = vector.extract_strided_slice %583 {offsets = [0, 0], sizes = [8, 32], strides = [1, 1]} : vector<16x32xf32> to vector<8x32xf32>
    %643 = arith.truncf %642 : vector<8x32xf32> to vector<8x32xbf16>
    %cst_198 = arith.constant dense<0.000000e+00> : vector<8x32xf32>
    %644 = tpu.matmul %602, %643, %cst_198 {dimension_numbers = #tpu.dot_dimension_numbers<[1], [0], [0], [1], [0, 0, 1, 1], [], []>} : vector<8x8xbf16>, vector<8x32xbf16>, vector<8x32xf32> -> vector<8x32xf32>
    %645 = vector.extract_strided_slice %583 {offsets = [8, 0], sizes = [8, 32], strides = [1, 1]} : vector<16x32xf32> to vector<8x32xf32>
    %646 = arith.truncf %645 : vector<8x32xf32> to vector<8x32xbf16>
    %cst_199 = arith.constant dense<0.000000e+00> : vector<8x32xf32>
    %647 = tpu.matmul %602, %646, %cst_199 {dimension_numbers = #tpu.dot_dimension_numbers<[1], [0], [0], [1], [0, 0, 1, 1], [], []>} : vector<8x8xbf16>, vector<8x32xbf16>, vector<8x32xf32> -> vector<8x32xf32>
    %648 = tpu.concatenate %644, %647 in 0 : vector<8x32xf32>, vector<8x32xf32> -> vector<16x32xf32>
    %649 = arith.truncf %648 : vector<16x32xf32> to vector<16x32xbf16>
    %cst_200 = arith.constant dense<0.000000e+00> : vector<16x32xf32>
    %650 = tpu.matmul %649, %5, %cst_200 {dimension_numbers = #tpu.dot_dimension_numbers<[1], [0], [0], [1], [0, 0, 1, 1], [], []>} : vector<16x32xbf16>, vector<32x32xbf16>, vector<16x32xf32> -> vector<16x32xf32>
    %651 = arith.addf %650, %20 : vector<16x32xf32>
    %cst_201 = arith.constant 0.000000e+00 : f32
    %652 = vector.broadcast %cst_201 : f32 to vector<16x32xf32>
    %653 = arith.maximumf %651, %652 : vector<16x32xf32>
    %654 = arith.truncf %641 : vector<16x32xf32> to vector<16x32xbf16>
    %cst_202 = arith.constant dense<0.000000e+00> : vector<16x32xf32>
    %655 = tpu.matmul %654, %6, %cst_202 {dimension_numbers = #tpu.dot_dimension_numbers<[1], [0], [0], [1], [0, 0, 1, 1], [], []>} : vector<16x32xbf16>, vector<32x32xbf16>, vector<16x32xf32> -> vector<16x32xf32>
    %656 = arith.truncf %653 : vector<16x32xf32> to vector<16x32xbf16>
    %cst_203 = arith.constant dense<0.000000e+00> : vector<16x32xf32>
    %657 = tpu.matmul %656, %7, %cst_203 {dimension_numbers = #tpu.dot_dimension_numbers<[1], [0], [0], [1], [0, 0, 1, 1], [], []>} : vector<16x32xbf16>, vector<32x32xbf16>, vector<16x32xf32> -> vector<16x32xf32>
    %658 = arith.addf %655, %657 : vector<16x32xf32>
    %659 = arith.addf %658, %23 : vector<16x32xf32>
    %660 = arith.truncf %622 : vector<16x2xf32> to vector<16x2xbf16>
    %cst_204 = arith.constant dense<0.000000e+00> : vector<16x96xf32>
    %661 = tpu.matmul %660, %9, %cst_204 {dimension_numbers = #tpu.dot_dimension_numbers<[1], [0], [0], [1], [0, 0, 1, 1], [], []>} : vector<16x2xbf16>, vector<2x96xbf16>, vector<16x96xf32> -> vector<16x96xf32>
    %662 = arith.truncf %629 : vector<16x2xf32> to vector<16x2xbf16>
    %cst_205 = arith.constant dense<0.000000e+00> : vector<16x96xf32>
    %663 = tpu.matmul %662, %10, %cst_205 {dimension_numbers = #tpu.dot_dimension_numbers<[1], [0], [0], [1], [0, 0, 1, 1], [], []>} : vector<16x2xbf16>, vector<2x96xbf16>, vector<16x96xf32> -> vector<16x96xf32>
    %664 = arith.addf %661, %663 : vector<16x96xf32>
    %665 = arith.truncf %659 : vector<16x32xf32> to vector<16x32xbf16>
    %cst_206 = arith.constant dense<0.000000e+00> : vector<16x96xf32>
    %666 = tpu.matmul %665, %11, %cst_206 {dimension_numbers = #tpu.dot_dimension_numbers<[1], [0], [0], [1], [0, 0, 1, 1], [], []>} : vector<16x32xbf16>, vector<32x96xbf16>, vector<16x96xf32> -> vector<16x96xf32>
    %667 = vector.extract_strided_slice %664 {offsets = [0, 0], sizes = [16, 32], strides = [1, 1]} : vector<16x96xf32> to vector<16x32xf32>
    %668 = vector.extract_strided_slice %666 {offsets = [0, 0], sizes = [16, 32], strides = [1, 1]} : vector<16x96xf32> to vector<16x32xf32>
    %669 = arith.addf %667, %668 : vector<16x32xf32>
    %670 = arith.addf %669, %26 : vector<16x32xf32>
    %671 = arith.negf %670 : vector<16x32xf32>
    %672 = math.exp %671 : vector<16x32xf32>
    %cst_207 = arith.constant 1.000000e+00 : f32
    %673 = vector.broadcast %cst_207 : f32 to vector<16x32xf32>
    %674 = arith.addf %673, %672 : vector<16x32xf32>
    %675 = arith.divf %673, %674 : vector<16x32xf32>
    %676 = vector.extract_strided_slice %664 {offsets = [0, 32], sizes = [16, 32], strides = [1, 1]} : vector<16x96xf32> to vector<16x32xf32>
    %677 = vector.extract_strided_slice %666 {offsets = [0, 32], sizes = [16, 32], strides = [1, 1]} : vector<16x96xf32> to vector<16x32xf32>
    %678 = arith.addf %676, %677 : vector<16x32xf32>
    %679 = arith.addf %678, %29 : vector<16x32xf32>
    %680 = arith.negf %679 : vector<16x32xf32>
    %681 = math.exp %680 : vector<16x32xf32>
    %cst_208 = arith.constant 1.000000e+00 : f32
    %682 = vector.broadcast %cst_208 : f32 to vector<16x32xf32>
    %683 = arith.addf %682, %681 : vector<16x32xf32>
    %684 = arith.divf %682, %683 : vector<16x32xf32>
    %685 = vector.extract_strided_slice %664 {offsets = [0, 64], sizes = [16, 32], strides = [1, 1]} : vector<16x96xf32> to vector<16x32xf32>
    %686 = arith.addf %685, %32 : vector<16x32xf32>
    %687 = vector.extract_strided_slice %666 {offsets = [0, 64], sizes = [16, 32], strides = [1, 1]} : vector<16x96xf32> to vector<16x32xf32>
    %688 = arith.addf %687, %35 : vector<16x32xf32>
    %689 = arith.mulf %675, %688 : vector<16x32xf32>
    %690 = arith.addf %686, %689 : vector<16x32xf32>
    %691 = math.tanh %690 : vector<16x32xf32>
    %cst_209 = arith.constant 1.000000e+00 : f32
    %692 = vector.broadcast %cst_209 : f32 to vector<16x32xf32>
    %693 = arith.subf %692, %684 : vector<16x32xf32>
    %694 = arith.mulf %693, %691 : vector<16x32xf32>
    %695 = arith.mulf %684, %659 : vector<16x32xf32>
    %696 = arith.addf %694, %695 : vector<16x32xf32>
    %697 = arith.truncf %696 : vector<16x32xf32> to vector<16x32xbf16>
    %cst_210 = arith.constant dense<0.000000e+00> : vector<16x2xf32>
    %698 = tpu.matmul %697, %8, %cst_210 {dimension_numbers = #tpu.dot_dimension_numbers<[1], [0], [0], [1], [0, 0, 1, 1], [], []>} : vector<16x32xbf16>, vector<32x2xbf16>, vector<16x2xf32> -> vector<16x2xf32>
    %699 = arith.addf %698, %44 : vector<16x2xf32>
    %c6 = arith.constant 6 : index
    %c0_211 = arith.constant 0 : index
    %c0_212 = arith.constant 0 : index
    %c0_213 = arith.constant 0 : index
    %700 = vector.load %arg1[%c6, %c0_211, %c0_212, %c0_213] : memref<8x2x8x6xf32, #tpu.memory_space<vmem>>, vector<1x2x8x6xf32>
    %701 = vector.shape_cast %700 : vector<1x2x8x6xf32> to vector<2x8x6xf32>
    %702 = vector.extract_strided_slice %701 {offsets = [0, 0, 0], sizes = [2, 8, 2], strides = [1, 1, 1]} : vector<2x8x6xf32> to vector<2x8x2xf32>
    %703 = arith.mulf %48, %702 : vector<2x8x2xf32>
    %704 = vector.shape_cast %699 : vector<16x2xf32> to vector<2x8x2xf32>
    %705 = arith.mulf %50, %704 : vector<2x8x2xf32>
    %706 = arith.addf %703, %705 : vector<2x8x2xf32>
    %c6_214 = arith.constant 6 : index
    %c0_215 = arith.constant 0 : index
    %c0_216 = arith.constant 0 : index
    %c0_217 = arith.constant 0 : index
    %707 = vector.load %arg1[%c6_214, %c0_215, %c0_216, %c0_217] : memref<8x2x8x6xf32, #tpu.memory_space<vmem>>, vector<1x2x8x6xf32>
    %708 = vector.shape_cast %707 : vector<1x2x8x6xf32> to vector<2x8x6xf32>
    %709 = vector.shape_cast %708 : vector<2x8x6xf32> to vector<16x6xf32>
    %c6_218 = arith.constant 6 : index
    %c0_219 = arith.constant 0 : index
    %c0_220 = arith.constant 0 : index
    %710 = vector.load %arg2[%c6_218, %c0_219, %c0_220] : memref<8x8x8xf32, #tpu.memory_space<vmem>>, vector<1x8x8xf32>
    %711 = vector.shape_cast %710 : vector<1x8x8xf32> to vector<8x8xf32>
    %712 = arith.truncf %711 : vector<8x8xf32> to vector<8x8xbf16>
    %c6_221 = arith.constant 6 : index
    %c0_222 = arith.constant 0 : index
    %c0_223 = arith.constant 0 : index
    %713 = vector.load %arg3[%c6_221, %c0_222, %c0_223] : memref<8x8x8xf32, #tpu.memory_space<vmem>>, vector<1x8x8xf32>
    %714 = vector.shape_cast %713 : vector<1x8x8xf32> to vector<8x8xf32>
    %715 = arith.truncf %714 : vector<8x8xf32> to vector<8x8xbf16>
    %716 = vector.extract_strided_slice %709 {offsets = [0, 0], sizes = [16, 2], strides = [1, 1]} : vector<16x6xf32> to vector<16x2xf32>
    %717 = vector.extract_strided_slice %709 {offsets = [0, 2], sizes = [16, 4], strides = [1, 1]} : vector<16x6xf32> to vector<16x4xf32>
    %718 = arith.mulf %717, %38 : vector<16x4xf32>
    %cst_224 = arith.constant dense<0.000000e+00> : vector<16xf32>
    %719 = vector.multi_reduction <add>, %718, %cst_224 [1] : vector<16x4xf32> to vector<16xf32>
    %720 = vector.shape_cast %719 : vector<16xf32> to vector<16x1xf32>
    %721 = arith.addf %720, %41 : vector<16x1xf32>
    %722 = arith.negf %721 : vector<16x1xf32>
    %723 = math.exp %722 : vector<16x1xf32>
    %cst_225 = arith.constant 1.000000e+00 : f32
    %724 = vector.broadcast %cst_225 : f32 to vector<16x1xf32>
    %725 = arith.addf %724, %723 : vector<16x1xf32>
    %726 = arith.divf %724, %725 : vector<16x1xf32>
    %727 = vector.broadcast %726 : vector<16x1xf32> to vector<16x2xf32>
    %728 = arith.mulf %727, %716 : vector<16x2xf32>
    %729 = vector.extract_strided_slice %728 {offsets = [0, 0], sizes = [8, 2], strides = [1, 1]} : vector<16x2xf32> to vector<8x2xf32>
    %730 = arith.truncf %729 : vector<8x2xf32> to vector<8x2xbf16>
    %cst_226 = arith.constant dense<0.000000e+00> : vector<8x2xf32>
    %731 = tpu.matmul %712, %730, %cst_226 {dimension_numbers = #tpu.dot_dimension_numbers<[1], [0], [0], [1], [0, 0, 1, 1], [], []>} : vector<8x8xbf16>, vector<8x2xbf16>, vector<8x2xf32> -> vector<8x2xf32>
    %732 = vector.extract_strided_slice %728 {offsets = [8, 0], sizes = [8, 2], strides = [1, 1]} : vector<16x2xf32> to vector<8x2xf32>
    %733 = arith.truncf %732 : vector<8x2xf32> to vector<8x2xbf16>
    %cst_227 = arith.constant dense<0.000000e+00> : vector<8x2xf32>
    %734 = tpu.matmul %712, %733, %cst_227 {dimension_numbers = #tpu.dot_dimension_numbers<[1], [0], [0], [1], [0, 0, 1, 1], [], []>} : vector<8x8xbf16>, vector<8x2xbf16>, vector<8x2xf32> -> vector<8x2xf32>
    %735 = tpu.concatenate %731, %734 in 0 : vector<8x2xf32>, vector<8x2xf32> -> vector<16x2xf32>
    %736 = vector.extract_strided_slice %728 {offsets = [0, 0], sizes = [8, 2], strides = [1, 1]} : vector<16x2xf32> to vector<8x2xf32>
    %737 = arith.truncf %736 : vector<8x2xf32> to vector<8x2xbf16>
    %cst_228 = arith.constant dense<0.000000e+00> : vector<8x2xf32>
    %738 = tpu.matmul %715, %737, %cst_228 {dimension_numbers = #tpu.dot_dimension_numbers<[1], [0], [0], [1], [0, 0, 1, 1], [], []>} : vector<8x8xbf16>, vector<8x2xbf16>, vector<8x2xf32> -> vector<8x2xf32>
    %739 = vector.extract_strided_slice %728 {offsets = [8, 0], sizes = [8, 2], strides = [1, 1]} : vector<16x2xf32> to vector<8x2xf32>
    %740 = arith.truncf %739 : vector<8x2xf32> to vector<8x2xbf16>
    %cst_229 = arith.constant dense<0.000000e+00> : vector<8x2xf32>
    %741 = tpu.matmul %715, %740, %cst_229 {dimension_numbers = #tpu.dot_dimension_numbers<[1], [0], [0], [1], [0, 0, 1, 1], [], []>} : vector<8x8xbf16>, vector<8x2xbf16>, vector<8x2xf32> -> vector<8x2xf32>
    %742 = tpu.concatenate %738, %741 in 0 : vector<8x2xf32>, vector<8x2xf32> -> vector<16x2xf32>
    %743 = vector.extract_strided_slice %696 {offsets = [0, 0], sizes = [8, 32], strides = [1, 1]} : vector<16x32xf32> to vector<8x32xf32>
    %744 = arith.truncf %743 : vector<8x32xf32> to vector<8x32xbf16>
    %cst_230 = arith.constant dense<0.000000e+00> : vector<8x32xf32>
    %745 = tpu.matmul %712, %744, %cst_230 {dimension_numbers = #tpu.dot_dimension_numbers<[1], [0], [0], [1], [0, 0, 1, 1], [], []>} : vector<8x8xbf16>, vector<8x32xbf16>, vector<8x32xf32> -> vector<8x32xf32>
    %746 = vector.extract_strided_slice %696 {offsets = [8, 0], sizes = [8, 32], strides = [1, 1]} : vector<16x32xf32> to vector<8x32xf32>
    %747 = arith.truncf %746 : vector<8x32xf32> to vector<8x32xbf16>
    %cst_231 = arith.constant dense<0.000000e+00> : vector<8x32xf32>
    %748 = tpu.matmul %712, %747, %cst_231 {dimension_numbers = #tpu.dot_dimension_numbers<[1], [0], [0], [1], [0, 0, 1, 1], [], []>} : vector<8x8xbf16>, vector<8x32xbf16>, vector<8x32xf32> -> vector<8x32xf32>
    %749 = tpu.concatenate %745, %748 in 0 : vector<8x32xf32>, vector<8x32xf32> -> vector<16x32xf32>
    %750 = arith.truncf %749 : vector<16x32xf32> to vector<16x32xbf16>
    %cst_232 = arith.constant dense<0.000000e+00> : vector<16x32xf32>
    %751 = tpu.matmul %750, %4, %cst_232 {dimension_numbers = #tpu.dot_dimension_numbers<[1], [0], [0], [1], [0, 0, 1, 1], [], []>} : vector<16x32xbf16>, vector<32x32xbf16>, vector<16x32xf32> -> vector<16x32xf32>
    %752 = arith.addf %751, %17 : vector<16x32xf32>
    %cst_233 = arith.constant 0.000000e+00 : f32
    %753 = vector.broadcast %cst_233 : f32 to vector<16x32xf32>
    %754 = arith.maximumf %752, %753 : vector<16x32xf32>
    %755 = vector.extract_strided_slice %696 {offsets = [0, 0], sizes = [8, 32], strides = [1, 1]} : vector<16x32xf32> to vector<8x32xf32>
    %756 = arith.truncf %755 : vector<8x32xf32> to vector<8x32xbf16>
    %cst_234 = arith.constant dense<0.000000e+00> : vector<8x32xf32>
    %757 = tpu.matmul %715, %756, %cst_234 {dimension_numbers = #tpu.dot_dimension_numbers<[1], [0], [0], [1], [0, 0, 1, 1], [], []>} : vector<8x8xbf16>, vector<8x32xbf16>, vector<8x32xf32> -> vector<8x32xf32>
    %758 = vector.extract_strided_slice %696 {offsets = [8, 0], sizes = [8, 32], strides = [1, 1]} : vector<16x32xf32> to vector<8x32xf32>
    %759 = arith.truncf %758 : vector<8x32xf32> to vector<8x32xbf16>
    %cst_235 = arith.constant dense<0.000000e+00> : vector<8x32xf32>
    %760 = tpu.matmul %715, %759, %cst_235 {dimension_numbers = #tpu.dot_dimension_numbers<[1], [0], [0], [1], [0, 0, 1, 1], [], []>} : vector<8x8xbf16>, vector<8x32xbf16>, vector<8x32xf32> -> vector<8x32xf32>
    %761 = tpu.concatenate %757, %760 in 0 : vector<8x32xf32>, vector<8x32xf32> -> vector<16x32xf32>
    %762 = arith.truncf %761 : vector<16x32xf32> to vector<16x32xbf16>
    %cst_236 = arith.constant dense<0.000000e+00> : vector<16x32xf32>
    %763 = tpu.matmul %762, %5, %cst_236 {dimension_numbers = #tpu.dot_dimension_numbers<[1], [0], [0], [1], [0, 0, 1, 1], [], []>} : vector<16x32xbf16>, vector<32x32xbf16>, vector<16x32xf32> -> vector<16x32xf32>
    %764 = arith.addf %763, %20 : vector<16x32xf32>
    %cst_237 = arith.constant 0.000000e+00 : f32
    %765 = vector.broadcast %cst_237 : f32 to vector<16x32xf32>
    %766 = arith.maximumf %764, %765 : vector<16x32xf32>
    %767 = arith.truncf %754 : vector<16x32xf32> to vector<16x32xbf16>
    %cst_238 = arith.constant dense<0.000000e+00> : vector<16x32xf32>
    %768 = tpu.matmul %767, %6, %cst_238 {dimension_numbers = #tpu.dot_dimension_numbers<[1], [0], [0], [1], [0, 0, 1, 1], [], []>} : vector<16x32xbf16>, vector<32x32xbf16>, vector<16x32xf32> -> vector<16x32xf32>
    %769 = arith.truncf %766 : vector<16x32xf32> to vector<16x32xbf16>
    %cst_239 = arith.constant dense<0.000000e+00> : vector<16x32xf32>
    %770 = tpu.matmul %769, %7, %cst_239 {dimension_numbers = #tpu.dot_dimension_numbers<[1], [0], [0], [1], [0, 0, 1, 1], [], []>} : vector<16x32xbf16>, vector<32x32xbf16>, vector<16x32xf32> -> vector<16x32xf32>
    %771 = arith.addf %768, %770 : vector<16x32xf32>
    %772 = arith.addf %771, %23 : vector<16x32xf32>
    %773 = arith.truncf %735 : vector<16x2xf32> to vector<16x2xbf16>
    %cst_240 = arith.constant dense<0.000000e+00> : vector<16x96xf32>
    %774 = tpu.matmul %773, %9, %cst_240 {dimension_numbers = #tpu.dot_dimension_numbers<[1], [0], [0], [1], [0, 0, 1, 1], [], []>} : vector<16x2xbf16>, vector<2x96xbf16>, vector<16x96xf32> -> vector<16x96xf32>
    %775 = arith.truncf %742 : vector<16x2xf32> to vector<16x2xbf16>
    %cst_241 = arith.constant dense<0.000000e+00> : vector<16x96xf32>
    %776 = tpu.matmul %775, %10, %cst_241 {dimension_numbers = #tpu.dot_dimension_numbers<[1], [0], [0], [1], [0, 0, 1, 1], [], []>} : vector<16x2xbf16>, vector<2x96xbf16>, vector<16x96xf32> -> vector<16x96xf32>
    %777 = arith.addf %774, %776 : vector<16x96xf32>
    %778 = arith.truncf %772 : vector<16x32xf32> to vector<16x32xbf16>
    %cst_242 = arith.constant dense<0.000000e+00> : vector<16x96xf32>
    %779 = tpu.matmul %778, %11, %cst_242 {dimension_numbers = #tpu.dot_dimension_numbers<[1], [0], [0], [1], [0, 0, 1, 1], [], []>} : vector<16x32xbf16>, vector<32x96xbf16>, vector<16x96xf32> -> vector<16x96xf32>
    %780 = vector.extract_strided_slice %777 {offsets = [0, 0], sizes = [16, 32], strides = [1, 1]} : vector<16x96xf32> to vector<16x32xf32>
    %781 = vector.extract_strided_slice %779 {offsets = [0, 0], sizes = [16, 32], strides = [1, 1]} : vector<16x96xf32> to vector<16x32xf32>
    %782 = arith.addf %780, %781 : vector<16x32xf32>
    %783 = arith.addf %782, %26 : vector<16x32xf32>
    %784 = arith.negf %783 : vector<16x32xf32>
    %785 = math.exp %784 : vector<16x32xf32>
    %cst_243 = arith.constant 1.000000e+00 : f32
    %786 = vector.broadcast %cst_243 : f32 to vector<16x32xf32>
    %787 = arith.addf %786, %785 : vector<16x32xf32>
    %788 = arith.divf %786, %787 : vector<16x32xf32>
    %789 = vector.extract_strided_slice %777 {offsets = [0, 32], sizes = [16, 32], strides = [1, 1]} : vector<16x96xf32> to vector<16x32xf32>
    %790 = vector.extract_strided_slice %779 {offsets = [0, 32], sizes = [16, 32], strides = [1, 1]} : vector<16x96xf32> to vector<16x32xf32>
    %791 = arith.addf %789, %790 : vector<16x32xf32>
    %792 = arith.addf %791, %29 : vector<16x32xf32>
    %793 = arith.negf %792 : vector<16x32xf32>
    %794 = math.exp %793 : vector<16x32xf32>
    %cst_244 = arith.constant 1.000000e+00 : f32
    %795 = vector.broadcast %cst_244 : f32 to vector<16x32xf32>
    %796 = arith.addf %795, %794 : vector<16x32xf32>
    %797 = arith.divf %795, %796 : vector<16x32xf32>
    %798 = vector.extract_strided_slice %777 {offsets = [0, 64], sizes = [16, 32], strides = [1, 1]} : vector<16x96xf32> to vector<16x32xf32>
    %799 = arith.addf %798, %32 : vector<16x32xf32>
    %800 = vector.extract_strided_slice %779 {offsets = [0, 64], sizes = [16, 32], strides = [1, 1]} : vector<16x96xf32> to vector<16x32xf32>
    %801 = arith.addf %800, %35 : vector<16x32xf32>
    %802 = arith.mulf %788, %801 : vector<16x32xf32>
    %803 = arith.addf %799, %802 : vector<16x32xf32>
    %804 = math.tanh %803 : vector<16x32xf32>
    %cst_245 = arith.constant 1.000000e+00 : f32
    %805 = vector.broadcast %cst_245 : f32 to vector<16x32xf32>
    %806 = arith.subf %805, %797 : vector<16x32xf32>
    %807 = arith.mulf %806, %804 : vector<16x32xf32>
    %808 = arith.mulf %797, %772 : vector<16x32xf32>
    %809 = arith.addf %807, %808 : vector<16x32xf32>
    %810 = arith.truncf %809 : vector<16x32xf32> to vector<16x32xbf16>
    %cst_246 = arith.constant dense<0.000000e+00> : vector<16x2xf32>
    %811 = tpu.matmul %810, %8, %cst_246 {dimension_numbers = #tpu.dot_dimension_numbers<[1], [0], [0], [1], [0, 0, 1, 1], [], []>} : vector<16x32xbf16>, vector<32x2xbf16>, vector<16x2xf32> -> vector<16x2xf32>
    %812 = arith.addf %811, %44 : vector<16x2xf32>
    %c7 = arith.constant 7 : index
    %c0_247 = arith.constant 0 : index
    %c0_248 = arith.constant 0 : index
    %c0_249 = arith.constant 0 : index
    %813 = vector.load %arg1[%c7, %c0_247, %c0_248, %c0_249] : memref<8x2x8x6xf32, #tpu.memory_space<vmem>>, vector<1x2x8x6xf32>
    %814 = vector.shape_cast %813 : vector<1x2x8x6xf32> to vector<2x8x6xf32>
    %815 = vector.extract_strided_slice %814 {offsets = [0, 0, 0], sizes = [2, 8, 2], strides = [1, 1, 1]} : vector<2x8x6xf32> to vector<2x8x2xf32>
    %816 = arith.mulf %48, %815 : vector<2x8x2xf32>
    %817 = vector.shape_cast %812 : vector<16x2xf32> to vector<2x8x2xf32>
    %818 = arith.mulf %50, %817 : vector<2x8x2xf32>
    %819 = arith.addf %816, %818 : vector<2x8x2xf32>
    %820 = vector.shape_cast %593 : vector<2x8x2xf32> to vector<1x2x8x2xf32>
    %821 = vector.shape_cast %706 : vector<2x8x2xf32> to vector<1x2x8x2xf32>
    %822 = vector.shape_cast %819 : vector<2x8x2xf32> to vector<1x2x8x2xf32>
    %823 = tpu.concatenate %820, %821, %822 in 0 : vector<1x2x8x2xf32>, vector<1x2x8x2xf32>, vector<1x2x8x2xf32> -> vector<3x2x8x2xf32>
    %c0_250 = arith.constant 0 : index
    %c0_251 = arith.constant 0 : index
    %c0_252 = arith.constant 0 : index
    %c0_253 = arith.constant 0 : index
    %824 = vector.load %arg8[%c0_250, %c0_251, %c0_252, %c0_253] : memref<3x2x8x2xf32, #tpu.memory_space<vmem>>, vector<3x2x8x2xf32>
    tpu.vector_store %arg8[%c0_250, %c0_251, %c0_252, %c0_253], %823 {strides = array<i32>} : memref<3x2x8x2xf32, #tpu.memory_space<vmem>>, vector<3x2x8x2xf32>,
    return
  }
  func.func @transform_0(%arg0: i32) -> (i32, i32, i32, i32) {
    %c0_i32 = arith.constant 0 : i32
    %c0_i32_0 = arith.constant 0 : i32
    %c0_i32_1 = arith.constant 0 : i32
    %c0_i32_2 = arith.constant 0 : i32
    return %c0_i32, %arg0, %c0_i32_0, %c0_i32_1 : i32, i32, i32, i32
  }
  func.func @transform_1(%arg0: i32) -> (i32, i32, i32) {
    %c0_i32 = arith.constant 0 : i32
    %c0_i32_0 = arith.constant 0 : i32
    %c0_i32_1 = arith.constant 0 : i32
    %c0_i32_2 = arith.constant 0 : i32
    return %c0_i32, %c0_i32_0, %c0_i32_1 : i32, i32, i32
  }
  func.func @transform_2(%arg0: i32) -> (i32, i32, i32) {
    %c0_i32 = arith.constant 0 : i32
    %c0_i32_0 = arith.constant 0 : i32
    %c0_i32_1 = arith.constant 0 : i32
    %c0_i32_2 = arith.constant 0 : i32
    return %c0_i32, %c0_i32_0, %c0_i32_1 : i32, i32, i32
  }
  func.func @transform_3(%arg0: i32) -> (i32, i32) {
    %c0_i32 = arith.constant 0 : i32
    %c0_i32_0 = arith.constant 0 : i32
    %c0_i32_1 = arith.constant 0 : i32
    return %c0_i32, %c0_i32_0 : i32, i32
  }
  func.func @transform_4(%arg0: i32) -> (i32, i32) {
    %c0_i32 = arith.constant 0 : i32
    %c0_i32_0 = arith.constant 0 : i32
    %c0_i32_1 = arith.constant 0 : i32
    return %c0_i32, %c0_i32_0 : i32, i32
  }
  func.func @transform_5(%arg0: i32) -> (i32, i32) {
    %c0_i32 = arith.constant 0 : i32
    %c0_i32_0 = arith.constant 0 : i32
    %c0_i32_1 = arith.constant 0 : i32
    return %c0_i32, %c0_i32_0 : i32, i32
  }
  func.func @transform_6(%arg0: i32) -> (i32, i32) {
    %c0_i32 = arith.constant 0 : i32
    %c0_i32_0 = arith.constant 0 : i32
    %c0_i32_1 = arith.constant 0 : i32
    return %c0_i32, %c0_i32_0 : i32, i32
  }
  func.func @transform_7(%arg0: i32) -> (i32, i32, i32, i32) {
    %c0_i32 = arith.constant 0 : i32
    %c0_i32_0 = arith.constant 0 : i32
    %c0_i32_1 = arith.constant 0 : i32
    %c0_i32_2 = arith.constant 0 : i32
    return %c0_i32, %arg0, %c0_i32_0, %c0_i32_1 : i32, i32, i32, i32
  }
}

</mosaic_0001>

<bundles_post_ra>
// kernel: forward.1
= control target key start
LH: loop header
LB: loop body
LE: loop exit
PB: predicated region body
PF: predicated region fallthrough
CT: control target
= control target key end

     0   :  { %s8154_s24 = smov 0   ;;  %s8156_s25 = smov 0   ;;  %s9710_s0 = inlined_call_operand.vmem [shape: f32[8,4,8,6], index: 0, kind: input, shape index: {}]   ;;  %s9711_s1 = inlined_call_operand.vmem [shape: f32[8,8,8], index: 1, kind: input, shape index: {}]   ;;  %s9712_s2 = inlined_call_operand.vmem [shape: f32[8,8,8], index: 2, kind: input, shape index: {}]   ;;  %s9713_s3 = inlined_call_operand.vmem [shape: bf16[176,32], index: 3, kind: input, shape index: {}]   ;;  %s9714_s4 = inlined_call_operand.vmem [shape: bf16[64,96], index: 4, kind: input, shape index: {}]   ;;  %s9715_s5 = inlined_call_operand.vmem [shape: f32[11,32], index: 5, kind: input, shape index: {}]   ;;  %s9716_s6 = inlined_call_operand.vmem [shape: f32[8,1], index: 6, kind: input, shape index: {}]   ;;  %s9717_s7 = inlined_call_operand.vmem [shape: f32[3,4,8,2], index: 7, kind: output, shape index: {}]  }
   0x1   :  { %s8158_s26 = smov 0  }
   0x2 LB: > { %s6571_s27 = sadd.s32 4294967295, %s8104_s26   ;;  %s8171_s28 = sadd.s32 1, %s8104_s26   ;;  %s8104_s26 = sphi %s8158_s26, %s9721_s26   ;;  %s8100_s25 = sphi %s8156_s25, %s9720_s25   ;;  %s8096_s24 = sphi %s8154_s24, %s9719_s24  }
   0x3   : > { %s21_s29 = ssub.s32 %s8104_s26, %s8171_s28  ;;  %s24_s30 = sadd.s32 1, %s8100_s25 }
   0x4   : > { %p22_p0 = scmp.eq.s32.totalorder %s21_s29, 0  ;;  %p31_p1 = scmp.ne.s32.totalorder %s8100_s25, %s8096_s24 }
   0x5   : > { %p32_p2 = scmp.eq.s32.totalorder %s8104_s26, 0  ;;  %p187_p3 = scmp.eq.s32.totalorder %s6571_s27, 1 }
   0x6   : > { %s8182_s8 = scalar_select %p22_p0, %s8100_s25, %s24_s30  }
   0x7   : > { %p33_p4 = por %p32_p2, %p31_p1  ;;  %p8184_p5 = por %p187_p3, %p31_p1 }
   0x8   : > { %p6574_p6 = scmp.ge.s32.totalorder %s8104_s26, 2 }
   0xa   : > { %227 = sbr.rel (%p6574_p6) target bundleno = 29 (0x1d), region = 40 }
  0x11   : > { %230 = sbr.rel (!%p33_p4) target bundleno = 29 (0x1d), region = 44  ;;  %s232_s10 = sand.u32 (%p33_p4), 1, %s8100_s25  }
  0x12   : > { %s6775_s11 = sshll.u32 (%p33_p4), %s8104_s26, 4  ;;  %s6575_s12 = sshll.u32 (%p33_p4), %s232_s10, 7 }
  0x13   : > { %s8194_s15 = scalar_lea.vmem (%p33_p4), %s9710_s0, %s6775_s11  ;;  %s234_s16 = scalar_lea.vmem (%p33_p4), [#allocation2], %s6575_s12 }
  0x14   : > { %v295_v0 = vld [vmem:[%s8194_s15] sm:$0xff] (%p33_p4)  ;;  %v297_v1 = vld [vmem:[%s8194_s15 + $0x8] sm:$0xff] (%p33_p4) }
  0x15   : > { %v299_v2 = vld [vmem:[%s8194_s15 + $0x20] sm:$0xff] (%p33_p4)  ;;  %296 = vst [vmem:[%s234_s16] sm:$0xff] (%p33_p4), %v295_v0  ;;  %298 = vst [vmem:[%s234_s16 + $0x8] sm:$0xff] (%p33_p4), %v297_v1  ;;  %v301_v3 = vld [vmem:[%s8194_s15 + $0x28] sm:$0xff] (%p33_p4) }
  0x16   : > { %300 = vst [vmem:[%s234_s16 + $0x10] sm:$0xff] (%p33_p4), %v299_v2  ;;  %v303_v4 = vld [vmem:[%s8194_s15 + $0x40] sm:$0xff] (%p33_p4)  ;;  %v305_v5 = vld [vmem:[%s8194_s15 + $0x48] sm:$0xff] (%p33_p4)  ;;  %302 = vst [vmem:[%s234_s16 + $0x18] sm:$0xff] (%p33_p4), %v301_v3 }
  0x17   : > { %304 = vst [vmem:[%s234_s16 + $0x20] sm:$0xff] (%p33_p4), %v303_v4  ;;  %306 = vst [vmem:[%s234_s16 + $0x28] sm:$0xff] (%p33_p4), %v305_v5  ;;  %v307_v6 = vld [vmem:[%s8194_s15 + $0x60] sm:$0xff] (%p33_p4)  ;;  %v309_v7 = vld [vmem:[%s8194_s15 + $0x68] sm:$0xff] (%p33_p4) }
  0x18   : > { %v311_v8 = vld [vmem:[%s8194_s15 + $0x80] sm:$0xff]  ;;  %308 = vst [vmem:[%s234_s16 + $0x30] sm:$0xff] %v307_v6  ;;  %310 = vst [vmem:[%s234_s16 + $0x38] sm:$0xff] %v309_v7  ;;  %v313_v9 = vld [vmem:[%s8194_s15 + $0x88] sm:$0xff] }
  0x19   : > { %312 = vst [vmem:[%s234_s16 + $0x40] sm:$0xff] %v311_v8  ;;  %v315_v10 = vld [vmem:[%s8194_s15 + $0xa0] sm:$0xff]  ;;  %v317_v11 = vld [vmem:[%s8194_s15 + $0xa8] sm:$0xff]  ;;  %314 = vst [vmem:[%s234_s16 + $0x48] sm:$0xff] %v313_v9 }
  0x1a   : > { %316 = vst [vmem:[%s234_s16 + $0x50] sm:$0xff] %v315_v10  ;;  %318 = vst [vmem:[%s234_s16 + $0x58] sm:$0xff] %v317_v11  ;;  %v319_v12 = vld [vmem:[%s8194_s15 + $0xc0] sm:$0xff]  ;;  %v321_v13 = vld [vmem:[%s8194_s15 + $0xc8] sm:$0xff] }
  0x1b   : > { %v323_v14 = vld [vmem:[%s8194_s15 + $0xe0] sm:$0xff]  ;;  %320 = vst [vmem:[%s234_s16 + $0x60] sm:$0xff] %v319_v12  ;;  %322 = vst [vmem:[%s234_s16 + $0x68] sm:$0xff] %v321_v13  ;;  %v325_v15 = vld [vmem:[%s8194_s15 + $0xe8] sm:$0xff] }
  0x1c   : > { %324 = vst [vmem:[%s234_s16 + $0x70] sm:$0xff] %v323_v14  ;;  %326 = vst [vmem:[%s234_s16 + $0x78] sm:$0xff] %v325_v15 }
  0x1d PF: > { %p6578_p7 = scmp.ge.s32.totalorder %s8104_s26, 1  ;;  %p331_p8 = scmp.lt.s32.totalorder %s8104_s26, 3 }
  0x1f   : > { %p332_p9 = pnand %p6578_p7, %p331_p8 }
  0x20   : > { %v400_v16 = vlaneseq (!%p332_p9)  ;;  %s338_s17 = sand.u32 (!%p332_p9), 1, %s8096_s24   ;;  %v8218_v17 = vld [vmem:[%s9715_s5 + $0x8] sm:$0x7] (!%p332_p9)  ;;  %v8106_v18 = vmov (!%p332_p9), 0.0   ;;  %vm8107_vm0 = vmmov (!%p332_p9), 0   ;;  %vm460_vm1 = vcmask (!%p332_p9), 1043456  }
  0x21   : > { %335 = sbr.rel (%p332_p9) target bundleno = 11930 (0x2e9a), region = 82  ;;  %7037 = vmatprep.subr.bf16.mxu0 (!%p332_p9), %v8106_v18  ;;  %7043 = vmatprep.subr.bf16.mxu1 (!%p332_p9), %v8106_v18  ;;  %s6579_s20 = sshll.u32 (!%p332_p9), %s338_s17, 7  ;;  %v451_v24 = vld [vmem:[%s9711_s1] sm:$0xff] (!%p332_p9)  ;;  %vm456_vm2 = vcmask (!%p332_p9), 64512   ;;  %vm553_vm3 = vcmask (!%p332_p9), 1042432   ;;  %vm549_vm4 = vcmask (!%p332_p9), 48128  }
  0x22   : > { %v8224_v19 = vshrl.u32 (!%p332_p9), %v400_v16, 7  ;;  %7039 = vmatprep.mubr.msk.bf16.mxu0 (!%p332_p9), %vm8107_vm0, %v8106_v18  ;;  %7045 = vmatprep.mubr.msk.bf16.mxu1 (!%p332_p9), %vm8107_vm0, %v8106_v18  ;;  %s8230_s21 = scalar_lea.vmem (!%p332_p9), [#allocation2], %s6579_s20  ;;  %v8256_v30 = vpack.c.bf16 (!%p332_p9), %v451_v24, %v451_v24  ;;  %s8108_s29 = smov (!%p332_p9), 2   ;;  %v371_v32 = vld [vmem:[%s9713_s3] sm:$0xf] (!%p332_p9)  ;;  %vm616_vm5 = vcmask (!%p332_p9), 31744  }
  0x23   : > { %v8233_v20 = vld [vmem:[%s8230_s21] sm:$0xff] (!%p332_p9)  ;;  %v8236_v21 = vld [vmem:[%s8230_s21 + $0x8] sm:$0xff] (!%p332_p9)  ;;  %v555_v33 = vsel (!%p332_p9), %vm553_vm3, %v371_v32, 0  ;;  %s8109_s11 = smov (!%p332_p9), 126   ;;  %v8110_v50 = vmov (!%p332_p9), 0   ;;  %vm921_vm6 = vcmask (!%p332_p9), 261120  }
  0x24   : > { %v402_v22 = vsub.s32 (!%p332_p9), 0, %v8224_v19  ;;  %v410_v23 = vsub.s32 (!%p332_p9), 2, %v8224_v19  ;;  %v455_v25 = vpack.c.bf16 (!%p332_p9), %v8233_v20, %v8233_v20  ;;  %v504_v26 = vpack.c.bf16 (!%p332_p9), %v8236_v21, %v8236_v21  ;;  %7841 = vset.pattern.permute.xlu1 (!%p332_p9), %v8110_v50  ;;  %7840 = vset.pattern.permute.xlu0 (!%p332_p9), %v8110_v50  ;;  %v8296_v5 = vld [vmem:[%s9715_s5] sm:$0xff] (!%p332_p9)  ;;  %s8111_s14 = smov (!%p332_p9), 64   ;;  %s8112_s15 = smov (!%p332_p9), 32  }
  0x25   : > { %v406_v51 = vsub.s32 (!%p332_p9), 1, %v8224_v19  ;;  %vm1229_vm7 = vcmask (!%p332_p9), 1040384   ;;  %vm1225_vm8 = vcmask (!%p332_p9), 15360   ;;  %s8113_s16 = smov (!%p332_p9), 96  }
  0x26   : > { %v435_v27 = vrot.slane (!%p332_p9), %v8218_v17, %v402_v22  ;;  %v8253_v28 = vrot.slane (!%p332_p9), %v8218_v17, %v410_v23  ;;  %v462_v29 = vsel (!%p332_p9), %vm460_vm1, %v455_v25, 0  ;;  %v506_v31 = vsel (!%p332_p9), %vm460_vm1, %v504_v26, 0 }
  0x27   : > { %7038 = vmatpush3.bf16.msra.mxu0 (!%p332_p9), %v462_v29  ;;  %7044 = vmatpush3.bf16.msra.mxu1 (!%p332_p9), %v506_v31  ;;  %v8289_v52 = vrot.slane (!%p332_p9), %v8218_v17, %v406_v51  ;;  %v403_v6 = vrot.slane (!%p332_p9), %v8296_v5, %v402_v22  ;;  %v8345_v29 = vld [vmem:[%s9713_s3 + $0x8] sm:$0xff] (!%p332_p9)  }
  0x28   : > { %603 = vrot.lane.b32.xlu0 %v435_v27, %s8108_s29  ;;  %7049 = vmatprep.subr.bf16.mxu0 %v8106_v18 }
  0x29   : > { %7055 = vmatprep.subr.bf16.mxu1 %v8106_v18 }
  0x2a   : > { %7040 = vmatmul.mubr.msk.bf16.vlgmr.msra.gmra.mrb[0].mxu0 %vm456_vm2, %v8256_v30  ;;  %7046 = vmatmul.mubr.msk.bf16.vlgmr.msra.gmra.mrb[0].mxu1 %vm456_vm2, %v8256_v30 }
  0x2b   : > { %7051 = vmatprep.mubr.msk.bf16.mxu0 %vm8107_vm0, %v8106_v18  ;;  %7057 = vmatprep.mubr.msk.bf16.mxu1 %vm8107_vm0, %v8106_v18 }
  0x2c   : > { %7050 = vmatpush3.bf16.msra.mxu0 %v555_v33 }
  0x2d   : > { %7061 = vmatprep.subr.bf16.mxu0 %v8106_v18 }
  0x9a   : > { %v8273_v34 = vpop.permute.xlu0 %603 }
  0x9b   : > { %v607_v35 = vmul.f32 %v8273_v34, %v8236_v21  ;;  %v606_v36 = vmul.f32 %v8273_v34, %v8233_v20 }
  0x9d   : > { %612 = vrot.lane.b32.xlu1 %v607_v35, %s8109_s11  ;;  %610 = vrot.lane.b32.xlu0 %v606_v36, %s8109_s11 }
  0xfd   : > { %v498_v37 = vpop.f32.mrb[0].mxu0  ;;  %v542_v38 = vpop.f32.mrb[0].mxu1 }
  0xfe   : > { %v7041_v39 = vpop.f32.mrb[1].mxu0  ;;  %v548_v40 = vpack.c.bf16 %v542_v38, %v498_v37  ;;  %v7047_v41 = vpop.f32.mrb[1].mxu1 }
  0xff   : > { %v501_v42 = vpop.f32.mrb[2].mxu0  ;;  %v545_v43 = vpop.f32.mrb[2].mxu1 }
 0x100   : > { %v7042_v44 = vpop.f32.mrb[3].mxu0  ;;  %v7048_v45 = vpop.f32.mrb[3].mxu1  ;;  %7052 = vmatmul.mubr.msk.bf16.vlgmr.msra.gmra.mrb[4].mxu0 %vm549_vm4, %v548_v40 }
 0x101   : > { %7063 = vmatprep.mubr.msk.bf16.mxu0 %vm8107_vm0, %v8106_v18 }
 0x10f   : > { %v613_v46 = vpop.permute.xlu1 %612  ;;  %v611_v47 = vpop.permute.xlu0 %610 }
 0x110   : > { %v620_v48 = vsel %vm616_vm5, %v613_v46, 0.0  ;;  %v617_v49 = vsel %vm616_vm5, %v611_v47, 0.0 }
 0x111   : > { %621 = vadd.xlane.f32.xlu0 %v620_v48  ;;  %618 = vadd.xlane.f32.xlu1 %v617_v49 }
 0x19e   : > { %v619_v53 = vpop.xlane.xlu1 %618  ;;  %v622_v54 = vpop.xlane.xlu0 %621 }
 0x19f   : > { %v623_v55 = vadd.f32 %v619_v53, %v8289_v52  ;;  %v624_v56 = vadd.f32 %v622_v54, %v8289_v52 }
 0x1a1   : > { %v6583_v57 = vmul.f32 -1.442695, %v623_v55  ;;  %v6584_v58 = vmul.f32 -1.442695, %v624_v56 }
 0x1a3   : > { %7854 = vpow2.f32 %v6583_v57 }
 0x1a4   : > { %7856 = vpow2.f32 %v6584_v58 }
 0x1ad   : > { %v7855_v59 = vpop.eup %7854 }
 0x1ae   : > { %v7857_v60 = vpop.eup %7856  ;;  %v631_v61 = vadd.f32 1.0, %v7855_v59 }
 0x1af   : > { %v632_v62 = vadd.f32 1.0, %v7857_v60 }
 0x1b0   : > { %7858 = vrcp.f32 %v631_v61  ;;  %v8378_v61 = vld [vmem:[%s9713_s3 + $0x18] sm:$0xff]  }
 0x1b1   : > { %7860 = vrcp.f32 %v632_v62 }
 0x1ba   : > { %v7859_v63 = vpop.eup %7858 }
 0x1bb   : > { %v7861_v0 = vpop.eup %7860  ;;  %639 = vperm.xlu0 %7840, %v7859_v63  }
 0x1bc   : > { %644 = vperm.xlu1 %7841, %v7861_v0   ;;  %v8385_v0 = vld [vmem:[%s9713_s3 + $0x20] sm:$0xff]  }
 0x1d3   : > { %v591_v1 = vpop.f32.mrb[4].mxu0 }
 0x1d4   : > { %v7053_v2 = vpop.f32.mrb[5].mxu0  ;;  %v592_v12 = vadd.f32 %v591_v1, %v403_v6 }
 0x1d5   : > { %v594_v3 = vpop.f32.mrb[6].mxu0 }
 0x1d6   : > { %v7054_v4 = vpop.f32.mrb[7].mxu0  ;;  %v595_v14 = vadd.f32 %v594_v3, %v403_v6  ;;  %v598_v17 = vmax.f32 %v592_v12, 0.0  ;;  %v8392_v3 = vrot.slane %v8296_v5, %v406_v51 }
 0x1d8   : > { %v599_v22 = vmax.f32 %v595_v14, 0.0 }
 0x1da   : > { %v864_v24 = vpack.c.bf16 %v599_v22, %v599_v22 }
 0x1dc   : > { %v866_v27 = vsel %vm460_vm1, %v864_v24, 0  ;;  %v8426_v24 = vld [vmem:[%s9713_s3 + $0x40] sm:$0xff]  }
 0x23a   : > { %v640_v7 = vpop.permute.xlu0 %639 }
 0x23b   : > { %v645_v8 = vpop.permute.xlu1 %644  ;;  %v647_v9 = vmul.f32 %v640_v7, %v8233_v20  ;;  %v600_v20 = vld [vmem:[%s9712_s2] sm:$0xff] }
 0x23c   : > { %v648_v10 = vmul.f32 %v645_v8, %v8236_v21  ;;  %v820_v21 = vpack.c.bf16 %v598_v17, %v598_v17  ;;  %v601_v25 = vpack.c.bf16 %v600_v20, %v600_v20  ;;  %v8406_v20 = vld [vmem:[%s9713_s3 + $0x30] sm:$0xff]  }
 0x23d   : > { %v649_v11 = vpack.c.bf16 %v647_v9, %v647_v9 }
 0x23e   : > { %v693_v13 = vpack.c.bf16 %v648_v10, %v648_v10  ;;  %v822_v26 = vsel %vm460_vm1, %v820_v21, 0  ;;  %v8419_v21 = vld [vmem:[%s9713_s3 + $0x38] sm:$0xff]  }
 0x23f   : > { %v651_v15 = vsel %vm460_vm1, %v649_v11, 0 }
 0x240   : > { %7056 = vmatpush3.bf16.msra.mxu1 %v651_v15  ;;  %v695_v16 = vsel %vm460_vm1, %v693_v13, 0 }
 0x241   : > { %7062 = vmatpush3.bf16.msra.mxu0 %v695_v16  ;;  %7067 = vmatprep.subr.bf16.mxu1 %v8106_v18 }
 0x242   : > { %7073 = vmatprep.subr.bf16.mxu0 %v8106_v18 }
 0x243   : > { %7058 = vmatmul.mubr.msk.bf16.vlgmr.msra.gmra.mrb[4].mxu1 %vm456_vm2, %v8256_v30 }
 0x244   : > { %7064 = vmatmul.mubr.msk.bf16.vlgmr.msra.gmra.mrb[8].mxu0 %vm456_vm2, %v8256_v30  ;;  %7068 = vmatpush3.bf16.msra.mxu1 %v651_v15  ;;  %v8399_v15 = vld [vmem:[%s9713_s3 + $0x28] sm:$0xff]  }
 0x245   : > { %7074 = vmatpush3.bf16.msra.mxu0 %v695_v16  ;;  %7069 = vmatprep.mubr.msk.bf16.mxu1 %vm8107_vm0, %v8106_v18 }
 0x246   : > { %7075 = vmatprep.mubr.msk.bf16.mxu0 %vm8107_vm0, %v8106_v18  ;;  %7079 = vmatprep.subr.bf16.mxu1 %v8106_v18 }
 0x247   : > { %7085 = vmatprep.subr.bf16.mxu0 %v8106_v18 }
 0x24b   : > { %7070 = vmatmul.mubr.msk.bf16.vlgmr.msra.gmra.mrb[8].mxu1 %vm456_vm2, %v601_v25 }
 0x24c   : > { %7076 = vmatmul.mubr.msk.bf16.vlgmr.msra.gmra.mrb[12].mxu0 %vm456_vm2, %v601_v25  ;;  %7080 = vmatpush3.bf16.msra.mxu1 %v822_v26 }
 0x24d   : > { %7086 = vmatpush3.bf16.msra.mxu0 %v866_v27  ;;  %7081 = vmatprep.mubr.msk.bf16.mxu1 %vm8107_vm0, %v8106_v18 }
 0x24e   : > { %7087 = vmatprep.mubr.msk.bf16.mxu0 %vm8107_vm0, %v8106_v18  ;;  %7099 = vmatprep.subr.bf16.mxu0 %v8106_v18 }
 0x24f   : > { %7091 = vmatprep.subr.bf16.mxu1 %v8106_v18 }
 0x253   : > { %7082 = vmatmul.mubr.msk.bf16.vlgmr.msra.gmra.mrb[12].mxu1 %vm456_vm2, %v8256_v30 }
 0x254   : > { %7088 = vmatmul.mubr.msk.bf16.vlgmr.msra.gmra.mrb[16].mxu0 %vm456_vm2, %v8256_v30  ;;  %7095 = vmatprep.mubr.msk.bf16.mxu1 %vm8107_vm0, %v8106_v18  ;;  %v8351_v30 = vld [vmem:[%s9713_s3 + $0x10] sm:$0xff]  }
 0x255   : > { %7100 = vmatpush3.bf16.msra.mxu0 %v822_v26  ;;  %7101 = vmatprep.mubr.msk.bf16.mxu0 %vm8107_vm0, %v8106_v18 }
 0x256   : > { %7111 = vmatprep.subr.bf16.mxu0 %v8106_v18  ;;  %7092 = vmatpush3.bf16.msra.mxu1 %v8345_v29 }
 0x257   : > { %7093 = vmatprep.subr.bf16.mxu1 %v8106_v18 }
 0x25a   : > { %7094 = vmatpush3.bf16.msra.mxu1 %v8351_v30 }
 0x25b   : > { %7105 = vmatprep.subr.bf16.mxu1 %v8106_v18 }
 0x25c   : > { %7102 = vmatmul.mubr.msk.bf16.vlgmr.msra.gmra.mrb[20].mxu0 %vm456_vm2, %v601_v25 }
 0x25d   : > { %7115 = vmatprep.mubr.msk.bf16.mxu0 %vm8107_vm0, %v8106_v18  ;;  %7112 = vmatpush3.bf16.msra.mxu0 %v8378_v61 }
 0x25e   : > { %7113 = vmatprep.subr.bf16.mxu0 %v8106_v18 }
 0x261   : > { %7114 = vmatpush3.bf16.msra.mxu0 %v8385_v0 }
 0x262   : > { %7127 = vmatprep.subr.bf16.mxu0 %v8106_v18 }
 0x316   : > { %v8356_v31 = vpop.f32.mrb[4].mxu1 }
 0x317   : > { %v8358_v32 = vpop.f32.mrb[8].mxu0  ;;  %v7059_v33 = vpop.f32.mrb[5].mxu1 }
 0x318   : > { %v1223_v35 = vpack.c.bf16 %v8358_v32, %v8356_v31  ;;  %v7065_v36 = vpop.f32.mrb[9].mxu0  ;;  %v690_v37 = vpop.f32.mrb[6].mxu1  ;;  %v430_v31 = vsub.s32 7, %v8224_v19 }
 0x319   : > { %v734_v38 = vpop.f32.mrb[10].mxu0  ;;  %v7060_v39 = vpop.f32.mrb[7].mxu1 }
 0x31a   : > { %v7066_v40 = vpop.f32.mrb[11].mxu0  ;;  %v393_v39 = vld [vmem:[%s9714_s4 + $0x8] sm:$0xf]  ;;  %v431_v32 = vrot.slane %v8296_v5, %v430_v31 }
 0x31c   : > { %1419 = vrot.lane.b32.xlu1 %v431_v32, %s8111_s14 }
 0x31e   : > { %v8362_v41 = vpop.f32.mrb[8].mxu1 }
 0x31f   : > { %v8364_v42 = vpop.f32.mrb[12].mxu0  ;;  %v7071_v43 = vpop.f32.mrb[9].mxu1 }
 0x320   : > { %v1224_v44 = vpack.c.bf16 %v8364_v42, %v8362_v41  ;;  %v7077_v45 = vpop.f32.mrb[13].mxu0  ;;  %v777_v46 = vpop.f32.mrb[10].mxu1  ;;  %v8469_v41 = vld [vmem:[%s9714_s4 + $0x10] sm:$0xff]   ;;  %v8476_v42 = vld [vmem:[%s9714_s4 + $0x18] sm:$0xff]  }
 0x321   : > { %v817_v47 = vpop.f32.mrb[14].mxu0  ;;  %v7072_v48 = vpop.f32.mrb[11].mxu1  ;;  %v8440_v46 = vsel %vm1229_vm7, %v393_v39, 0 }
 0x322   : > { %v7078_v49 = vpop.f32.mrb[15].mxu0 }
 0x326   : > { %v858_v50 = vpop.f32.mrb[12].mxu1 }
 0x327   : > { %v902_v53 = vpop.f32.mrb[16].mxu0  ;;  %v7083_v54 = vpop.f32.mrb[13].mxu1 }
 0x328   : > { %v908_v55 = vpack.c.bf16 %v902_v53, %v858_v50  ;;  %v7089_v56 = vpop.f32.mrb[17].mxu0  ;;  %v861_v57 = vpop.f32.mrb[14].mxu1  ;;  %v392_v50 = vld [vmem:[%s9714_s4] sm:$0xf] }
 0x329   : > { %v905_v58 = vpop.f32.mrb[18].mxu0  ;;  %v7084_v59 = vpop.f32.mrb[15].mxu1  ;;  %v8450_v53 = vsel %vm1229_vm7, %v392_v50, 0 }
 0x32a   : > { %v7090_v60 = vpop.f32.mrb[19].mxu0  ;;  %7096 = vmatmul.mubr.msk.bf16.vlgmr.msra.gmra.mrb[16].mxu1 %vm921_vm6, %v908_v55 }
 0x32b   : > { %7106 = vmatpush3.bf16.msra.mxu1 %v866_v27  ;;  %7107 = vmatprep.mubr.msk.bf16.mxu1 %vm8107_vm0, %v8106_v18 }
 0x32c   : > { %7119 = vmatprep.subr.bf16.mxu1 %v8106_v18 }
 0x32f   : > { %v1002_v62 = vpop.f32.mrb[20].mxu0 }
 0x330   : > { %v7103_v63 = vpop.f32.mrb[21].mxu0 }
 0x331   : > { %v1005_v1 = vpop.f32.mrb[22].mxu0 }
 0x332   : > { %7108 = vmatmul.mubr.msk.bf16.vlgmr.msra.gmra.mrb[20].mxu1 %vm456_vm2, %v601_v25  ;;  %v7104_v2 = vpop.f32.mrb[23].mxu0  ;;  %v8433_v25 = vrot.slane %v8296_v5, %v410_v23 }
 0x333   : > { %7123 = vmatprep.mubr.msk.bf16.mxu1 %vm8107_vm0, %v8106_v18  ;;  %7120 = vmatpush3.bf16.msra.mxu1 %v8419_v21 }
 0x334   : > { %7121 = vmatprep.subr.bf16.mxu1 %v8106_v18 }
 0x337   : > { %7122 = vmatpush3.bf16.msra.mxu1 %v8426_v24 }
 0x338   : > { %7135 = vmatprep.subr.bf16.mxu1 %v8106_v18 }
 0x3fd   : > { %v959_v4 = vpop.f32.mrb[16].mxu1 }
 0x3fe   : > { %v960_v6 = vadd.f32 %v959_v4, %v8392_v3  ;;  %v7097_v7 = vpop.f32.mrb[17].mxu1 }
 0x3ff   : > { %v962_v8 = vpop.f32.mrb[18].mxu1  ;;  %v8495_v7 = vpop.permute.xlu1 %1419 }
 0x400   : > { %v963_v9 = vadd.f32 %v962_v8, %v8392_v3  ;;  %v7098_v10 = vpop.f32.mrb[19].mxu1  ;;  %v966_v11 = vmax.f32 %v960_v6, 0.0 }
 0x402   : > { %v967_v12 = vmax.f32 %v963_v9, 0.0 }
 0x404   : > { %v1107_v13 = vpack.c.bf16 %v967_v12, %v966_v11 }
 0x405   : > { %v1042_v14 = vpop.f32.mrb[20].mxu1 }
 0x406   : > { %v1048_v16 = vpack.c.bf16 %v1042_v14, %v1002_v62  ;;  %v7109_v51 = vpop.f32.mrb[21].mxu1 }
 0x407   : > { %v1045_v17 = vpop.f32.mrb[22].mxu1  ;;  %v8505_v51 = vld [vmem:[%s8230_s21 + $0x10] sm:$0xff] }
 0x408   : > { %v7110_v22 = vpop.f32.mrb[23].mxu1  ;;  %7116 = vmatmul.mubr.msk.bf16.vlgmr.msra.gmra.mrb[24].mxu0 %vm921_vm6, %v1048_v16  ;;  %v1479_v17 = vmul.f32 %v8505_v51, %v8273_v34 }
 0x409   : > { %7128 = vmatpush3.bf16.msra.mxu0 %v8399_v15  ;;  %7131 = vmatprep.mubr.msk.bf16.mxu0 %vm8107_vm0, %v8106_v18  ;;  %v8511_v22 = vld [vmem:[%s8230_s21 + $0x18] sm:$0xff] }
 0x40a   : > { %7129 = vmatprep.subr.bf16.mxu0 %v8106_v18 }
 0x40d   : > { %7130 = vmatpush3.bf16.msra.mxu0 %v8406_v20 }
 0x40e   : > { %7147 = vmatprep.subr.bf16.mxu0 %v8106_v18 }
 0x410   : > { %7132 = vmatmul.mubr.msk.bf16.vlgmr.msra.gmra.mrb[28].mxu0 %vm921_vm6, %v1107_v13 }
 0x411   : > { %7151 = vmatprep.mubr.msk.bf16.mxu0 %vm8107_vm0, %v8106_v18  ;;  %7148 = vmatpush3.bf16.msra.mxu0 %v8469_v41 }
 0x412   : > { %7149 = vmatprep.subr.bf16.mxu0 %v8106_v18 }
 0x415   : > { %7150 = vmatpush3.bf16.msra.mxu0 %v8476_v42 }
 0x416   : > { %7155 = vmatprep.subr.bf16.mxu0 %v8106_v18 }
 0x4db   : > { %v1098_v26 = vpop.f32.mrb[24].mxu0 }
 0x4dc   : > { %v1099_v27 = vadd.f32 %v1098_v26, %v8433_v25  ;;  %v7117_v33 = vpop.f32.mrb[25].mxu0  ;;  %v426_v26 = vsub.s32 6, %v8224_v19 }
 0x4dd   : > { %v1101_v36 = vpop.f32.mrb[26].mxu0 }
 0x4de   : > { %v1102_v37 = vadd.f32 %v1101_v36, %v8433_v25  ;;  %v7118_v38 = vpop.f32.mrb[27].mxu0  ;;  %v1105_v40 = vmax.f32 %v1099_v27, 0.0  ;;  %v1480_v27 = vmul.f32 %v8511_v22, %v8273_v34  ;;  %v427_v33 = vrot.slane %v8296_v5, %v426_v26 }
 0x4df   : > { %v418_v36 = vsub.s32 4, %v8224_v19 }
 0x4e0   : > { %v1106_v43 = vmax.f32 %v1102_v37, 0.0 }
 0x4e1   : > { %v8522_v37 = vrot.slane %v8296_v5, %v418_v36 }
 0x4e2   : > { %v1108_v45 = vpack.c.bf16 %v1106_v43, %v1105_v40 }
 0x4e3   : > { %v1214_v23 = vpop.f32.mrb[28].mxu0 }
 0x4e4   : > { %7124 = vmatmul.mubr.msk.bf16.vlgmr.msra.gmra.mrb[24].mxu1 %vm921_vm6, %v1108_v45  ;;  %v7133_v47 = vpop.f32.mrb[29].mxu0 }
 0x4e5   : > { %v1217_v48 = vpop.f32.mrb[30].mxu0  ;;  %7136 = vmatpush3.bf16.msra.mxu1 %v8440_v46  ;;  %7137 = vmatprep.mubr.msk.bf16.mxu1 %vm8107_vm0, %v8106_v18 }
 0x4e6   : > { %v7134_v49 = vpop.f32.mrb[31].mxu0  ;;  %7141 = vmatprep.subr.bf16.mxu1 %v8106_v18 }
 0x4ec   : > { %7138 = vmatmul.mubr.msk.bf16.vlgmr.msra.gmra.mrb[28].mxu1 %vm1225_vm8, %v1224_v44 }
 0x4ed   : > { %7142 = vmatpush3.bf16.msra.mxu1 %v8450_v53  ;;  %7143 = vmatprep.mubr.msk.bf16.mxu1 %vm8107_vm0, %v8106_v18 }
 0x4ee   : > { %7161 = vmatprep.subr.bf16.mxu1 %v8106_v18 }
 0x4f8   : > { %7144 = vmatmul.mubr.msk.bf16.vlgmr.msra.gmra.mrb[28].mxu1 %vm1225_vm8, %v1223_v35  ;;  %v414_v35 = vsub.s32 3, %v8224_v19 }
 0x4f9   : > { %7163 = vmatprep.mubr.msk.bf16.mxu1 %vm8107_vm0, %v8106_v18 }
 0x4fa   : > { %v8485_v54 = vrot.slane %v8296_v5, %v414_v35 }
 0x5b7   : > { %v1158_v44 = vpop.f32.mrb[24].mxu1 }
 0x5b8   : > { %v1215_v55 = vadd.f32 %v1214_v23, %v1158_v44  ;;  %v7125_v56 = vpop.f32.mrb[25].mxu1 }
 0x5b9   : > { %v1161_v57 = vpop.f32.mrb[26].mxu1 }
 0x5ba   : > { %v1218_v58 = vadd.f32 %v1217_v48, %v1161_v57  ;;  %v7126_v59 = vpop.f32.mrb[27].mxu1  ;;  %v1221_v60 = vadd.f32 %v1215_v55, %v8485_v54 }
 0x5bb   : > { %v422_v59 = vsub.s32 5, %v8224_v19 }
 0x5bc   : > { %v8489_v62 = vadd.f32 %v1218_v58, %v8485_v54 }
 0x5be   : > { %v1321_v63 = vpack.c.bf16 %v8489_v62, %v1221_v60 }
 0x5c0   : > { %7152 = vmatmul.mubr.msk.bf16.vlgmr.msra.gmra.mrb[32].mxu0 %vm921_vm6, %v1321_v63  ;;  %v423_v63 = vrot.slane %v8296_v5, %v422_v59 }
 0x5c1   : > { %7157 = vmatprep.mubr.msk.bf16.mxu0 %vm8107_vm0, %v8106_v18 }
 0x5cb   : > { %v1314_v1 = vpop.f32.mrb[28].mxu1 }
 0x5cc   : > { %v7145_v2 = vpop.f32.mrb[29].mxu1 }
 0x5cd   : > { %v1317_v4 = vpop.f32.mrb[30].mxu1 }
 0x5ce   : > { %v7146_v6 = vpop.f32.mrb[31].mxu1 }
 0x693   : > { %v1371_v8 = vpop.f32.mrb[32].mxu0 }
 0x694   : > { %v8497_v9 = vadd.f32 %v1371_v8, %v1314_v1  ;;  %v1422_v10 = vadd.f32 %v8495_v7, %v1371_v8  ;;  %v7153_v11 = vpop.f32.mrb[33].mxu0 }
 0x695   : > { %v1374_v12 = vpop.f32.mrb[34].mxu0 }
 0x696   : > { %v8500_v13 = vadd.f32 %v1374_v12, %v1317_v4  ;;  %1426 = vrot.lane.b32.xlu1 %v1422_v10, %s8111_s14  ;;  %v7154_v14 = vpop.f32.mrb[35].mxu0  ;;  %v1423_v16 = vadd.f32 %v8495_v7, %v1374_v12  ;;  %v1380_v38 = vadd.f32 %v8497_v9, %v8522_v37 }
 0x698   : > { %v6610_v39 = vmul.f32 -1.442695, %v1380_v38  ;;  %v1381_v40 = vadd.f32 %v8500_v13, %v8522_v37 }
 0x69a   : > { %1428 = vrot.lane.b32.xlu1 %v1423_v16, %s8111_s14  ;;  %7862 = vpow2.f32 %v6610_v39  ;;  %v6611_v43 = vmul.f32 -1.442695, %v1381_v40 }
 0x69c   : > { %7864 = vpow2.f32 %v6611_v43 }
 0x69e   : > { %1483 = vrot.lane.b32.xlu1 %v1479_v17, %s8109_s11 }
 0x6a2   : > { %1485 = vrot.lane.b32.xlu1 %v1480_v27, %s8109_s11 }
 0x6a4   : > { %v7863_v45 = vpop.eup %7862 }
 0x6a5   : > { %v1388_v23 = vadd.f32 1.0, %v7863_v45 }
 0x6a6   : > { %1413 = vrot.lane.b32.xlu1 %v427_v33, %s8111_s14  ;;  %v7865_v47 = vpop.eup %7864 }
 0x6a7   : > { %7866 = vrcp.f32 %v1388_v23  ;;  %v1389_v48 = vadd.f32 1.0, %v7865_v47 }
 0x6a9   : > { %7868 = vrcp.f32 %v1389_v48 }
 0x6b1   : > { %v7867_v49 = vpop.eup %7866 }
 0x6b3   : > { %v7869_v32 = vpop.eup %7868 }
 0x708   : > { %v1427_v50 = vpop.permute.xlu1 %1426 }
 0x709   : > { %v1432_v31 = vmul.f32 %v7867_v49, %v1427_v50 }
 0x70b   : > { %1436 = vrot.lane.b32.xlu1 %v1432_v31, %s8111_s14 }
 0x70c   : > { %v1429_v35 = vpop.permute.xlu1 %1428 }
 0x70d   : > { %v1433_v44 = vmul.f32 %v7869_v32, %v1429_v35 }
 0x70f   : > { %1438 = vrot.lane.b32.xlu0 %v1433_v44, %s8111_s14 }
 0x710   : > { %v1484_v55 = vpop.permute.xlu1 %1483 }
 0x711   : > { %v1489_v58 = vsel %vm616_vm5, %v1484_v55, 0.0 }
 0x714   : > { %v1486_v56 = vpop.permute.xlu1 %1485 }
 0x715   : > { %v1492_v57 = vsel %vm616_vm5, %v1486_v56, 0.0 }
 0x718   : > { %v8536_v2 = vpop.permute.xlu1 %1413 }
 0x719   : > { %v1416_v6 = vadd.f32 %v8536_v2, %v1314_v1  ;;  %v1417_v11 = vadd.f32 %v8536_v2, %v1317_v4 }
 0x72e   : > { %1493 = vadd.xlane.f32.xlu0 %v1492_v57 }
 0x72f   : > { %1490 = vadd.xlane.f32.xlu1 %v1489_v58 }
 0x744   : > { %1395 = vrot.lane.b32.xlu0 %v423_v63, %s8112_s15 }
 0x748   : > { %1460 = vrot.lane.b32.xlu0 %v1221_v60, %s8112_s15 }
 0x77d   : > { %v1437_v8 = vpop.permute.xlu1 %1436 }
 0x77e   : > { %v1442_v10 = vadd.f32 %v1437_v8, %v1416_v6 }
 0x780   : > { %7870 = vtanh.f32 %v1442_v10 }
 0x781   : > { %v1439_v12 = vpop.permute.xlu0 %1438 }
 0x782   : > { %v1443_v14 = vadd.f32 %v1439_v12, %v1417_v11 }
 0x784   : > { %7872 = vtanh.f32 %v1443_v14 }
 0x78a   : > { %v7871_v19 = vpop.eup %7870 }
 0x78b   : > { %1450 = vrot.lane.b32.xlu1 %v7871_v19, %s8113_s16 }
 0x78e   : > { %v7873_v5 = vpop.eup %7872 }
 0x78f   : > { %1452 = vrot.lane.b32.xlu1 %v7873_v5, %s8113_s16 }
 0x793   : > { %1462 = vrot.lane.b32.xlu1 %v8489_v62, %s8112_s15 }
 0x7bb   : > { %v1494_v60 = vpop.xlane.xlu0 %1493 }
 0x7bc   : > { %v1496_v1 = vadd.f32 %v1494_v60, %v8289_v52  ;;  %v1491_v16 = vpop.xlane.xlu1 %1490 }
 0x7bd   : > { %v1495_v17 = vadd.f32 %v1491_v16, %v8289_v52 }
 0x7be   : > { %v6619_v4 = vmul.f32 -1.442695, %v1496_v1  ;;  %v6616_v1 = vld [vmem:[%s9711_s1 + $0x8] sm:$0xff] }
 0x7bf   : > { %v6618_v26 = vmul.f32 -1.442695, %v1495_v17  ;;  %v8546_v39 = vpop.permute.xlu0 %1395 }
 0x7c0   : > { %7874 = vpow2.f32 %v6619_v4  ;;  %v1398_v62 = vadd.f32 %v8546_v39, %v8497_v9  ;;  %v1399_v23 = vadd.f32 %v8546_v39, %v8500_v13 }
 0x7c1   : > { %7876 = vpow2.f32 %v6618_v26  ;;  %v1475_v26 = vpack.c.bf16 %v6616_v1, %v6616_v1 }
 0x7c2   : > { %v6612_v45 = vmul.f32 -1.442695, %v1398_v62  ;;  %v6613_v47 = vmul.f32 -1.442695, %v1399_v23 }
 0x7c3   : > { %v1461_v9 = vpop.permute.xlu0 %1460 }
 0x7ca   : > { %v7875_v27 = vpop.eup %7874 }
 0x7cb   : > { %v7877_v33 = vpop.eup %7876  ;;  %v1504_v36 = vadd.f32 1.0, %v7875_v27 }
 0x7cc   : > { %v1503_v38 = vadd.f32 1.0, %v7877_v33 }
 0x7cd   : > { %7878 = vrcp.f32 %v1504_v36 }
 0x7ce   : > { %7880 = vrcp.f32 %v1503_v38 }
 0x7cf   : > { %7882 = vpow2.f32 %v6612_v45 }
 0x7d0   : > { %7884 = vpow2.f32 %v6613_v47 }
 0x7d7   : > { %v7879_v40 = vpop.eup %7878 }
 0x7d8   : > { %v7881_v43 = vpop.eup %7880  ;;  %1516 = vperm.xlu1 %7841, %v7879_v40  }
 0x7d9   : > { %1511 = vperm.xlu0 %7840, %v7881_v43   ;;  %v7883_v48 = vpop.eup %7882 }
 0x7da   : > { %v1406_v49 = vadd.f32 1.0, %v7883_v48  ;;  %v7885_v50 = vpop.eup %7884 }
 0x7db   : > { %v1407_v31 = vadd.f32 1.0, %v7885_v50 }
 0x7dc   : > { %7886 = vrcp.f32 %v1406_v49 }
 0x7dd   : > { %7888 = vrcp.f32 %v1407_v31 }
 0x7e6   : > { %v7887_v32 = vpop.eup %7886 }
 0x7e7   : > { %v1446_v35 = vsub.f32 1.0, %v7887_v32  ;;  %v1466_v55 = vmul.f32 %v7887_v32, %v1461_v9  ;;  %v7889_v58 = vpop.eup %7888 }
 0x7e8   : > { %v1447_v6 = vsub.f32 1.0, %v7889_v58 }
 0x7fd   : > { %v1451_v44 = vpop.permute.xlu1 %1450 }
 0x7fe   : > { %v1456_v56 = vmul.f32 %v1451_v44, %v1446_v35 }
 0x800   : > { %v1468_v57 = vadd.f32 %v1466_v55, %v1456_v56 }
 0x801   : > { %v1453_v59 = vpop.permute.xlu1 %1452 }
 0x802   : > { %v1695_v63 = vpack.c.bf16 %v1468_v57, %v1468_v57  ;;  %v1457_v8 = vmul.f32 %v1453_v59, %v1447_v6 }
 0x804   : > { %1697 = vrot.lane.b32.xlu0 %v1695_v63, %s8113_s16 }
 0x805   : > { %v1463_v13 = vpop.permute.xlu1 %1462 }
 0x806   : > { %v1467_v10 = vmul.f32 %v7889_v58, %v1463_v13 }
 0x808   : > { %v1469_v11 = vadd.f32 %v1467_v10, %v1457_v8 }
 0x80a   : > { %v1742_v12 = vpack.c.bf16 %v1469_v11, %v1469_v11 }
 0x80c   : > { %1744 = vrot.lane.b32.xlu1 %v1742_v12, %s8113_s16 }
 0x857   : > { %v1517_v14 = vpop.permute.xlu1 %1516 }
 0x858   : > { %v1520_v19 = vmul.f32 %v8511_v22, %v1517_v14  ;;  %v1512_v5 = vpop.permute.xlu0 %1511 }
 0x859   : > { %v1519_v60 = vmul.f32 %v8505_v51, %v1512_v5  ;;  %v6617_v51 = vld [vmem:[%s9712_s2 + $0x8] sm:$0xff] }
 0x85a   : > { %v1568_v16 = vpack.c.bf16 %v1520_v19, %v1520_v19  ;;  %v1478_v22 = vpack.c.bf16 %v6617_v51, %v6617_v51 }
 0x85b   : > { %v1521_v17 = vpack.c.bf16 %v1519_v60, %v1519_v60 }
 0x85c   : > { %v1570_v4 = vsel %vm460_vm1, %v1568_v16, 0 }
 0x85d   : > { %v1526_v27 = vsel %vm460_vm1, %v1521_v17, 0  ;;  %7162 = vmatpush3.bf16.msra.mxu1 %v1570_v4 }
 0x85e   : > { %7156 = vmatpush3.bf16.msra.mxu0 %v1526_v27  ;;  %7173 = vmatprep.subr.bf16.mxu1 %v8106_v18 }
 0x85f   : > { %7167 = vmatprep.subr.bf16.mxu0 %v8106_v18 }
 0x860   : > { %7164 = vmatmul.mubr.msk.bf16.vlgmr.msra.gmra.mrb[32].mxu1 %vm456_vm2, %v1475_v26 }
 0x861   : > { %7174 = vmatpush3.bf16.msra.mxu1 %v1570_v4  ;;  %7158 = vmatmul.mubr.msk.bf16.vlgmr.msra.gmra.mrb[36].mxu0 %vm456_vm2, %v1475_v26 }
 0x862   : > { %7168 = vmatpush3.bf16.msra.mxu0 %v1526_v27  ;;  %7169 = vmatprep.mubr.msk.bf16.mxu0 %vm8107_vm0, %v8106_v18 }
 0x863   : > { %7175 = vmatprep.mubr.msk.bf16.mxu1 %vm8107_vm0, %v8106_v18  ;;  %7179 = vmatprep.subr.bf16.mxu0 %v8106_v18 }
 0x864   : > { %7185 = vmatprep.subr.bf16.mxu1 %v8106_v18 }
 0x868   : > { %7176 = vmatmul.mubr.msk.bf16.vlgmr.msra.gmra.mrb[36].mxu1 %vm456_vm2, %v1478_v22 }
 0x869   : > { %7170 = vmatmul.mubr.msk.bf16.vlgmr.msra.gmra.mrb[40].mxu0 %vm456_vm2, %v1478_v22  ;;  %7187 = vmatprep.mubr.msk.bf16.mxu1 %vm8107_vm0, %v8106_v18 }
 0x86a   : > { %7181 = vmatprep.mubr.msk.bf16.mxu0 %vm8107_vm0, %v8106_v18 }
 0x876   : > { %v1698_v33 = vpop.permute.xlu0 %1697 }
 0x877   : > { %v1700_v36 = vsel %vm460_vm1, %v1698_v33, 0 }
 0x878   : > { %7180 = vmatpush3.bf16.msra.mxu0 %v1700_v36 }
 0x879   : > { %7191 = vmatprep.subr.bf16.mxu0 %v8106_v18 }
 0x87b   : > { %7182 = vmatmul.mubr.msk.bf16.vlgmr.msra.gmra.mrb[44].mxu0 %vm456_vm2, %v1475_v26 }
 0x87c   : > { %7192 = vmatpush3.bf16.msra.mxu0 %v8345_v29  ;;  %7195 = vmatprep.mubr.msk.bf16.mxu0 %vm8107_vm0, %v8106_v18 }
 0x87d   : > { %7193 = vmatprep.subr.bf16.mxu0 %v8106_v18 }
 0x87e   : > { %v1745_v38 = vpop.permute.xlu1 %1744 }
 0x87f   : > { %v1747_v62 = vsel %vm460_vm1, %v1745_v38, 0 }
 0x880   : > { %7186 = vmatpush3.bf16.msra.mxu1 %v1747_v62  ;;  %7194 = vmatpush3.bf16.msra.mxu0 %v8351_v30 }
 0x881   : > { %7199 = vmatprep.subr.bf16.mxu1 %v8106_v18  ;;  %7205 = vmatprep.subr.bf16.mxu0 %v8106_v18 }
 0x883   : > { %7188 = vmatmul.mubr.msk.bf16.vlgmr.msra.gmra.mrb[40].mxu1 %vm456_vm2, %v1475_v26 }
 0x884   : > { %7200 = vmatpush3.bf16.msra.mxu1 %v1700_v36  ;;  %7201 = vmatprep.mubr.msk.bf16.mxu1 %vm8107_vm0, %v8106_v18 }
 0x885   : > { %7211 = vmatprep.subr.bf16.mxu1 %v8106_v18 }
 0x88b   : > { %7202 = vmatmul.mubr.msk.bf16.vlgmr.msra.gmra.mrb[44].mxu1 %vm456_vm2, %v1478_v22 }
 0x88c   : > { %7212 = vmatpush3.bf16.msra.mxu1 %v8378_v61  ;;  %7215 = vmatprep.mubr.msk.bf16.mxu1 %vm8107_vm0, %v8106_v18 }
 0x88d   : > { %7213 = vmatprep.subr.bf16.mxu1 %v8106_v18 }
 0x890   : > { %7214 = vmatpush3.bf16.msra.mxu1 %v8385_v0 }
 0x891   : > { %7227 = vmatprep.subr.bf16.mxu1 %v8106_v18 }
 0x933   : > { %v8602_v29 = vpop.f32.mrb[32].mxu1 }
 0x934   : > { %v8604_v30 = vpop.f32.mrb[36].mxu0  ;;  %v7165_v40 = vpop.f32.mrb[33].mxu1 }
 0x935   : > { %v2055_v43 = vpack.c.bf16 %v8602_v29, %v8604_v30  ;;  %v7159_v45 = vpop.f32.mrb[37].mxu0  ;;  %v1609_v23 = vpop.f32.mrb[34].mxu1 }
 0x936   : > { %v1565_v61 = vpop.f32.mrb[38].mxu0  ;;  %v7166_v47 = vpop.f32.mrb[35].mxu1 }
 0x937   : > { %v7160_v48 = vpop.f32.mrb[39].mxu0 }
 0x93b   : > { %v8608_v49 = vpop.f32.mrb[36].mxu1 }
 0x93c   : > { %v8610_v50 = vpop.f32.mrb[40].mxu0  ;;  %v7177_v0 = vpop.f32.mrb[37].mxu1 }
 0x93d   : > { %v2056_v31 = vpack.c.bf16 %v8608_v49, %v8610_v50  ;;  %v7171_v32 = vpop.f32.mrb[41].mxu0  ;;  %v1692_v35 = vpop.f32.mrb[38].mxu1 }
 0x93e   : > { %v1652_v9 = vpop.f32.mrb[42].mxu0  ;;  %v7178_v44 = vpop.f32.mrb[39].mxu1 }
 0x93f   : > { %v7172_v55 = vpop.f32.mrb[43].mxu0 }
 0x94e   : > { %v1736_v56 = vpop.f32.mrb[44].mxu0 }
 0x94f   : > { %v7183_v57 = vpop.f32.mrb[45].mxu0 }
 0x950   : > { %v1739_v58 = vpop.f32.mrb[46].mxu0 }
 0x951   : > { %v7184_v59 = vpop.f32.mrb[47].mxu0 }
 0x956   : > { %v1783_v63 = vpop.f32.mrb[40].mxu1 }
 0x957   : > { %v1789_v6 = vpack.c.bf16 %v1783_v63, %v1736_v56  ;;  %v7189_v13 = vpop.f32.mrb[41].mxu1 }
 0x958   : > { %v1786_v8 = vpop.f32.mrb[42].mxu1 }
 0x959   : > { %v7190_v10 = vpop.f32.mrb[43].mxu1  ;;  %7196 = vmatmul.mubr.msk.bf16.vlgmr.msra.gmra.mrb[48].mxu0 %vm921_vm6, %v1789_v6  ;;  %v8671_v8 = vld [vmem:[%s8230_s21 + $0x20] sm:$0xff] }
 0x95a   : > { %7206 = vmatpush3.bf16.msra.mxu0 %v1747_v62  ;;  %7207 = vmatprep.mubr.msk.bf16.mxu0 %vm8107_vm0, %v8106_v18 }
 0x95b   : > { %7219 = vmatprep.subr.bf16.mxu0 %v8106_v18 }
 0x95e   : > { %v1870_v11 = vpop.f32.mrb[44].mxu1 }
 0x95f   : > { %v7203_v12 = vpop.f32.mrb[45].mxu1 }
 0x960   : > { %v1873_v14 = vpop.f32.mrb[46].mxu1 }
 0x961   : > { %7208 = vmatmul.mubr.msk.bf16.vlgmr.msra.gmra.mrb[52].mxu0 %vm456_vm2, %v1478_v22  ;;  %v7204_v19 = vpop.f32.mrb[47].mxu1  ;;  %v8678_v14 = vld [vmem:[%s8230_s21 + $0x28] sm:$0xff] }
 0x962   : > { %7220 = vmatpush3.bf16.msra.mxu0 %v8419_v21  ;;  %7223 = vmatprep.mubr.msk.bf16.mxu0 %vm8107_vm0, %v8106_v18  ;;  %v2279_v19 = vmul.f32 %v8671_v8, %v8273_v34 }
 0x963   : > { %7221 = vmatprep.subr.bf16.mxu0 %v8106_v18 }
 0x966   : > { %7222 = vmatpush3.bf16.msra.mxu0 %v8426_v24 }
 0x967   : > { %7235 = vmatprep.subr.bf16.mxu0 %v8106_v18 }
 0xa2c   : > { %v1827_v5 = vpop.f32.mrb[48].mxu0 }
 0xa2d   : > { %v1828_v60 = vadd.f32 %v1827_v5, %v8392_v3  ;;  %v7197_v1 = vpop.f32.mrb[49].mxu0  ;;  %v2280_v5 = vmul.f32 %v8678_v14, %v8273_v34 }
 0xa2e   : > { %v1830_v16 = vpop.f32.mrb[50].mxu0 }
 0xa2f   : > { %v1831_v21 = vadd.f32 %v1830_v16, %v8392_v3  ;;  %v7198_v17 = vpop.f32.mrb[51].mxu0  ;;  %v1834_v4 = vmax.f32 %v1828_v60, 0.0 }
 0xa31   : > { %v1835_v26 = vmax.f32 %v1831_v21, 0.0 }
 0xa33   : > { %v1963_v27 = vpack.c.bf16 %v1835_v26, %v1834_v4 }
 0xa34   : > { %v1910_v51 = vpop.f32.mrb[52].mxu0 }
 0xa35   : > { %v1916_v22 = vpack.c.bf16 %v1910_v51, %v1870_v11  ;;  %v7209_v24 = vpop.f32.mrb[53].mxu0 }
 0xa36   : > { %v1913_v33 = vpop.f32.mrb[54].mxu0 }
 0xa37   : > { %v7210_v36 = vpop.f32.mrb[55].mxu0  ;;  %7216 = vmatmul.mubr.msk.bf16.vlgmr.msra.gmra.mrb[48].mxu1 %vm921_vm6, %v1916_v22 }
 0xa38   : > { %7228 = vmatpush3.bf16.msra.mxu1 %v8399_v15  ;;  %7231 = vmatprep.mubr.msk.bf16.mxu1 %vm8107_vm0, %v8106_v18 }
 0xa39   : > { %7229 = vmatprep.subr.bf16.mxu1 %v8106_v18 }
 0xa3c   : > { %7230 = vmatpush3.bf16.msra.mxu1 %v8406_v20 }
 0xa3d   : > { %7247 = vmatprep.subr.bf16.mxu1 %v8106_v18 }
 0xa3f   : > { %7232 = vmatmul.mubr.msk.bf16.vlgmr.msra.gmra.mrb[52].mxu1 %vm921_vm6, %v1963_v27 }
 0xa40   : > { %7248 = vmatpush3.bf16.msra.mxu1 %v8469_v41  ;;  %7251 = vmatprep.mubr.msk.bf16.mxu1 %vm8107_vm0, %v8106_v18 }
 0xa41   : > { %7249 = vmatprep.subr.bf16.mxu1 %v8106_v18 }
 0xa44   : > { %7250 = vmatpush3.bf16.msra.mxu1 %v8476_v42 }
 0xa45   : > { %7255 = vmatprep.subr.bf16.mxu1 %v8106_v18 }
 0xb0a   : > { %v1954_v15 = vpop.f32.mrb[48].mxu1 }
 0xb0b   : > { %v1955_v38 = vadd.f32 %v1954_v15, %v8433_v25  ;;  %v7217_v62 = vpop.f32.mrb[49].mxu1 }
 0xb0c   : > { %v1957_v20 = vpop.f32.mrb[50].mxu1 }
 0xb0d   : > { %v1958_v40 = vadd.f32 %v1957_v20, %v8433_v25  ;;  %v7218_v45 = vpop.f32.mrb[51].mxu1  ;;  %v1961_v23 = vmax.f32 %v1955_v38, 0.0 }
 0xb0f   : > { %v1962_v61 = vmax.f32 %v1958_v40, 0.0 }
 0xb11   : > { %v1964_v41 = vpack.c.bf16 %v1962_v61, %v1961_v23 }
 0xb12   : > { %v2046_v47 = vpop.f32.mrb[52].mxu1 }
 0xb13   : > { %7224 = vmatmul.mubr.msk.bf16.vlgmr.msra.gmra.mrb[56].mxu0 %vm921_vm6, %v1964_v41  ;;  %v7233_v48 = vpop.f32.mrb[53].mxu1 }
 0xb14   : > { %v2049_v0 = vpop.f32.mrb[54].mxu1  ;;  %7236 = vmatpush3.bf16.msra.mxu0 %v8440_v46  ;;  %7237 = vmatprep.mubr.msk.bf16.mxu0 %vm8107_vm0, %v8106_v18 }
 0xb15   : > { %v7234_v42 = vpop.f32.mrb[55].mxu1  ;;  %7241 = vmatprep.subr.bf16.mxu0 %v8106_v18 }
 0xb1b   : > { %7238 = vmatmul.mubr.msk.bf16.vlgmr.msra.gmra.mrb[60].mxu0 %vm1225_vm8, %v2056_v31 }
 0xb1c   : > { %7242 = vmatpush3.bf16.msra.mxu0 %v8450_v53  ;;  %7243 = vmatprep.mubr.msk.bf16.mxu0 %vm8107_vm0, %v8106_v18 }
 0xb1d   : > { %7261 = vmatprep.subr.bf16.mxu0 %v8106_v18 }
 0xb27   : > { %7244 = vmatmul.mubr.msk.bf16.vlgmr.msra.gmra.mrb[60].mxu0 %vm1225_vm8, %v2055_v43 }
 0xb28   : > { %7263 = vmatprep.mubr.msk.bf16.mxu0 %vm8107_vm0, %v8106_v18 }
 0xbe6   : > { %v2002_v32 = vpop.f32.mrb[56].mxu0 }
 0xbe7   : > { %v2047_v35 = vadd.f32 %v2046_v47, %v2002_v32  ;;  %v7225_v49 = vpop.f32.mrb[57].mxu0 }
 0xbe8   : > { %v2005_v50 = vpop.f32.mrb[58].mxu0 }
 0xbe9   : > { %v2050_v31 = vadd.f32 %v2049_v0, %v2005_v50  ;;  %v7226_v9 = vpop.f32.mrb[59].mxu0  ;;  %v2053_v44 = vadd.f32 %v2047_v35, %v8485_v54 }
 0xbeb   : > { %v2054_v55 = vadd.f32 %v2050_v31, %v8485_v54 }
 0xbed   : > { %v2145_v56 = vpack.c.bf16 %v2054_v55, %v2053_v44 }
 0xbef   : > { %7252 = vmatmul.mubr.msk.bf16.vlgmr.msra.gmra.mrb[56].mxu1 %vm921_vm6, %v2145_v56 }
 0xbf0   : > { %7257 = vmatprep.mubr.msk.bf16.mxu1 %vm8107_vm0, %v8106_v18 }
 0xbfa   : > { %v2138_v29 = vpop.f32.mrb[60].mxu0 }
 0xbfb   : > { %v7245_v30 = vpop.f32.mrb[61].mxu0  ;;  %v2220_v45 = vadd.f32 %v2138_v29, %v8536_v2 }
 0xbfc   : > { %v2141_v43 = vpop.f32.mrb[62].mxu0 }
 0xbfd   : > { %v7246_v57 = vpop.f32.mrb[63].mxu0  ;;  %v2221_v61 = vadd.f32 %v2141_v43, %v8536_v2 }
 0xcc2   : > { %v2183_v58 = vpop.f32.mrb[56].mxu1 }
 0xcc3   : > { %v8667_v59 = vadd.f32 %v2183_v58, %v2138_v29  ;;  %v2222_v63 = vadd.f32 %v2183_v58, %v8495_v7  ;;  %v7253_v6 = vpop.f32.mrb[57].mxu1 }
 0xcc4   : > { %v2186_v13 = vpop.f32.mrb[58].mxu1 }
 0xcc5   : > { %v8673_v10 = vadd.f32 %v2186_v13, %v2141_v43  ;;  %v2223_v11 = vadd.f32 %v2186_v13, %v8495_v7  ;;  %2226 = vrot.lane.b32.xlu0 %v2222_v63, %s8111_s14  ;;  %v7254_v12 = vpop.f32.mrb[59].mxu1  ;;  %v2192_v60 = vadd.f32 %v8667_v59, %v8522_v37 }
 0xcc7   : > { %2228 = vrot.lane.b32.xlu1 %v2223_v11, %s8111_s14  ;;  %v2193_v1 = vadd.f32 %v8673_v10, %v8522_v37  ;;  %v6635_v16 = vmul.f32 -1.442695, %v2192_v60  ;;  %v2207_v58 = vadd.f32 %v8673_v10, %v8546_v39 }
 0xcc9   : > { %2283 = vrot.lane.b32.xlu0 %v2279_v19, %s8109_s11  ;;  %v6636_v21 = vmul.f32 -1.442695, %v2193_v1  ;;  %7890 = vpow2.f32 %v6635_v16  ;;  %v6638_v6 = vmul.f32 -1.442695, %v2207_v58 }
 0xccb   : > { %2285 = vrot.lane.b32.xlu1 %v2280_v5, %s8109_s11  ;;  %7892 = vpow2.f32 %v6636_v21 }
 0xcd3   : > { %v7891_v17 = vpop.eup %7890 }
 0xcd4   : > { %v2200_v26 = vadd.f32 1.0, %v7891_v17 }
 0xcd5   : > { %v7893_v4 = vpop.eup %7892 }
 0xcd6   : > { %v2201_v27 = vadd.f32 1.0, %v7893_v4  ;;  %7894 = vrcp.f32 %v2200_v26 }
 0xcd8   : > { %7896 = vrcp.f32 %v2201_v27 }
 0xce0   : > { %v7895_v51 = vpop.eup %7894 }
 0xce2   : > { %v7897_v33 = vpop.eup %7896 }
 0xd37   : > { %v2227_v22 = vpop.permute.xlu0 %2226 }
 0xd38   : > { %v2232_v24 = vmul.f32 %v7895_v51, %v2227_v22 }
 0xd39   : > { %v2229_v36 = vpop.permute.xlu1 %2228 }
 0xd3a   : > { %v2233_v15 = vmul.f32 %v7897_v33, %v2229_v36  ;;  %2236 = vrot.lane.b32.xlu0 %v2232_v24, %s8111_s14 }
 0xd3b   : > { %v2284_v38 = vpop.permute.xlu0 %2283 }
 0xd3c   : > { %2238 = vrot.lane.b32.xlu1 %v2233_v15, %s8111_s14  ;;  %v2289_v62 = vsel %vm616_vm5, %v2284_v38, 0.0 }
 0xd3d   : > { %v2286_v20 = vpop.permute.xlu1 %2285 }
 0xd3e   : > { %v2292_v40 = vsel %vm616_vm5, %v2286_v20, 0.0 }
 0xd59   : > { %2290 = vadd.xlane.f32.xlu0 %v2289_v62  ;;  %v6641_v62 = vld [vmem:[%s9711_s1 + $0x10] sm:$0xff] }
 0xd60   : > { %2293 = vadd.xlane.f32.xlu1 %v2292_v40 }
 0xdac   : > { %v2237_v23 = vpop.permute.xlu0 %2236 }
 0xdad   : > { %v2242_v41 = vadd.f32 %v2237_v23, %v2220_v45  ;;  %v2275_v45 = vpack.c.bf16 %v6641_v62, %v6641_v62 }
 0xdae   : > { %v2239_v47 = vpop.permute.xlu1 %2238 }
 0xdaf   : > { %7898 = vtanh.f32 %v2242_v41  ;;  %v2243_v48 = vadd.f32 %v2239_v47, %v2221_v61 }
 0xdb1   : > { %7900 = vtanh.f32 %v2243_v48 }
 0xdb9   : > { %v7899_v0 = vpop.eup %7898 }
 0xdba   : > { %2250 = vrot.lane.b32.xlu0 %v7899_v0, %s8113_s16 }
 0xdbb   : > { %v7901_v42 = vpop.eup %7900 }
 0xdbc   : > { %2252 = vrot.lane.b32.xlu1 %v7901_v42, %s8113_s16 }
 0xdbe   : > { %2260 = vrot.lane.b32.xlu0 %v2053_v44, %s8112_s15 }
 0xdc0   : > { %2262 = vrot.lane.b32.xlu1 %v2054_v55, %s8112_s15  ;;  %v2206_v55 = vadd.f32 %v8667_v59, %v8546_v39 }
 0xdc2   : > { %v6637_v63 = vmul.f32 -1.442695, %v2206_v55 }
 0xde6   : > { %v2291_v32 = vpop.xlane.xlu0 %2290 }
 0xde7   : > { %v2295_v35 = vadd.f32 %v2291_v32, %v8289_v52 }
 0xde9   : > { %v6643_v49 = vmul.f32 -1.442695, %v2295_v35  ;;  %v8747_v35 = vld [vmem:[%s9713_s3 + $0x8] sm:$0xff]  }
 0xdeb   : > { %7902 = vpow2.f32 %v6643_v49  ;;  %v8760_v49 = vld [vmem:[%s9713_s3 + $0x10] sm:$0xff]  }
 0xded   : > { %v2294_v50 = vpop.xlane.xlu1 %2293 }
 0xdee   : > { %v2296_v31 = vadd.f32 %v2294_v50, %v8289_v52  ;;  %v8769_v50 = vld [vmem:[%s9713_s3 + $0x18] sm:$0xff]  }
 0xdf0   : > { %v6644_v9 = vmul.f32 -1.442695, %v2296_v31  ;;  %v8778_v31 = vld [vmem:[%s9713_s3 + $0x20] sm:$0xff]  }
 0xdf2   : > { %7904 = vpow2.f32 %v6644_v9 }
 0xdf5   : > { %v7903_v56 = vpop.eup %7902 }
 0xdf6   : > { %v2303_v29 = vadd.f32 1.0, %v7903_v56 }
 0xdf8   : > { %7906 = vrcp.f32 %v2303_v29 }
 0xdfc   : > { %v7905_v30 = vpop.eup %7904 }
 0xdfd   : > { %v2304_v43 = vadd.f32 1.0, %v7905_v30 }
 0xdff   : > { %7908 = vrcp.f32 %v2304_v43 }
 0xe00   : > { %7910 = vpow2.f32 %v6637_v63 }
 0xe01   : > { %7912 = vpow2.f32 %v6638_v6 }
 0xe02   : > { %v7907_v57 = vpop.eup %7906 }
 0xe03   : > { %2311 = vperm.xlu0 %7840, %v7907_v57  }
 0xe09   : > { %v7909_v44 = vpop.eup %7908 }
 0xe0a   : > { %2316 = vperm.xlu1 %7841, %v7909_v44   ;;  %v7911_v13 = vpop.eup %7910 }
 0xe0b   : > { %v7913_v11 = vpop.eup %7912  ;;  %v2214_v12 = vadd.f32 1.0, %v7911_v13 }
 0xe0c   : > { %v2215_v19 = vadd.f32 1.0, %v7913_v11 }
 0xe0d   : > { %7914 = vrcp.f32 %v2214_v12 }
 0xe0e   : > { %7916 = vrcp.f32 %v2215_v19 }
 0xe17   : > { %v7915_v5 = vpop.eup %7914 }
 0xe18   : > { %v7917_v1 = vpop.eup %7916  ;;  %v2246_v21 = vsub.f32 1.0, %v7915_v5 }
 0xe19   : > { %v2247_v4 = vsub.f32 1.0, %v7917_v1 }
 0xe2c   : > { %v2251_v60 = vpop.permute.xlu0 %2250 }
 0xe2d   : > { %v2256_v17 = vmul.f32 %v2251_v60, %v2246_v21 }
 0xe2e   : > { %v2253_v16 = vpop.permute.xlu1 %2252 }
 0xe2f   : > { %v2257_v27 = vmul.f32 %v2253_v16, %v2247_v4 }
 0xe30   : > { %v2261_v59 = vpop.permute.xlu0 %2260 }
 0xe31   : > { %v2266_v26 = vmul.f32 %v7915_v5, %v2261_v59 }
 0xe32   : > { %v2263_v10 = vpop.permute.xlu1 %2262 }
 0xe33   : > { %v2268_v51 = vadd.f32 %v2266_v26, %v2256_v17  ;;  %v2267_v22 = vmul.f32 %v7917_v1, %v2263_v10 }
 0xe35   : > { %v2495_v24 = vpack.c.bf16 %v2268_v51, %v2268_v51  ;;  %v2269_v33 = vadd.f32 %v2267_v22, %v2257_v27  ;;  %v8803_v22 = vld [vmem:[%s9713_s3 + $0x38] sm:$0xff]  }
 0xe37   : > { %v2542_v36 = vpack.c.bf16 %v2269_v33, %v2269_v33  ;;  %2497 = vrot.lane.b32.xlu0 %v2495_v24, %s8113_s16  ;;  %v8812_v24 = vld [vmem:[%s9713_s3 + $0x40] sm:$0xff]  }
 0xe39   : > { %2544 = vrot.lane.b32.xlu1 %v2542_v36, %s8113_s16 }
 0xe82   : > { %v2312_v15 = vpop.permute.xlu0 %2311 }
 0xe83   : > { %v2319_v38 = vmul.f32 %v8671_v8, %v2312_v15  ;;  %v6642_v8 = vld [vmem:[%s9712_s2 + $0x10] sm:$0xff] }
 0xe84   : > { %v8725_v48 = vpack.c.bf16 %v6642_v8, %v6642_v8 }
 0xe85   : > { %v2321_v20 = vpack.c.bf16 %v2319_v38, %v2319_v38 }
 0xe87   : > { %v2326_v40 = vsel %vm460_vm1, %v2321_v20, 0 }
 0xe88   : > { %7256 = vmatpush3.bf16.msra.mxu1 %v2326_v40 }
 0xe89   : > { %v2317_v23 = vpop.permute.xlu1 %2316  ;;  %7267 = vmatprep.subr.bf16.mxu1 %v8106_v18 }
 0xe8a   : > { %v2320_v61 = vmul.f32 %v8678_v14, %v2317_v23 }
 0xe8b   : > { %7258 = vmatmul.mubr.msk.bf16.vlgmr.msra.gmra.mrb[60].mxu1 %vm456_vm2, %v2275_v45 }
 0xe8c   : > { %v2368_v41 = vpack.c.bf16 %v2320_v61, %v2320_v61  ;;  %7268 = vmatpush3.bf16.msra.mxu1 %v2326_v40  ;;  %7269 = vmatprep.mubr.msk.bf16.mxu1 %vm8107_vm0, %v8106_v18 }
 0xe8d   : > { %7279 = vmatprep.subr.bf16.mxu1 %v8106_v18 }
 0xe8e   : > { %v2370_v47 = vsel %vm460_vm1, %v2368_v41, 0 }
 0xe8f   : > { %7262 = vmatpush3.bf16.msra.mxu0 %v2370_v47 }
 0xe90   : > { %7273 = vmatprep.subr.bf16.mxu0 %v8106_v18 }
 0xe92   : > { %7264 = vmatmul.mubr.msk.bf16.vlgmr.msra.gmra.mrb[64].mxu0 %vm456_vm2, %v2275_v45 }
 0xe93   : > { %7274 = vmatpush3.bf16.msra.mxu0 %v2370_v47  ;;  %7275 = vmatprep.mubr.msk.bf16.mxu0 %vm8107_vm0, %v8106_v18 }
 0xe94   : > { %7270 = vmatmul.mubr.msk.bf16.vlgmr.msra.gmra.mrb[64].mxu1 %vm456_vm2, %v8725_v48  ;;  %7285 = vmatprep.subr.bf16.mxu0 %v8106_v18 }
 0xe95   : > { %7281 = vmatprep.mubr.msk.bf16.mxu1 %vm8107_vm0, %v8106_v18 }
 0xe9a   : > { %7276 = vmatmul.mubr.msk.bf16.vlgmr.msra.gmra.mrb[68].mxu0 %vm456_vm2, %v8725_v48 }
 0xe9b   : > { %7287 = vmatprep.mubr.msk.bf16.mxu0 %vm8107_vm0, %v8106_v18 }
 0xea9   : > { %v2498_v14 = vpop.permute.xlu0 %2497 }
 0xeaa   : > { %v2500_v0 = vsel %vm460_vm1, %v2498_v14, 0 }
 0xeab   : > { %7280 = vmatpush3.bf16.msra.mxu1 %v2500_v0  ;;  %v2545_v42 = vpop.permute.xlu1 %2544 }
 0xeac   : > { %v2547_v32 = vsel %vm460_vm1, %v2545_v42, 0  ;;  %7291 = vmatprep.subr.bf16.mxu1 %v8106_v18 }
 0xead   : > { %7286 = vmatpush3.bf16.msra.mxu0 %v2547_v32 }
 0xeae   : > { %7282 = vmatmul.mubr.msk.bf16.vlgmr.msra.gmra.mrb[68].mxu1 %vm456_vm2, %v2275_v45  ;;  %7299 = vmatprep.subr.bf16.mxu0 %v8106_v18 }
 0xeaf   : > { %7292 = vmatpush3.bf16.msra.mxu1 %v8747_v35  ;;  %7295 = vmatprep.mubr.msk.bf16.mxu1 %vm8107_vm0, %v8106_v18 }
 0xeb0   : > { %7288 = vmatmul.mubr.msk.bf16.vlgmr.msra.gmra.mrb[72].mxu0 %vm456_vm2, %v2275_v45  ;;  %7293 = vmatprep.subr.bf16.mxu1 %v8106_v18 }
 0xeb1   : > { %7300 = vmatpush3.bf16.msra.mxu0 %v2500_v0  ;;  %7301 = vmatprep.mubr.msk.bf16.mxu0 %vm8107_vm0, %v8106_v18 }
 0xeb2   : > { %7311 = vmatprep.subr.bf16.mxu0 %v8106_v18 }
 0xeb3   : > { %7294 = vmatpush3.bf16.msra.mxu1 %v8760_v49 }
 0xeb4   : > { %7305 = vmatprep.subr.bf16.mxu1 %v8106_v18 }
 0xeb8   : > { %7302 = vmatmul.mubr.msk.bf16.vlgmr.msra.gmra.mrb[76].mxu0 %vm456_vm2, %v8725_v48 }
 0xeb9   : > { %7312 = vmatpush3.bf16.msra.mxu0 %v8769_v50  ;;  %7315 = vmatprep.mubr.msk.bf16.mxu0 %vm8107_vm0, %v8106_v18 }
 0xeba   : > { %7313 = vmatprep.subr.bf16.mxu0 %v8106_v18 }
 0xebd   : > { %7314 = vmatpush3.bf16.msra.mxu0 %v8778_v31 }
 0xebe   : > { %7327 = vmatprep.subr.bf16.mxu0 %v8106_v18 }
 0xf5e   : > { %v8782_v9 = vpop.f32.mrb[60].mxu1 }
 0xf5f   : > { %v7259_v56 = vpop.f32.mrb[61].mxu1 }
 0xf60   : > { %v2365_v29 = vpop.f32.mrb[62].mxu1  ;;  %v8822_v56 = vld [vmem:[%s9713_s3 + $0x28] sm:$0xff]  }
 0xf61   : > { %v7260_v30 = vpop.f32.mrb[63].mxu1  ;;  %v8831_v29 = vld [vmem:[%s9713_s3 + $0x30] sm:$0xff]  }
 0xf62   : > { %v8839_v30 = vld [vmem:[%s9714_s4 + $0x10] sm:$0xff]  }
 0xf65   : > { %v8784_v43 = vpop.f32.mrb[64].mxu0 }
 0xf66   : > { %v2855_v57 = vpack.c.bf16 %v8784_v43, %v8782_v9  ;;  %v7265_v44 = vpop.f32.mrb[65].mxu0 }
 0xf67   : > { %v2409_v55 = vpop.f32.mrb[66].mxu0  ;;  %v8788_v58 = vpop.f32.mrb[64].mxu1  ;;  %v8848_v44 = vld [vmem:[%s9714_s4 + $0x18] sm:$0xff]  }
 0xf68   : > { %v7266_v63 = vpop.f32.mrb[67].mxu0  ;;  %v7271_v6 = vpop.f32.mrb[65].mxu1 }
 0xf69   : > { %v2452_v13 = vpop.f32.mrb[66].mxu1 }
 0xf6a   : > { %v7272_v11 = vpop.f32.mrb[67].mxu1 }
 0xf6d   : > { %v8790_v12 = vpop.f32.mrb[68].mxu0 }
 0xf6e   : > { %v2856_v19 = vpack.c.bf16 %v8790_v12, %v8788_v58  ;;  %v7277_v5 = vpop.f32.mrb[69].mxu0 }
 0xf6f   : > { %v2492_v60 = vpop.f32.mrb[70].mxu0 }
 0xf70   : > { %v7278_v1 = vpop.f32.mrb[71].mxu0 }
 0xf81   : > { %v2536_v16 = vpop.f32.mrb[68].mxu1 }
 0xf82   : > { %v7283_v21 = vpop.f32.mrb[69].mxu1 }
 0xf83   : > { %v2539_v59 = vpop.f32.mrb[70].mxu1  ;;  %v2583_v17 = vpop.f32.mrb[72].mxu0 }
 0xf84   : > { %v2589_v4 = vpack.c.bf16 %v2583_v17, %v2536_v16  ;;  %v7284_v26 = vpop.f32.mrb[71].mxu1  ;;  %v7289_v10 = vpop.f32.mrb[73].mxu0 }
 0xf85   : > { %v2586_v27 = vpop.f32.mrb[74].mxu0 }
 0xf86   : > { %v7290_v51 = vpop.f32.mrb[75].mxu0  ;;  %7296 = vmatmul.mubr.msk.bf16.vlgmr.msra.gmra.mrb[72].mxu1 %vm921_vm6, %v2589_v4 }
 0xf87   : > { %7306 = vmatpush3.bf16.msra.mxu1 %v2547_v32  ;;  %7307 = vmatprep.mubr.msk.bf16.mxu1 %vm8107_vm0, %v8106_v18 }
 0xf88   : > { %7319 = vmatprep.subr.bf16.mxu1 %v8106_v18 }
 0xf8b   : > { %v2670_v33 = vpop.f32.mrb[76].mxu0 }
 0xf8c   : > { %v7303_v36 = vpop.f32.mrb[77].mxu0 }
 0xf8d   : > { %v2673_v15 = vpop.f32.mrb[78].mxu0 }
 0xf8e   : > { %7308 = vmatmul.mubr.msk.bf16.vlgmr.msra.gmra.mrb[76].mxu1 %vm456_vm2, %v8725_v48  ;;  %v7304_v38 = vpop.f32.mrb[79].mxu0 }
 0xf8f   : > { %7320 = vmatpush3.bf16.msra.mxu1 %v8803_v22  ;;  %7323 = vmatprep.mubr.msk.bf16.mxu1 %vm8107_vm0, %v8106_v18 }
 0xf90   : > { %7321 = vmatprep.subr.bf16.mxu1 %v8106_v18 }
 0xf93   : > { %7322 = vmatpush3.bf16.msra.mxu1 %v8812_v24 }
 0xf94   : > { %7335 = vmatprep.subr.bf16.mxu1 %v8106_v18 }
0x1059   : > { %v2627_v62 = vpop.f32.mrb[72].mxu1 }
0x105a   : > { %v2628_v20 = vadd.f32 %v2627_v62, %v8392_v3  ;;  %v7297_v40 = vpop.f32.mrb[73].mxu1 }
0x105b   : > { %v2630_v45 = vpop.f32.mrb[74].mxu1 }
0x105c   : > { %v2631_v23 = vadd.f32 %v2630_v45, %v8392_v3  ;;  %v7298_v61 = vpop.f32.mrb[75].mxu1  ;;  %v2634_v41 = vmax.f32 %v2628_v20, 0.0 }
0x105e   : > { %v2635_v8 = vmax.f32 %v2631_v23, 0.0  ;;  %v8882_v23 = vld [vmem:[%s8230_s21 + $0x30] sm:$0xff] }
0x1060   : > { %v2763_v47 = vpack.c.bf16 %v2635_v8, %v2634_v41 }
0x1061   : > { %v2710_v48 = vpop.f32.mrb[76].mxu1 }
0x1062   : > { %v2716_v14 = vpack.c.bf16 %v2710_v48, %v2670_v33  ;;  %v7309_v0 = vpop.f32.mrb[77].mxu1  ;;  %v3079_v48 = vmul.f32 %v8882_v23, %v8273_v34 }
0x1063   : > { %v2713_v42 = vpop.f32.mrb[78].mxu1 }
0x1064   : > { %v7310_v32 = vpop.f32.mrb[79].mxu1  ;;  %7316 = vmatmul.mubr.msk.bf16.vlgmr.msra.gmra.mrb[80].mxu0 %vm921_vm6, %v2716_v14 }
0x1065   : > { %7328 = vmatpush3.bf16.msra.mxu0 %v8822_v56  ;;  %7331 = vmatprep.mubr.msk.bf16.mxu0 %vm8107_vm0, %v8106_v18 }
0x1066   : > { %7329 = vmatprep.subr.bf16.mxu0 %v8106_v18 }
0x1069   : > { %7330 = vmatpush3.bf16.msra.mxu0 %v8831_v29 }
0x106a   : > { %7347 = vmatprep.subr.bf16.mxu0 %v8106_v18 }
0x106c   : > { %7332 = vmatmul.mubr.msk.bf16.vlgmr.msra.gmra.mrb[84].mxu0 %vm921_vm6, %v2763_v47  ;;  %v8889_v47 = vld [vmem:[%s8230_s21 + $0x38] sm:$0xff] }
0x106d   : > { %7348 = vmatpush3.bf16.msra.mxu0 %v8839_v30  ;;  %7351 = vmatprep.mubr.msk.bf16.mxu0 %vm8107_vm0, %v8106_v18  ;;  %v3080_v14 = vmul.f32 %v8889_v47, %v8273_v34 }
0x106e   : > { %7349 = vmatprep.subr.bf16.mxu0 %v8106_v18 }
0x1071   : > { %7350 = vmatpush3.bf16.msra.mxu0 %v8848_v44 }
0x1072   : > { %7355 = vmatprep.subr.bf16.mxu0 %v8106_v18 }
0x1137   : > { %v2754_v55 = vpop.f32.mrb[80].mxu0 }
0x1138   : > { %v2755_v63 = vadd.f32 %v2754_v55, %v8433_v25  ;;  %v7317_v6 = vpop.f32.mrb[81].mxu0 }
0x1139   : > { %v2757_v13 = vpop.f32.mrb[82].mxu0 }
0x113a   : > { %v2758_v11 = vadd.f32 %v2757_v13, %v8433_v25  ;;  %v7318_v5 = vpop.f32.mrb[83].mxu0  ;;  %v2761_v60 = vmax.f32 %v2755_v63, 0.0 }
0x113c   : > { %v2762_v1 = vmax.f32 %v2758_v11, 0.0 }
0x113e   : > { %v2764_v16 = vpack.c.bf16 %v2762_v1, %v2761_v60 }
0x113f   : > { %v2846_v21 = vpop.f32.mrb[84].mxu0 }
0x1140   : > { %7324 = vmatmul.mubr.msk.bf16.vlgmr.msra.gmra.mrb[80].mxu1 %vm921_vm6, %v2764_v16  ;;  %v7333_v59 = vpop.f32.mrb[85].mxu0 }
0x1141   : > { %v2849_v17 = vpop.f32.mrb[86].mxu0  ;;  %7336 = vmatpush3.bf16.msra.mxu1 %v8440_v46  ;;  %7337 = vmatprep.mubr.msk.bf16.mxu1 %vm8107_vm0, %v8106_v18 }
0x1142   : > { %v7334_v4 = vpop.f32.mrb[87].mxu0  ;;  %7341 = vmatprep.subr.bf16.mxu1 %v8106_v18 }
0x1148   : > { %7338 = vmatmul.mubr.msk.bf16.vlgmr.msra.gmra.mrb[84].mxu1 %vm1225_vm8, %v2856_v19 }
0x1149   : > { %7342 = vmatpush3.bf16.msra.mxu1 %v8450_v53  ;;  %7343 = vmatprep.mubr.msk.bf16.mxu1 %vm8107_vm0, %v8106_v18 }
0x114a   : > { %7361 = vmatprep.subr.bf16.mxu1 %v8106_v18 }
0x1154   : > { %7344 = vmatmul.mubr.msk.bf16.vlgmr.msra.gmra.mrb[84].mxu1 %vm1225_vm8, %v2855_v57 }
0x1155   : > { %7363 = vmatprep.mubr.msk.bf16.mxu1 %vm8107_vm0, %v8106_v18 }
0x1213   : > { %v2802_v26 = vpop.f32.mrb[80].mxu1 }
0x1214   : > { %v2847_v10 = vadd.f32 %v2846_v21, %v2802_v26  ;;  %v7325_v58 = vpop.f32.mrb[81].mxu1 }
0x1215   : > { %v2805_v12 = vpop.f32.mrb[82].mxu1 }
0x1216   : > { %v2850_v19 = vadd.f32 %v2849_v17, %v2805_v12  ;;  %v7326_v27 = vpop.f32.mrb[83].mxu1  ;;  %v2853_v51 = vadd.f32 %v2847_v10, %v8485_v54 }
0x1218   : > { %v2854_v33 = vadd.f32 %v2850_v19, %v8485_v54 }
0x121a   : > { %v2945_v36 = vpack.c.bf16 %v2854_v33, %v2853_v51 }
0x121c   : > { %7352 = vmatmul.mubr.msk.bf16.vlgmr.msra.gmra.mrb[88].mxu0 %vm921_vm6, %v2945_v36 }
0x121d   : > { %7357 = vmatprep.mubr.msk.bf16.mxu0 %vm8107_vm0, %v8106_v18 }
0x1227   : > { %v2938_v9 = vpop.f32.mrb[84].mxu1 }
0x1228   : > { %v7345_v43 = vpop.f32.mrb[85].mxu1  ;;  %v3020_v58 = vadd.f32 %v2938_v9, %v8536_v2 }
0x1229   : > { %v2941_v57 = vpop.f32.mrb[86].mxu1 }
0x122a   : > { %v7346_v15 = vpop.f32.mrb[87].mxu1  ;;  %v3021_v19 = vadd.f32 %v2941_v57, %v8536_v2 }
0x12ef   : > { %v2983_v38 = vpop.f32.mrb[88].mxu0 }
0x12f0   : > { %v8878_v62 = vadd.f32 %v2983_v38, %v2938_v9  ;;  %v3022_v20 = vadd.f32 %v2983_v38, %v8495_v7  ;;  %v7353_v40 = vpop.f32.mrb[89].mxu0 }
0x12f1   : > { %v2986_v45 = vpop.f32.mrb[90].mxu0 }
0x12f2   : > { %v8884_v61 = vadd.f32 %v2986_v45, %v2941_v57  ;;  %v3023_v41 = vadd.f32 %v2986_v45, %v8495_v7  ;;  %3026 = vrot.lane.b32.xlu0 %v3022_v20, %s8111_s14  ;;  %v7354_v8 = vpop.f32.mrb[91].mxu0  ;;  %v2992_v0 = vadd.f32 %v8878_v62, %v8522_v37 }
0x12f4   : > { %3028 = vrot.lane.b32.xlu1 %v3023_v41, %s8111_s14  ;;  %v2993_v42 = vadd.f32 %v8884_v61, %v8522_v37  ;;  %v6660_v32 = vmul.f32 -1.442695, %v2992_v0 }
0x12f6   : > { %3083 = vrot.lane.b32.xlu0 %v3079_v48, %s8109_s11  ;;  %v6661_v55 = vmul.f32 -1.442695, %v2993_v42  ;;  %7918 = vpow2.f32 %v6660_v32  ;;  %v3007_v32 = vadd.f32 %v8884_v61, %v8546_v39 }
0x12f8   : > { %3085 = vrot.lane.b32.xlu1 %v3080_v14, %s8109_s11  ;;  %7920 = vpow2.f32 %v6661_v55 }
0x1300   : > { %v7919_v63 = vpop.eup %7918 }
0x1301   : > { %v3000_v13 = vadd.f32 1.0, %v7919_v63  ;;  %v6663_v63 = vmul.f32 -1.442695, %v3007_v32 }
0x1302   : > { %v7921_v6 = vpop.eup %7920 }
0x1303   : > { %v3001_v11 = vadd.f32 1.0, %v7921_v6  ;;  %7922 = vrcp.f32 %v3000_v13 }
0x1305   : > { %7924 = vrcp.f32 %v3001_v11 }
0x130d   : > { %v7923_v5 = vpop.eup %7922 }
0x130f   : > { %v7925_v16 = vpop.eup %7924 }
0x1364   : > { %v3027_v60 = vpop.permute.xlu0 %3026 }
0x1365   : > { %v3032_v1 = vmul.f32 %v7923_v5, %v3027_v60 }
0x1366   : > { %v3029_v21 = vpop.permute.xlu1 %3028 }
0x1367   : > { %v3033_v59 = vmul.f32 %v7925_v16, %v3029_v21  ;;  %3036 = vrot.lane.b32.xlu0 %v3032_v1, %s8111_s14 }
0x1368   : > { %v3084_v17 = vpop.permute.xlu0 %3083 }
0x1369   : > { %3038 = vrot.lane.b32.xlu1 %v3033_v59, %s8111_s14  ;;  %v3089_v4 = vsel %vm616_vm5, %v3084_v17, 0.0 }
0x136a   : > { %v3086_v26 = vpop.permute.xlu1 %3085 }
0x136b   : > { %v3092_v10 = vsel %vm616_vm5, %v3086_v26, 0.0 }
0x1386   : > { %3090 = vadd.xlane.f32.xlu0 %v3089_v4 }
0x138d   : > { %3093 = vadd.xlane.f32.xlu1 %v3092_v10 }
0x13d9   : > { %v3037_v12 = vpop.permute.xlu0 %3036 }
0x13da   : > { %v3042_v27 = vadd.f32 %v3037_v12, %v3020_v58 }
0x13db   : > { %v3039_v36 = vpop.permute.xlu1 %3038 }
0x13dc   : > { %7926 = vtanh.f32 %v3042_v27  ;;  %v3043_v43 = vadd.f32 %v3039_v36, %v3021_v19 }
0x13de   : > { %7928 = vtanh.f32 %v3043_v43 }
0x13e6   : > { %v7927_v15 = vpop.eup %7926 }
0x13e7   : > { %3050 = vrot.lane.b32.xlu0 %v7927_v15, %s8113_s16 }
0x13e8   : > { %v7929_v38 = vpop.eup %7928 }
0x13e9   : > { %3052 = vrot.lane.b32.xlu1 %v7929_v38, %s8113_s16  ;;  %v6666_v38 = vld [vmem:[%s9711_s1 + $0x18] sm:$0xff] }
0x13eb   : > { %3060 = vrot.lane.b32.xlu0 %v2853_v51, %s8112_s15 }
0x13ed   : > { %3062 = vrot.lane.b32.xlu1 %v2854_v33, %s8112_s15  ;;  %v3006_v33 = vadd.f32 %v8878_v62, %v8546_v39 }
0x13ef   : > { %v6662_v55 = vmul.f32 -1.442695, %v3006_v33 }
0x1413   : > { %v3091_v20 = vpop.xlane.xlu0 %3090 }
0x1414   : > { %v3095_v9 = vadd.f32 %v3091_v20, %v8289_v52 }
0x1416   : > { %v6668_v40 = vmul.f32 -1.442695, %v3095_v9 }
0x1418   : > { %7930 = vpow2.f32 %v6668_v40  ;;  %v3075_v40 = vpack.c.bf16 %v6666_v38, %v6666_v38 }
0x141a   : > { %v3094_v57 = vpop.xlane.xlu1 %3093 }
0x141b   : > { %v3096_v45 = vadd.f32 %v3094_v57, %v8289_v52 }
0x141d   : > { %v6669_v41 = vmul.f32 -1.442695, %v3096_v45 }
0x141f   : > { %7932 = vpow2.f32 %v6669_v41 }
0x1422   : > { %v7931_v8 = vpop.eup %7930 }
0x1423   : > { %v3103_v48 = vadd.f32 1.0, %v7931_v8 }
0x1425   : > { %7934 = vrcp.f32 %v3103_v48 }
0x1429   : > { %v7933_v14 = vpop.eup %7932 }
0x142a   : > { %v3104_v0 = vadd.f32 1.0, %v7933_v14 }
0x142c   : > { %7936 = vrcp.f32 %v3104_v0 }
0x142d   : > { %7938 = vpow2.f32 %v6662_v55 }
0x142e   : > { %7940 = vpow2.f32 %v6663_v63 }
0x142f   : > { %v7935_v42 = vpop.eup %7934 }
0x1430   : > { %3111 = vperm.xlu0 %7840, %v7935_v42  }
0x1436   : > { %v7937_v51 = vpop.eup %7936 }
0x1437   : > { %3116 = vperm.xlu1 %7841, %v7937_v51   ;;  %v7939_v6 = vpop.eup %7938 }
0x1438   : > { %v7941_v13 = vpop.eup %7940  ;;  %v3014_v11 = vadd.f32 1.0, %v7939_v6 }
0x1439   : > { %v3015_v5 = vadd.f32 1.0, %v7941_v13 }
0x143a   : > { %7942 = vrcp.f32 %v3014_v11 }
0x143b   : > { %7944 = vrcp.f32 %v3015_v5 }
0x1444   : > { %v7943_v60 = vpop.eup %7942 }
0x1445   : > { %v7945_v16 = vpop.eup %7944  ;;  %v3046_v59 = vsub.f32 1.0, %v7943_v60 }
0x1446   : > { %v3047_v4 = vsub.f32 1.0, %v7945_v16 }
0x1459   : > { %v3051_v1 = vpop.permute.xlu0 %3050 }
0x145a   : > { %v3056_v17 = vmul.f32 %v3051_v1, %v3046_v59 }
0x145b   : > { %v3053_v21 = vpop.permute.xlu1 %3052 }
0x145c   : > { %v3057_v10 = vmul.f32 %v3053_v21, %v3047_v4 }
0x145d   : > { %v3061_v62 = vpop.permute.xlu0 %3060 }
0x145e   : > { %v3066_v26 = vmul.f32 %v7943_v60, %v3061_v62 }
0x145f   : > { %v3063_v61 = vpop.permute.xlu1 %3062 }
0x1460   : > { %v3068_v58 = vadd.f32 %v3066_v26, %v3056_v17  ;;  %v3067_v12 = vmul.f32 %v7945_v16, %v3063_v61 }
0x1462   : > { %v3295_v19 = vpack.c.bf16 %v3068_v58, %v3068_v58  ;;  %v3069_v27 = vadd.f32 %v3067_v12, %v3057_v10 }
0x1464   : > { %v3342_v36 = vpack.c.bf16 %v3069_v27, %v3069_v27  ;;  %3297 = vrot.lane.b32.xlu0 %v3295_v19, %s8113_s16 }
0x1466   : > { %3344 = vrot.lane.b32.xlu1 %v3342_v36, %s8113_s16 }
0x14af   : > { %v3112_v43 = vpop.permute.xlu0 %3111 }
0x14b0   : > { %v3119_v15 = vmul.f32 %v8882_v23, %v3112_v43  ;;  %v6667_v23 = vld [vmem:[%s9712_s2 + $0x18] sm:$0xff] }
0x14b1   : > { %v8936_v48 = vpack.c.bf16 %v6667_v23, %v6667_v23 }
0x14b2   : > { %v3121_v20 = vpack.c.bf16 %v3119_v15, %v3119_v15 }
0x14b4   : > { %v3126_v9 = vsel %vm460_vm1, %v3121_v20, 0 }
0x14b5   : > { %7356 = vmatpush3.bf16.msra.mxu0 %v3126_v9 }
0x14b6   : > { %v3117_v57 = vpop.permute.xlu1 %3116  ;;  %7367 = vmatprep.subr.bf16.mxu0 %v8106_v18 }
0x14b7   : > { %v3120_v45 = vmul.f32 %v8889_v47, %v3117_v57 }
0x14b8   : > { %7358 = vmatmul.mubr.msk.bf16.vlgmr.msra.gmra.mrb[92].mxu0 %vm456_vm2, %v3075_v40 }
0x14b9   : > { %v3168_v41 = vpack.c.bf16 %v3120_v45, %v3120_v45  ;;  %7368 = vmatpush3.bf16.msra.mxu0 %v3126_v9  ;;  %7369 = vmatprep.mubr.msk.bf16.mxu0 %vm8107_vm0, %v8106_v18 }
0x14ba   : > { %7379 = vmatprep.subr.bf16.mxu0 %v8106_v18 }
0x14bb   : > { %v3170_v8 = vsel %vm460_vm1, %v3168_v41, 0 }
0x14bc   : > { %7362 = vmatpush3.bf16.msra.mxu1 %v3170_v8 }
0x14bd   : > { %7373 = vmatprep.subr.bf16.mxu1 %v8106_v18 }
0x14bf   : > { %7364 = vmatmul.mubr.msk.bf16.vlgmr.msra.gmra.mrb[88].mxu1 %vm456_vm2, %v3075_v40 }
0x14c0   : > { %7374 = vmatpush3.bf16.msra.mxu1 %v3170_v8  ;;  %7375 = vmatprep.mubr.msk.bf16.mxu1 %vm8107_vm0, %v8106_v18 }
0x14c1   : > { %7370 = vmatmul.mubr.msk.bf16.vlgmr.msra.gmra.mrb[96].mxu0 %vm456_vm2, %v8936_v48  ;;  %7385 = vmatprep.subr.bf16.mxu1 %v8106_v18 }
0x14c2   : > { %7381 = vmatprep.mubr.msk.bf16.mxu0 %vm8107_vm0, %v8106_v18 }
0x14c7   : > { %7376 = vmatmul.mubr.msk.bf16.vlgmr.msra.gmra.mrb[92].mxu1 %vm456_vm2, %v8936_v48 }
0x14c8   : > { %7387 = vmatprep.mubr.msk.bf16.mxu1 %vm8107_vm0, %v8106_v18 }
0x14d6   : > { %v3298_v47 = vpop.permute.xlu0 %3297 }
0x14d7   : > { %v3300_v14 = vsel %vm460_vm1, %v3298_v47, 0 }
0x14d8   : > { %7380 = vmatpush3.bf16.msra.mxu0 %v3300_v14  ;;  %v3345_v0 = vpop.permute.xlu1 %3344 }
0x14d9   : > { %v3347_v42 = vsel %vm460_vm1, %v3345_v0, 0  ;;  %7391 = vmatprep.subr.bf16.mxu0 %v8106_v18 }
0x14da   : > { %7386 = vmatpush3.bf16.msra.mxu1 %v3347_v42 }
0x14db   : > { %7382 = vmatmul.mubr.msk.bf16.vlgmr.msra.gmra.mrb[100].mxu0 %vm456_vm2, %v3075_v40  ;;  %7399 = vmatprep.subr.bf16.mxu1 %v8106_v18 }
0x14dc   : > { %7392 = vmatpush3.bf16.msra.mxu0 %v8747_v35  ;;  %7395 = vmatprep.mubr.msk.bf16.mxu0 %vm8107_vm0, %v8106_v18 }
0x14dd   : > { %7388 = vmatmul.mubr.msk.bf16.vlgmr.msra.gmra.mrb[96].mxu1 %vm456_vm2, %v3075_v40  ;;  %7393 = vmatprep.subr.bf16.mxu0 %v8106_v18 }
0x14de   : > { %7400 = vmatpush3.bf16.msra.mxu1 %v3300_v14  ;;  %7401 = vmatprep.mubr.msk.bf16.mxu1 %vm8107_vm0, %v8106_v18 }
0x14df   : > { %7411 = vmatprep.subr.bf16.mxu1 %v8106_v18 }
0x14e0   : > { %7394 = vmatpush3.bf16.msra.mxu0 %v8760_v49 }
0x14e1   : > { %7405 = vmatprep.subr.bf16.mxu0 %v8106_v18 }
0x14e5   : > { %7402 = vmatmul.mubr.msk.bf16.vlgmr.msra.gmra.mrb[100].mxu1 %vm456_vm2, %v8936_v48 }
0x14e6   : > { %7412 = vmatpush3.bf16.msra.mxu1 %v8769_v50  ;;  %7415 = vmatprep.mubr.msk.bf16.mxu1 %vm8107_vm0, %v8106_v18 }
0x14e7   : > { %7413 = vmatprep.subr.bf16.mxu1 %v8106_v18 }
0x14ea   : > { %7414 = vmatpush3.bf16.msra.mxu1 %v8778_v31 }
0x14eb   : > { %7427 = vmatprep.subr.bf16.mxu1 %v8106_v18 }
0x158b   : > { %v8973_v35 = vpop.f32.mrb[92].mxu0 }
0x158c   : > { %v7359_v51 = vpop.f32.mrb[93].mxu0 }
0x158d   : > { %v3165_v49 = vpop.f32.mrb[94].mxu0 }
0x158e   : > { %v7360_v33 = vpop.f32.mrb[95].mxu0 }
0x1592   : > { %v8975_v32 = vpop.f32.mrb[88].mxu1 }
0x1593   : > { %v3655_v55 = vpack.c.bf16 %v8975_v32, %v8973_v35  ;;  %v7365_v50 = vpop.f32.mrb[89].mxu1 }
0x1594   : > { %v3209_v63 = vpop.f32.mrb[90].mxu1  ;;  %v8979_v6 = vpop.f32.mrb[96].mxu0 }
0x1595   : > { %v7366_v13 = vpop.f32.mrb[91].mxu1  ;;  %v7371_v11 = vpop.f32.mrb[97].mxu0 }
0x1596   : > { %v3252_v5 = vpop.f32.mrb[98].mxu0 }
0x1597   : > { %v7372_v31 = vpop.f32.mrb[99].mxu0 }
0x159a   : > { %v8981_v60 = vpop.f32.mrb[92].mxu1 }
0x159b   : > { %v3656_v1 = vpack.c.bf16 %v8981_v60, %v8979_v6  ;;  %v7377_v16 = vpop.f32.mrb[93].mxu1 }
0x159c   : > { %v3292_v21 = vpop.f32.mrb[94].mxu1 }
0x159d   : > { %v7378_v59 = vpop.f32.mrb[95].mxu1 }
0x15ae   : > { %v3336_v62 = vpop.f32.mrb[100].mxu0 }
0x15af   : > { %v7383_v17 = vpop.f32.mrb[101].mxu0 }
0x15b0   : > { %v3339_v4 = vpop.f32.mrb[102].mxu0  ;;  %v3383_v26 = vpop.f32.mrb[96].mxu1 }
0x15b1   : > { %v3389_v61 = vpack.c.bf16 %v3383_v26, %v3336_v62  ;;  %v7384_v10 = vpop.f32.mrb[103].mxu0  ;;  %v7389_v58 = vpop.f32.mrb[97].mxu1 }
0x15b2   : > { %v3386_v12 = vpop.f32.mrb[98].mxu1 }
0x15b3   : > { %v7390_v19 = vpop.f32.mrb[99].mxu1  ;;  %7396 = vmatmul.mubr.msk.bf16.vlgmr.msra.gmra.mrb[104].mxu0 %vm921_vm6, %v3389_v61  ;;  %v9043_v12 = vld [vmem:[%s8230_s21 + $0x40] sm:$0xff] }
0x15b4   : > { %7406 = vmatpush3.bf16.msra.mxu0 %v3347_v42  ;;  %7407 = vmatprep.mubr.msk.bf16.mxu0 %vm8107_vm0, %v8106_v18 }
0x15b5   : > { %7419 = vmatprep.subr.bf16.mxu0 %v8106_v18 }
0x15b8   : > { %v3470_v27 = vpop.f32.mrb[100].mxu1 }
0x15b9   : > { %v7403_v36 = vpop.f32.mrb[101].mxu1 }
0x15ba   : > { %v3473_v43 = vpop.f32.mrb[102].mxu1 }
0x15bb   : > { %7408 = vmatmul.mubr.msk.bf16.vlgmr.msra.gmra.mrb[108].mxu0 %vm456_vm2, %v8936_v48  ;;  %v7404_v15 = vpop.f32.mrb[103].mxu1  ;;  %v9050_v43 = vld [vmem:[%s8230_s21 + $0x48] sm:$0xff] }
0x15bc   : > { %7420 = vmatpush3.bf16.msra.mxu0 %v8803_v22  ;;  %7423 = vmatprep.mubr.msk.bf16.mxu0 %vm8107_vm0, %v8106_v18  ;;  %v3879_v15 = vmul.f32 %v9043_v12, %v8273_v34 }
0x15bd   : > { %7421 = vmatprep.subr.bf16.mxu0 %v8106_v18 }
0x15c0   : > { %7422 = vmatpush3.bf16.msra.mxu0 %v8812_v24 }
0x15c1   : > { %7435 = vmatprep.subr.bf16.mxu0 %v8106_v18 }
0x1686   : > { %v3427_v38 = vpop.f32.mrb[104].mxu0 }
0x1687   : > { %v3428_v20 = vadd.f32 %v3427_v38, %v8392_v3  ;;  %v7397_v9 = vpop.f32.mrb[105].mxu0  ;;  %v3880_v38 = vmul.f32 %v9050_v43, %v8273_v34 }
0x1688   : > { %v3430_v40 = vpop.f32.mrb[106].mxu0 }
0x1689   : > { %v3431_v22 = vadd.f32 %v3430_v40, %v8392_v3  ;;  %v7398_v57 = vpop.f32.mrb[107].mxu0  ;;  %v3434_v45 = vmax.f32 %v3428_v20, 0.0 }
0x168b   : > { %v3435_v41 = vmax.f32 %v3431_v22, 0.0 }
0x168d   : > { %v3563_v23 = vpack.c.bf16 %v3435_v41, %v3434_v45 }
0x168e   : > { %v3510_v8 = vpop.f32.mrb[108].mxu0 }
0x168f   : > { %v3516_v48 = vpack.c.bf16 %v3510_v8, %v3470_v27  ;;  %v7409_v24 = vpop.f32.mrb[109].mxu0 }
0x1690   : > { %v3513_v47 = vpop.f32.mrb[110].mxu0 }
0x1691   : > { %v7410_v14 = vpop.f32.mrb[111].mxu0  ;;  %7416 = vmatmul.mubr.msk.bf16.vlgmr.msra.gmra.mrb[104].mxu1 %vm921_vm6, %v3516_v48 }
0x1692   : > { %7428 = vmatpush3.bf16.msra.mxu1 %v8822_v56  ;;  %7431 = vmatprep.mubr.msk.bf16.mxu1 %vm8107_vm0, %v8106_v18 }
0x1693   : > { %7429 = vmatprep.subr.bf16.mxu1 %v8106_v18 }
0x1696   : > { %7430 = vmatpush3.bf16.msra.mxu1 %v8831_v29 }
0x1697   : > { %7447 = vmatprep.subr.bf16.mxu1 %v8106_v18 }
0x1699   : > { %7432 = vmatmul.mubr.msk.bf16.vlgmr.msra.gmra.mrb[108].mxu1 %vm921_vm6, %v3563_v23 }
0x169a   : > { %7448 = vmatpush3.bf16.msra.mxu1 %v8839_v30  ;;  %7451 = vmatprep.mubr.msk.bf16.mxu1 %vm8107_vm0, %v8106_v18 }
0x169b   : > { %7449 = vmatprep.subr.bf16.mxu1 %v8106_v18 }
0x169e   : > { %7450 = vmatpush3.bf16.msra.mxu1 %v8848_v44 }
0x169f   : > { %7455 = vmatprep.subr.bf16.mxu1 %v8106_v18 }
0x1764   : > { %v3554_v56 = vpop.f32.mrb[104].mxu1 }
0x1765   : > { %v3555_v0 = vadd.f32 %v3554_v56, %v8433_v25  ;;  %v7417_v42 = vpop.f32.mrb[105].mxu1 }
0x1766   : > { %v3557_v29 = vpop.f32.mrb[106].mxu1 }
0x1767   : > { %v3558_v51 = vadd.f32 %v3557_v29, %v8433_v25  ;;  %v7418_v49 = vpop.f32.mrb[107].mxu1  ;;  %v3561_v33 = vmax.f32 %v3555_v0, 0.0 }
0x1769   : > { %v3562_v50 = vmax.f32 %v3558_v51, 0.0 }
0x176b   : > { %v3564_v30 = vpack.c.bf16 %v3562_v50, %v3561_v33 }
0x176c   : > { %v3646_v63 = vpop.f32.mrb[108].mxu1 }
0x176d   : > { %7424 = vmatmul.mubr.msk.bf16.vlgmr.msra.gmra.mrb[112].mxu0 %vm921_vm6, %v3564_v30  ;;  %v7433_v13 = vpop.f32.mrb[109].mxu1 }
0x176e   : > { %v3649_v11 = vpop.f32.mrb[110].mxu1  ;;  %7436 = vmatpush3.bf16.msra.mxu0 %v8440_v46  ;;  %7437 = vmatprep.mubr.msk.bf16.mxu0 %vm8107_vm0, %v8106_v18 }
0x176f   : > { %v7434_v44 = vpop.f32.mrb[111].mxu1  ;;  %7441 = vmatprep.subr.bf16.mxu0 %v8106_v18 }
0x1775   : > { %7438 = vmatmul.mubr.msk.bf16.vlgmr.msra.gmra.mrb[116].mxu0 %vm1225_vm8, %v3656_v1 }
0x1776   : > { %7442 = vmatpush3.bf16.msra.mxu0 %v8450_v53  ;;  %7443 = vmatprep.mubr.msk.bf16.mxu0 %vm8107_vm0, %v8106_v18 }
0x1777   : > { %7461 = vmatprep.subr.bf16.mxu0 %v8106_v18 }
0x1781   : > { %7444 = vmatmul.mubr.msk.bf16.vlgmr.msra.gmra.mrb[116].mxu0 %vm1225_vm8, %v3655_v55 }
0x1782   : > { %7463 = vmatprep.mubr.msk.bf16.mxu0 %vm8107_vm0, %v8106_v18 }
0x1840   : > { %v3602_v5 = vpop.f32.mrb[112].mxu0 }
0x1841   : > { %v3647_v31 = vadd.f32 %v3646_v63, %v3602_v5  ;;  %v7425_v6 = vpop.f32.mrb[113].mxu0 }
0x1842   : > { %v3605_v60 = vpop.f32.mrb[114].mxu0 }
0x1843   : > { %v3650_v1 = vadd.f32 %v3649_v11, %v3605_v60  ;;  %v7426_v16 = vpop.f32.mrb[115].mxu0  ;;  %v3653_v21 = vadd.f32 %v3647_v31, %v8485_v54 }
0x1845   : > { %v3654_v59 = vadd.f32 %v3650_v1, %v8485_v54 }
0x1847   : > { %v3745_v62 = vpack.c.bf16 %v3654_v59, %v3653_v21 }
0x1849   : > { %7452 = vmatmul.mubr.msk.bf16.vlgmr.msra.gmra.mrb[112].mxu1 %vm921_vm6, %v3745_v62 }
0x184a   : > { %7457 = vmatprep.mubr.msk.bf16.mxu1 %vm8107_vm0, %v8106_v18 }
0x1854   : > { %v3738_v35 = vpop.f32.mrb[116].mxu0 }
0x1855   : > { %v7445_v32 = vpop.f32.mrb[117].mxu0  ;;  %v3820_v49 = vadd.f32 %v3738_v35, %v8536_v2 }
0x1856   : > { %v3741_v55 = vpop.f32.mrb[118].mxu0 }
0x1857   : > { %v7446_v17 = vpop.f32.mrb[119].mxu0  ;;  %v3821_v50 = vadd.f32 %v3741_v55, %v8536_v2 }
0x191c   : > { %v3783_v4 = vpop.f32.mrb[112].mxu1 }
0x191d   : > { %v9039_v26 = vadd.f32 %v3783_v4, %v3738_v35  ;;  %v3822_v61 = vadd.f32 %v3783_v4, %v8495_v7  ;;  %v7453_v10 = vpop.f32.mrb[113].mxu1 }
0x191e   : > { %v3786_v58 = vpop.f32.mrb[114].mxu1 }
0x191f   : > { %v9045_v19 = vadd.f32 %v3786_v58, %v3741_v55  ;;  %v3823_v27 = vadd.f32 %v3786_v58, %v8495_v7  ;;  %3826 = vrot.lane.b32.xlu0 %v3822_v61, %s8111_s14  ;;  %v7454_v36 = vpop.f32.mrb[115].mxu1  ;;  %v3792_v20 = vadd.f32 %v9039_v26, %v8522_v37 }
0x1921   : > { %3828 = vrot.lane.b32.xlu1 %v3823_v27, %s8111_s14  ;;  %v3793_v9 = vadd.f32 %v9045_v19, %v8522_v37  ;;  %v6685_v40 = vmul.f32 -1.442695, %v3792_v20  ;;  %v3807_v4 = vadd.f32 %v9045_v19, %v8546_v39 }
0x1923   : > { %3883 = vrot.lane.b32.xlu0 %v3879_v15, %s8109_s11  ;;  %v6686_v22 = vmul.f32 -1.442695, %v3793_v9  ;;  %7946 = vpow2.f32 %v6685_v40  ;;  %v6688_v10 = vmul.f32 -1.442695, %v3807_v4 }
0x1925   : > { %3885 = vrot.lane.b32.xlu1 %v3880_v38, %s8109_s11  ;;  %7948 = vpow2.f32 %v6686_v22 }
0x192d   : > { %v7947_v57 = vpop.eup %7946 }
0x192e   : > { %v3800_v41 = vadd.f32 1.0, %v7947_v57 }
0x192f   : > { %v7949_v45 = vpop.eup %7948 }
0x1930   : > { %v3801_v23 = vadd.f32 1.0, %v7949_v45  ;;  %7950 = vrcp.f32 %v3800_v41 }
0x1932   : > { %7952 = vrcp.f32 %v3801_v23 }
0x193a   : > { %v7951_v8 = vpop.eup %7950 }
0x193c   : > { %v7953_v47 = vpop.eup %7952 }
0x1991   : > { %v3827_v48 = vpop.permute.xlu0 %3826 }
0x1992   : > { %v3832_v24 = vmul.f32 %v7951_v8, %v3827_v48 }
0x1993   : > { %v3829_v14 = vpop.permute.xlu1 %3828 }
0x1994   : > { %v3833_v56 = vmul.f32 %v7953_v47, %v3829_v14  ;;  %3836 = vrot.lane.b32.xlu0 %v3832_v24, %s8111_s14 }
0x1995   : > { %v3884_v0 = vpop.permute.xlu0 %3883 }
0x1996   : > { %3838 = vrot.lane.b32.xlu1 %v3833_v56, %s8111_s14  ;;  %v3889_v42 = vsel %vm616_vm5, %v3884_v0, 0.0 }
0x1997   : > { %v3886_v29 = vpop.permute.xlu1 %3885 }
0x1998   : > { %v3892_v51 = vsel %vm616_vm5, %v3886_v29, 0.0 }
0x19b3   : > { %3890 = vadd.xlane.f32.xlu0 %v3889_v42  ;;  %v6691_v42 = vld [vmem:[%s9711_s1 + $0x20] sm:$0xff] }
0x19ba   : > { %3893 = vadd.xlane.f32.xlu1 %v3892_v51 }
0x1a06   : > { %v3837_v33 = vpop.permute.xlu0 %3836 }
0x1a07   : > { %v3842_v30 = vadd.f32 %v3837_v33, %v3820_v49  ;;  %v3875_v49 = vpack.c.bf16 %v6691_v42, %v6691_v42 }
0x1a08   : > { %v3839_v63 = vpop.permute.xlu1 %3838 }
0x1a09   : > { %7954 = vtanh.f32 %v3842_v30  ;;  %v3843_v13 = vadd.f32 %v3839_v63, %v3821_v50 }
0x1a0b   : > { %7956 = vtanh.f32 %v3843_v13 }
0x1a13   : > { %v7955_v11 = vpop.eup %7954 }
0x1a14   : > { %3850 = vrot.lane.b32.xlu0 %v7955_v11, %s8113_s16 }
0x1a15   : > { %v7957_v44 = vpop.eup %7956 }
0x1a16   : > { %3852 = vrot.lane.b32.xlu1 %v7957_v44, %s8113_s16 }
0x1a18   : > { %3860 = vrot.lane.b32.xlu0 %v3653_v21, %s8112_s15 }
0x1a1a   : > { %3862 = vrot.lane.b32.xlu1 %v3654_v59, %s8112_s15  ;;  %v3806_v59 = vadd.f32 %v9039_v26, %v8546_v39 }
0x1a1c   : > { %v6687_v61 = vmul.f32 -1.442695, %v3806_v59 }
0x1a40   : > { %v3891_v5 = vpop.xlane.xlu0 %3890 }
0x1a41   : > { %v3895_v31 = vadd.f32 %v3891_v5, %v8289_v52 }
0x1a43   : > { %v6693_v6 = vmul.f32 -1.442695, %v3895_v31  ;;  %v9119_v31 = vld [vmem:[%s9713_s3 + $0x8] sm:$0xff]  }
0x1a45   : > { %7958 = vpow2.f32 %v6693_v6  ;;  %v9132_v6 = vld [vmem:[%s9713_s3 + $0x10] sm:$0xff]  }
0x1a47   : > { %v3894_v60 = vpop.xlane.xlu1 %3893 }
0x1a48   : > { %v3896_v1 = vadd.f32 %v3894_v60, %v8289_v52  ;;  %v9141_v60 = vld [vmem:[%s9713_s3 + $0x18] sm:$0xff]  }
0x1a4a   : > { %v6694_v16 = vmul.f32 -1.442695, %v3896_v1  ;;  %v9150_v1 = vld [vmem:[%s9713_s3 + $0x20] sm:$0xff]  }
0x1a4c   : > { %7960 = vpow2.f32 %v6694_v16 }
0x1a4f   : > { %v7959_v62 = vpop.eup %7958 }
0x1a50   : > { %v3903_v35 = vadd.f32 1.0, %v7959_v62 }
0x1a52   : > { %7962 = vrcp.f32 %v3903_v35 }
0x1a56   : > { %v7961_v32 = vpop.eup %7960 }
0x1a57   : > { %v3904_v55 = vadd.f32 1.0, %v7961_v32 }
0x1a59   : > { %7964 = vrcp.f32 %v3904_v55 }
0x1a5a   : > { %7966 = vpow2.f32 %v6687_v61 }
0x1a5b   : > { %7968 = vpow2.f32 %v6688_v10 }
0x1a5c   : > { %v7963_v17 = vpop.eup %7962 }
0x1a5d   : > { %3911 = vperm.xlu0 %7840, %v7963_v17  }
0x1a63   : > { %v7965_v21 = vpop.eup %7964 }
0x1a64   : > { %3916 = vperm.xlu1 %7841, %v7965_v21   ;;  %v7967_v58 = vpop.eup %7966 }
0x1a65   : > { %v7969_v27 = vpop.eup %7968  ;;  %v3814_v36 = vadd.f32 1.0, %v7967_v58 }
0x1a66   : > { %v3815_v15 = vadd.f32 1.0, %v7969_v27 }
0x1a67   : > { %7970 = vrcp.f32 %v3814_v36 }
0x1a68   : > { %7972 = vrcp.f32 %v3815_v15 }
0x1a71   : > { %v7971_v38 = vpop.eup %7970 }
0x1a72   : > { %v7973_v9 = vpop.eup %7972  ;;  %v3846_v22 = vsub.f32 1.0, %v7971_v38 }
0x1a73   : > { %v3847_v45 = vsub.f32 1.0, %v7973_v9 }
0x1a86   : > { %v3851_v20 = vpop.permute.xlu0 %3850 }
0x1a87   : > { %v3856_v57 = vmul.f32 %v3851_v20, %v3846_v22 }
0x1a88   : > { %v3853_v40 = vpop.permute.xlu1 %3852 }
0x1a89   : > { %v3857_v23 = vmul.f32 %v3853_v40, %v3847_v45 }
0x1a8a   : > { %v3861_v26 = vpop.permute.xlu0 %3860 }
0x1a8b   : > { %v3866_v41 = vmul.f32 %v7971_v38, %v3861_v26 }
0x1a8c   : > { %v3863_v19 = vpop.permute.xlu1 %3862 }
0x1a8d   : > { %v3868_v8 = vadd.f32 %v3866_v41, %v3856_v57  ;;  %v3867_v48 = vmul.f32 %v7973_v9, %v3863_v19 }
0x1a8f   : > { %v4095_v24 = vpack.c.bf16 %v3868_v8, %v3868_v8  ;;  %v3869_v47 = vadd.f32 %v3867_v48, %v3857_v23  ;;  %v9175_v48 = vld [vmem:[%s9713_s3 + $0x38] sm:$0xff]  }
0x1a91   : > { %v4142_v14 = vpack.c.bf16 %v3869_v47, %v3869_v47  ;;  %4097 = vrot.lane.b32.xlu0 %v4095_v24, %s8113_s16  ;;  %v9184_v24 = vld [vmem:[%s9713_s3 + $0x40] sm:$0xff]  }
0x1a93   : > { %4144 = vrot.lane.b32.xlu1 %v4142_v14, %s8113_s16 }
0x1adc   : > { %v3912_v56 = vpop.permute.xlu0 %3911 }
0x1add   : > { %v3919_v0 = vmul.f32 %v9043_v12, %v3912_v56  ;;  %v6692_v12 = vld [vmem:[%s9712_s2 + $0x20] sm:$0xff] }
0x1ade   : > { %v9097_v13 = vpack.c.bf16 %v6692_v12, %v6692_v12 }
0x1adf   : > { %v3921_v29 = vpack.c.bf16 %v3919_v0, %v3919_v0 }
0x1ae1   : > { %v3926_v51 = vsel %vm460_vm1, %v3921_v29, 0 }
0x1ae2   : > { %7456 = vmatpush3.bf16.msra.mxu1 %v3926_v51 }
0x1ae3   : > { %v3917_v33 = vpop.permute.xlu1 %3916  ;;  %7467 = vmatprep.subr.bf16.mxu1 %v8106_v18 }
0x1ae4   : > { %v3920_v50 = vmul.f32 %v9050_v43, %v3917_v33 }
0x1ae5   : > { %7458 = vmatmul.mubr.msk.bf16.vlgmr.msra.gmra.mrb[116].mxu1 %vm456_vm2, %v3875_v49 }
0x1ae6   : > { %v3968_v30 = vpack.c.bf16 %v3920_v50, %v3920_v50  ;;  %7468 = vmatpush3.bf16.msra.mxu1 %v3926_v51  ;;  %7469 = vmatprep.mubr.msk.bf16.mxu1 %vm8107_vm0, %v8106_v18 }
0x1ae7   : > { %7479 = vmatprep.subr.bf16.mxu1 %v8106_v18 }
0x1ae8   : > { %v3970_v63 = vsel %vm460_vm1, %v3968_v30, 0 }
0x1ae9   : > { %7462 = vmatpush3.bf16.msra.mxu0 %v3970_v63 }
0x1aea   : > { %7473 = vmatprep.subr.bf16.mxu0 %v8106_v18 }
0x1aec   : > { %7464 = vmatmul.mubr.msk.bf16.vlgmr.msra.gmra.mrb[120].mxu0 %vm456_vm2, %v3875_v49 }
0x1aed   : > { %7474 = vmatpush3.bf16.msra.mxu0 %v3970_v63  ;;  %7475 = vmatprep.mubr.msk.bf16.mxu0 %vm8107_vm0, %v8106_v18 }
0x1aee   : > { %7470 = vmatmul.mubr.msk.bf16.vlgmr.msra.gmra.mrb[120].mxu1 %vm456_vm2, %v9097_v13  ;;  %7485 = vmatprep.subr.bf16.mxu0 %v8106_v18 }
0x1aef   : > { %7481 = vmatprep.mubr.msk.bf16.mxu1 %vm8107_vm0, %v8106_v18 }
0x1af4   : > { %7476 = vmatmul.mubr.msk.bf16.vlgmr.msra.gmra.mrb[124].mxu0 %vm456_vm2, %v9097_v13 }
0x1af5   : > { %7487 = vmatprep.mubr.msk.bf16.mxu0 %vm8107_vm0, %v8106_v18 }
0x1b03   : > { %v4098_v43 = vpop.permute.xlu0 %4097 }
0x1b04   : > { %v4100_v11 = vsel %vm460_vm1, %v4098_v43, 0 }
0x1b05   : > { %7480 = vmatpush3.bf16.msra.mxu1 %v4100_v11  ;;  %v4145_v44 = vpop.permute.xlu1 %4144 }
0x1b06   : > { %v4147_v5 = vsel %vm460_vm1, %v4145_v44, 0  ;;  %7491 = vmatprep.subr.bf16.mxu1 %v8106_v18 }
0x1b07   : > { %7486 = vmatpush3.bf16.msra.mxu0 %v4147_v5 }
0x1b08   : > { %7482 = vmatmul.mubr.msk.bf16.vlgmr.msra.gmra.mrb[124].mxu1 %vm456_vm2, %v3875_v49  ;;  %7499 = vmatprep.subr.bf16.mxu0 %v8106_v18 }
0x1b09   : > { %7492 = vmatpush3.bf16.msra.mxu1 %v9119_v31  ;;  %7495 = vmatprep.mubr.msk.bf16.mxu1 %vm8107_vm0, %v8106_v18 }
0x1b0a   : > { %7488 = vmatmul.mubr.msk.bf16.vlgmr.msra.gmra.mrb[128].mxu0 %vm456_vm2, %v3875_v49  ;;  %7493 = vmatprep.subr.bf16.mxu1 %v8106_v18 }
0x1b0b   : > { %7500 = vmatpush3.bf16.msra.mxu0 %v4100_v11  ;;  %7501 = vmatprep.mubr.msk.bf16.mxu0 %vm8107_vm0, %v8106_v18 }
0x1b0c   : > { %7511 = vmatprep.subr.bf16.mxu0 %v8106_v18 }
0x1b0d   : > { %7494 = vmatpush3.bf16.msra.mxu1 %v9132_v6 }
0x1b0e   : > { %7505 = vmatprep.subr.bf16.mxu1 %v8106_v18 }
0x1b12   : > { %7502 = vmatmul.mubr.msk.bf16.vlgmr.msra.gmra.mrb[132].mxu0 %vm456_vm2, %v9097_v13 }
0x1b13   : > { %7512 = vmatpush3.bf16.msra.mxu0 %v9141_v60  ;;  %7515 = vmatprep.mubr.msk.bf16.mxu0 %vm8107_vm0, %v8106_v18 }
0x1b14   : > { %7513 = vmatprep.subr.bf16.mxu0 %v8106_v18 }
0x1b17   : > { %7514 = vmatpush3.bf16.msra.mxu0 %v9150_v1 }
0x1b18   : > { %7527 = vmatprep.subr.bf16.mxu0 %v8106_v18 }
0x1bb8   : > { %v9154_v16 = vpop.f32.mrb[116].mxu1 }
0x1bb9   : > { %v7459_v62 = vpop.f32.mrb[117].mxu1 }
0x1bba   : > { %v3965_v35 = vpop.f32.mrb[118].mxu1  ;;  %v9194_v62 = vld [vmem:[%s9713_s3 + $0x28] sm:$0xff]  }
0x1bbb   : > { %v7460_v32 = vpop.f32.mrb[119].mxu1  ;;  %v9203_v35 = vld [vmem:[%s9713_s3 + $0x30] sm:$0xff]  }
0x1bbc   : > { %v9211_v32 = vld [vmem:[%s9714_s4 + $0x10] sm:$0xff]  }
0x1bbf   : > { %v9156_v55 = vpop.f32.mrb[120].mxu0 }
0x1bc0   : > { %v4455_v17 = vpack.c.bf16 %v9156_v55, %v9154_v16  ;;  %v7465_v21 = vpop.f32.mrb[121].mxu0 }
0x1bc1   : > { %v4009_v59 = vpop.f32.mrb[122].mxu0  ;;  %v9160_v4 = vpop.f32.mrb[120].mxu1  ;;  %v9220_v21 = vld [vmem:[%s9714_s4 + $0x18] sm:$0xff]  }
0x1bc2   : > { %v7466_v61 = vpop.f32.mrb[123].mxu0  ;;  %v7471_v10 = vpop.f32.mrb[121].mxu1 }
0x1bc3   : > { %v4052_v58 = vpop.f32.mrb[122].mxu1 }
0x1bc4   : > { %v7472_v27 = vpop.f32.mrb[123].mxu1 }
0x1bc7   : > { %v9162_v36 = vpop.f32.mrb[124].mxu0 }
0x1bc8   : > { %v4456_v15 = vpack.c.bf16 %v9162_v36, %v9160_v4  ;;  %v7477_v38 = vpop.f32.mrb[125].mxu0 }
0x1bc9   : > { %v4092_v20 = vpop.f32.mrb[126].mxu0 }
0x1bca   : > { %v7478_v9 = vpop.f32.mrb[127].mxu0 }
0x1bdb   : > { %v4136_v40 = vpop.f32.mrb[124].mxu1 }
0x1bdc   : > { %v7483_v22 = vpop.f32.mrb[125].mxu1 }
0x1bdd   : > { %v4183_v26 = vpop.f32.mrb[128].mxu0  ;;  %v4139_v57 = vpop.f32.mrb[126].mxu1 }
0x1bde   : > { %v4189_v45 = vpack.c.bf16 %v4183_v26, %v4136_v40  ;;  %v7489_v41 = vpop.f32.mrb[129].mxu0  ;;  %v7484_v19 = vpop.f32.mrb[127].mxu1 }
0x1bdf   : > { %v4186_v23 = vpop.f32.mrb[130].mxu0 }
0x1be0   : > { %7496 = vmatmul.mubr.msk.bf16.vlgmr.msra.gmra.mrb[128].mxu1 %vm921_vm6, %v4189_v45  ;;  %v7490_v8 = vpop.f32.mrb[131].mxu0 }
0x1be1   : > { %7506 = vmatpush3.bf16.msra.mxu1 %v4147_v5  ;;  %7507 = vmatprep.mubr.msk.bf16.mxu1 %vm8107_vm0, %v8106_v18 }
0x1be2   : > { %7519 = vmatprep.subr.bf16.mxu1 %v8106_v18 }
0x1be5   : > { %v4270_v47 = vpop.f32.mrb[132].mxu0 }
0x1be6   : > { %v7503_v14 = vpop.f32.mrb[133].mxu0 }
0x1be7   : > { %v4273_v56 = vpop.f32.mrb[134].mxu0 }
0x1be8   : > { %7508 = vmatmul.mubr.msk.bf16.vlgmr.msra.gmra.mrb[132].mxu1 %vm456_vm2, %v9097_v13  ;;  %v7504_v0 = vpop.f32.mrb[135].mxu0 }
0x1be9   : > { %7520 = vmatpush3.bf16.msra.mxu1 %v9175_v48  ;;  %7523 = vmatprep.mubr.msk.bf16.mxu1 %vm8107_vm0, %v8106_v18 }
0x1bea   : > { %7521 = vmatprep.subr.bf16.mxu1 %v8106_v18 }
0x1bed   : > { %7522 = vmatpush3.bf16.msra.mxu1 %v9184_v24 }
0x1bee   : > { %7535 = vmatprep.subr.bf16.mxu1 %v8106_v18 }
0x1cb3   : > { %v4227_v42 = vpop.f32.mrb[128].mxu1 }
0x1cb4   : > { %v4228_v29 = vadd.f32 %v4227_v42, %v8392_v3  ;;  %v7497_v51 = vpop.f32.mrb[129].mxu1 }
0x1cb5   : > { %v4230_v49 = vpop.f32.mrb[130].mxu1 }
0x1cb6   : > { %v4231_v33 = vadd.f32 %v4230_v49, %v8392_v3  ;;  %v7498_v50 = vpop.f32.mrb[131].mxu1  ;;  %v4234_v30 = vmax.f32 %v4228_v29, 0.0 }
0x1cb8   : > { %v4235_v12 = vmax.f32 %v4231_v33, 0.0  ;;  %v9254_v33 = vld [vmem:[%s8230_s21 + $0x50] sm:$0xff] }
0x1cba   : > { %v4363_v63 = vpack.c.bf16 %v4235_v12, %v4234_v30 }
0x1cbb   : > { %v4310_v13 = vpop.f32.mrb[132].mxu1 }
0x1cbc   : > { %v4316_v43 = vpack.c.bf16 %v4310_v13, %v4270_v47  ;;  %v7509_v11 = vpop.f32.mrb[133].mxu1  ;;  %v4745_v13 = vmul.f32 %v9254_v33, %v8273_v34 }
0x1cbd   : > { %v4313_v44 = vpop.f32.mrb[134].mxu1 }
0x1cbe   : > { %7516 = vmatmul.mubr.msk.bf16.vlgmr.msra.gmra.mrb[136].mxu0 %vm921_vm6, %v4316_v43  ;;  %v7510_v5 = vpop.f32.mrb[135].mxu1 }
0x1cbf   : > { %7528 = vmatpush3.bf16.msra.mxu0 %v9194_v62  ;;  %7531 = vmatprep.mubr.msk.bf16.mxu0 %vm8107_vm0, %v8106_v18 }
0x1cc0   : > { %7529 = vmatprep.subr.bf16.mxu0 %v8106_v18 }
0x1cc3   : > { %7530 = vmatpush3.bf16.msra.mxu0 %v9203_v35 }
0x1cc4   : > { %7547 = vmatprep.subr.bf16.mxu0 %v8106_v18 }
0x1cc6   : > { %7532 = vmatmul.mubr.msk.bf16.vlgmr.msra.gmra.mrb[140].mxu0 %vm921_vm6, %v4363_v63  ;;  %v9261_v63 = vld [vmem:[%s8230_s21 + $0x58] sm:$0xff] }
0x1cc7   : > { %7548 = vmatpush3.bf16.msra.mxu0 %v9211_v32  ;;  %7551 = vmatprep.mubr.msk.bf16.mxu0 %vm8107_vm0, %v8106_v18  ;;  %v4746_v43 = vmul.f32 %v9261_v63, %v8273_v34 }
0x1cc8   : > { %7549 = vmatprep.subr.bf16.mxu0 %v8106_v18 }
0x1ccb   : > { %7550 = vmatpush3.bf16.msra.mxu0 %v9220_v21 }
0x1ccc   : > { %7555 = vmatprep.subr.bf16.mxu0 %v8106_v18 }
0x1d91   : > { %v4354_v59 = vpop.f32.mrb[136].mxu0 }
0x1d92   : > { %v4355_v61 = vadd.f32 %v4354_v59, %v8433_v25  ;;  %v7517_v10 = vpop.f32.mrb[137].mxu0 }
0x1d93   : > { %v4357_v58 = vpop.f32.mrb[138].mxu0 }
0x1d94   : > { %v4358_v27 = vadd.f32 %v4357_v58, %v8433_v25  ;;  %v7518_v38 = vpop.f32.mrb[139].mxu0  ;;  %v4361_v20 = vmax.f32 %v4355_v61, 0.0 }
0x1d96   : > { %v4362_v9 = vmax.f32 %v4358_v27, 0.0 }
0x1d98   : > { %v4364_v40 = vpack.c.bf16 %v4362_v9, %v4361_v20 }
0x1d99   : > { %v4446_v22 = vpop.f32.mrb[140].mxu0 }
0x1d9a   : > { %7524 = vmatmul.mubr.msk.bf16.vlgmr.msra.gmra.mrb[136].mxu1 %vm921_vm6, %v4364_v40  ;;  %v7533_v26 = vpop.f32.mrb[141].mxu0 }
0x1d9b   : > { %v4449_v57 = vpop.f32.mrb[142].mxu0  ;;  %7536 = vmatpush3.bf16.msra.mxu1 %v8440_v46  ;;  %7537 = vmatprep.mubr.msk.bf16.mxu1 %vm8107_vm0, %v8106_v18 }
0x1d9c   : > { %v7534_v45 = vpop.f32.mrb[143].mxu0  ;;  %7541 = vmatprep.subr.bf16.mxu1 %v8106_v18 }
0x1da2   : > { %7538 = vmatmul.mubr.msk.bf16.vlgmr.msra.gmra.mrb[140].mxu1 %vm1225_vm8, %v4456_v15 }
0x1da3   : > { %7542 = vmatpush3.bf16.msra.mxu1 %v8450_v53  ;;  %7543 = vmatprep.mubr.msk.bf16.mxu1 %vm8107_vm0, %v8106_v18 }
0x1da4   : > { %7563 = vmatprep.subr.bf16.mxu1 %v8106_v18 }
0x1dae   : > { %7544 = vmatmul.mubr.msk.bf16.vlgmr.msra.gmra.mrb[140].mxu1 %vm1225_vm8, %v4455_v17 }
0x1daf   : > { %7565 = vmatprep.mubr.msk.bf16.mxu1 %vm8107_vm0, %v8106_v18 }
0x1e6d   : > { %v4402_v41 = vpop.f32.mrb[136].mxu1 }
0x1e6e   : > { %v4447_v19 = vadd.f32 %v4446_v22, %v4402_v41  ;;  %v7525_v4 = vpop.f32.mrb[137].mxu1 }
0x1e6f   : > { %v4405_v36 = vpop.f32.mrb[138].mxu1 }
0x1e70   : > { %v4450_v15 = vadd.f32 %v4449_v57, %v4405_v36  ;;  %v7526_v23 = vpop.f32.mrb[139].mxu1  ;;  %v4453_v8 = vadd.f32 %v4447_v19, %v8485_v54 }
0x1e72   : > { %v4454_v47 = vadd.f32 %v4450_v15, %v8485_v54 }
0x1e74   : > { %v4545_v14 = vpack.c.bf16 %v4454_v47, %v4453_v8 }
0x1e76   : > { %7552 = vmatmul.mubr.msk.bf16.vlgmr.msra.gmra.mrb[144].mxu0 %vm921_vm6, %v4545_v14 }
0x1e77   : > { %7559 = vmatprep.mubr.msk.bf16.mxu0 %vm8107_vm0, %v8106_v18 }
0x1e81   : > { %v4538_v16 = vpop.f32.mrb[140].mxu1 }
0x1e82   : > { %v7545_v55 = vpop.f32.mrb[141].mxu1  ;;  %v4620_v4 = vadd.f32 %v4538_v16, %v8536_v2 }
0x1e83   : > { %v4541_v17 = vpop.f32.mrb[142].mxu1 }
0x1e84   : > { %v7546_v56 = vpop.f32.mrb[143].mxu1  ;;  %v4621_v15 = vadd.f32 %v4541_v17, %v8536_v2 }
0x1f49   : > { %v4583_v0 = vpop.f32.mrb[144].mxu0 }
0x1f4a   : > { %v9250_v42 = vadd.f32 %v4583_v0, %v4538_v16  ;;  %v4622_v29 = vadd.f32 %v4583_v0, %v8495_v7  ;;  %v7553_v51 = vpop.f32.mrb[145].mxu0 }
0x1f4b   : > { %v4586_v49 = vpop.f32.mrb[146].mxu0 }
0x1f4c   : > { %v9256_v50 = vadd.f32 %v4586_v49, %v4541_v17  ;;  %v4623_v30 = vadd.f32 %v4586_v49, %v8495_v7  ;;  %4626 = vrot.lane.b32.xlu0 %v4622_v29, %s8111_s14  ;;  %v7554_v12 = vpop.f32.mrb[147].mxu0  ;;  %v4592_v11 = vadd.f32 %v9250_v42, %v8522_v37 }
0x1f4e   : > { %4628 = vrot.lane.b32.xlu1 %v4623_v30, %s8111_s14  ;;  %v4593_v44 = vadd.f32 %v9256_v50, %v8522_v37  ;;  %v6710_v5 = vmul.f32 -1.442695, %v4592_v11 }
0x1f50   : > { %4749 = vrot.lane.b32.xlu0 %v4745_v13, %s8109_s11  ;;  %v6711_v59 = vmul.f32 -1.442695, %v4593_v44  ;;  %7974 = vpow2.f32 %v6710_v5  ;;  %v4607_v5 = vadd.f32 %v9256_v50, %v8546_v39 }
0x1f52   : > { %4751 = vrot.lane.b32.xlu1 %v4746_v43, %s8109_s11  ;;  %7976 = vpow2.f32 %v6711_v59 }
0x1f5a   : > { %v7975_v61 = vpop.eup %7974 }
0x1f5b   : > { %v4600_v58 = vadd.f32 1.0, %v7975_v61  ;;  %v9293_v61 = vld [vmem:[%s9713_s3 + $0x48] sm:$0xff]  }
0x1f5c   : > { %v7977_v10 = vpop.eup %7976  ;;  %7556 = vmatpush3.bf16.msra.mxu0 %v9293_v61 }
0x1f5d   : > { %v4601_v27 = vadd.f32 1.0, %v7977_v10  ;;  %7978 = vrcp.f32 %v4600_v58  ;;  %v6713_v10 = vmul.f32 -1.442695, %v4607_v5  ;;  %v9299_v58 = vld [vmem:[%s9713_s3 + $0x50] sm:$0xff]   ;;  %7557 = vmatprep.subr.bf16.mxu0 %v8106_v18 }
0x1f5f   : > { %7980 = vrcp.f32 %v4601_v27 }
0x1f60   : > { %7558 = vmatpush3.bf16.msra.mxu0 %v9299_v58 }
0x1f61   : > { %7569 = vmatprep.subr.bf16.mxu0 %v8106_v18 }
0x1f67   : > { %v7979_v38 = vpop.eup %7978 }
0x1f69   : > { %v7981_v40 = vpop.eup %7980 }
0x1fbe   : > { %v4627_v20 = vpop.permute.xlu0 %4626 }
0x1fbf   : > { %v4632_v9 = vmul.f32 %v7979_v38, %v4627_v20 }
0x1fc0   : > { %v4629_v22 = vpop.permute.xlu1 %4628 }
0x1fc1   : > { %v4633_v26 = vmul.f32 %v7981_v40, %v4629_v22  ;;  %4636 = vrot.lane.b32.xlu0 %v4632_v9, %s8111_s14 }
0x1fc2   : > { %v4750_v57 = vpop.permute.xlu0 %4749 }
0x1fc3   : > { %4638 = vrot.lane.b32.xlu1 %v4633_v26, %s8111_s14  ;;  %v4755_v45 = vsel %vm616_vm5, %v4750_v57, 0.0 }
0x1fc4   : > { %v4752_v41 = vpop.permute.xlu1 %4751 }
0x1fc5   : > { %v4758_v19 = vsel %vm616_vm5, %v4752_v41, 0.0 }
0x1fe0   : > { %4756 = vadd.xlane.f32.xlu0 %v4755_v45 }
0x1fe7   : > { %4759 = vadd.xlane.f32.xlu1 %v4758_v19 }
0x2033   : > { %v4637_v36 = vpop.permute.xlu0 %4636 }
0x2034   : > { %v4642_v23 = vadd.f32 %v4637_v36, %v4620_v4 }
0x2035   : > { %v4639_v14 = vpop.permute.xlu1 %4638 }
0x2036   : > { %7982 = vtanh.f32 %v4642_v23  ;;  %v4643_v55 = vadd.f32 %v4639_v14, %v4621_v15 }
0x2038   : > { %7984 = vtanh.f32 %v4643_v55 }
0x2040   : > { %v7983_v56 = vpop.eup %7982 }
0x2041   : > { %4650 = vrot.lane.b32.xlu0 %v7983_v56, %s8113_s16 }
0x2042   : > { %v7985_v0 = vpop.eup %7984 }
0x2043   : > { %4652 = vrot.lane.b32.xlu1 %v7985_v0, %s8113_s16 }
0x2045   : > { %4660 = vrot.lane.b32.xlu0 %v4453_v8, %s8112_s15 }
0x2047   : > { %4662 = vrot.lane.b32.xlu1 %v4454_v47, %s8112_s15  ;;  %v4606_v47 = vadd.f32 %v9250_v42, %v8546_v39 }
0x2049   : > { %v6712_v59 = vmul.f32 -1.442695, %v4606_v47 }
0x206d   : > { %v4757_v29 = vpop.xlane.xlu0 %4756 }
0x206e   : > { %v4761_v16 = vadd.f32 %v4757_v29, %v8289_v52 }
0x2070   : > { %v6721_v51 = vmul.f32 -1.442695, %v4761_v16 }
0x2072   : > { %7986 = vpow2.f32 %v6721_v51  ;;  %v6719_v51 = vld [vmem:[%s9711_s1 + $0x28] sm:$0xff] }
0x2074   : > { %v4760_v17 = vpop.xlane.xlu1 %4759 }
0x2075   : > { %v4762_v49 = vadd.f32 %v4760_v17, %v8289_v52 }
0x2077   : > { %v6722_v30 = vmul.f32 -1.442695, %v4762_v49 }
0x2079   : > { %7988 = vpow2.f32 %v6722_v30  ;;  %v4741_v30 = vpack.c.bf16 %v6719_v51, %v6719_v51 }
0x207c   : > { %v7987_v12 = vpop.eup %7986 }
0x207d   : > { %v4769_v13 = vadd.f32 1.0, %v7987_v12 }
0x207f   : > { %7990 = vrcp.f32 %v4769_v13 }
0x2083   : > { %v7989_v43 = vpop.eup %7988 }
0x2084   : > { %v4770_v11 = vadd.f32 1.0, %v7989_v43 }
0x2086   : > { %7992 = vrcp.f32 %v4770_v11 }
0x2087   : > { %7994 = vpow2.f32 %v6712_v59 }
0x2088   : > { %7996 = vpow2.f32 %v6713_v10 }
0x2089   : > { %v7991_v44 = vpop.eup %7990 }
0x208a   : > { %4777 = vperm.xlu0 %7840, %v7991_v44  }
0x2090   : > { %v7993_v8 = vpop.eup %7992 }
0x2091   : > { %4782 = vperm.xlu1 %7841, %v7993_v8   ;;  %v7995_v42 = vpop.eup %7994 }
0x2092   : > { %v7997_v50 = vpop.eup %7996  ;;  %v4614_v27 = vadd.f32 1.0, %v7995_v42 }
0x2093   : > { %v4615_v38 = vadd.f32 1.0, %v7997_v50 }
0x2094   : > { %7998 = vrcp.f32 %v4614_v27 }
0x2095   : > { %8000 = vrcp.f32 %v4615_v38 }
0x209e   : > { %v7999_v20 = vpop.eup %7998 }
0x209f   : > { %v8001_v40 = vpop.eup %8000  ;;  %v4646_v26 = vsub.f32 1.0, %v7999_v20 }
0x20a0   : > { %v4647_v41 = vsub.f32 1.0, %v8001_v40 }
0x20b3   : > { %v4651_v9 = vpop.permute.xlu0 %4650 }
0x20b4   : > { %v4656_v45 = vmul.f32 %v4651_v9, %v4646_v26 }
0x20b5   : > { %v4653_v22 = vpop.permute.xlu1 %4652 }
0x20b6   : > { %v4657_v36 = vmul.f32 %v4653_v22, %v4647_v41 }
0x20b7   : > { %v4661_v57 = vpop.permute.xlu0 %4660 }
0x20b8   : > { %v4666_v19 = vmul.f32 %v7999_v20, %v4661_v57 }
0x20b9   : > { %v4663_v4 = vpop.permute.xlu1 %4662 }
0x20ba   : > { %v4668_v15 = vadd.f32 %v4666_v19, %v4656_v45  ;;  %v4667_v23 = vmul.f32 %v8001_v40, %v4663_v4 }
0x20bc   : > { %v4669_v14 = vadd.f32 %v4667_v23, %v4657_v36  ;;  %v4961_v55 = vpack.c.bf16 %v4668_v15, %v4668_v15 }
0x20be   : > { %4963 = vrot.lane.b32.xlu1 %v4961_v55, %s8113_s16  ;;  %v4670_v56 = vpack.c.bf16 %v4669_v14, %v4668_v15  ;;  %v5008_v0 = vpack.c.bf16 %v4669_v14, %v4669_v14 }
0x20c0   : > { %4672 = vrot.lane.b32.xlu0 %v4670_v56, %s8113_s16 }
0x20c4   : > { %5010 = vrot.lane.b32.xlu0 %v5008_v0, %s8113_s16 }
0x2109   : > { %v4778_v29 = vpop.permute.xlu0 %4777 }
0x210a   : > { %v4785_v16 = vmul.f32 %v9254_v33, %v4778_v29  ;;  %v6720_v33 = vld [vmem:[%s9712_s2 + $0x28] sm:$0xff] }
0x210b   : > { %v9320_v12 = vpack.c.bf16 %v6720_v33, %v6720_v33 }
0x210c   : > { %v4787_v17 = vpack.c.bf16 %v4785_v16, %v4785_v16 }
0x210e   : > { %v4792_v49 = vsel %vm460_vm1, %v4787_v17, 0 }
0x210f   : > { %7564 = vmatpush3.bf16.msra.mxu1 %v4792_v49 }
0x2110   : > { %7575 = vmatprep.subr.bf16.mxu1 %v8106_v18  ;;  %v4783_v13 = vpop.permute.xlu1 %4782 }
0x2111   : > { %v4786_v43 = vmul.f32 %v9261_v63, %v4783_v13 }
0x2112   : > { %7566 = vmatmul.mubr.msk.bf16.vlgmr.msra.gmra.mrb[144].mxu1 %vm456_vm2, %v4741_v30 }
0x2113   : > { %7576 = vmatpush3.bf16.msra.mxu1 %v4792_v49  ;;  %7577 = vmatprep.mubr.msk.bf16.mxu1 %vm8107_vm0, %v8106_v18  ;;  %v4834_v11 = vpack.c.bf16 %v4786_v43, %v4786_v43 }
0x2114   : > { %7587 = vmatprep.subr.bf16.mxu1 %v8106_v18 }
0x2115   : > { %v4836_v5 = vsel %vm460_vm1, %v4834_v11, 0 }
0x211a   : > { %7578 = vmatmul.mubr.msk.bf16.vlgmr.msra.gmra.mrb[148].mxu1 %vm456_vm2, %v9320_v12 }
0x211b   : > { %7589 = vmatprep.mubr.msk.bf16.mxu1 %vm8107_vm0, %v8106_v18 }
0x2130   : > { %v4964_v44 = vpop.permute.xlu1 %4963 }
0x2131   : > { %v4966_v8 = vsel %vm460_vm1, %v4964_v44, 0 }
0x2132   : > { %v4673_v47 = vpop.permute.xlu0 %4672  ;;  %7588 = vmatpush3.bf16.msra.mxu1 %v4966_v8 }
0x2133   : > { %7560 = vmatmul.mubr.msk.bf16.vlgmr.msra.gmra.mrb[148].mxu0 %vm921_vm6, %v4673_v47  ;;  %7599 = vmatprep.subr.bf16.mxu1 %v8106_v18 }
0x2134   : > { %7570 = vmatpush3.bf16.msra.mxu0 %v4836_v5  ;;  %7571 = vmatprep.mubr.msk.bf16.mxu0 %vm8107_vm0, %v8106_v18 }
0x2135   : > { %7581 = vmatprep.subr.bf16.mxu0 %v8106_v18  ;;  %7590 = vmatmul.mubr.msk.bf16.vlgmr.msra.gmra.mrb[152].mxu1 %vm456_vm2, %v4741_v30 }
0x2136   : > { %7600 = vmatpush3.bf16.msra.mxu1 %v9119_v31  ;;  %7603 = vmatprep.mubr.msk.bf16.mxu1 %vm8107_vm0, %v8106_v18  ;;  %v5011_v63 = vpop.permute.xlu0 %5010 }
0x2137   : > { %7601 = vmatprep.subr.bf16.mxu1 %v8106_v18  ;;  %v5013_v31 = vsel %vm460_vm1, %v5011_v63, 0 }
0x213a   : > { %7602 = vmatpush3.bf16.msra.mxu1 %v9132_v6 }
0x213b   : > { %7572 = vmatmul.mubr.msk.bf16.vlgmr.msra.gmra.mrb[152].mxu0 %vm456_vm2, %v4741_v30  ;;  %7613 = vmatprep.subr.bf16.mxu1 %v8106_v18 }
0x213c   : > { %7582 = vmatpush3.bf16.msra.mxu0 %v4836_v5  ;;  %7583 = vmatprep.mubr.msk.bf16.mxu0 %vm8107_vm0, %v8106_v18 }
0x213d   : > { %7593 = vmatprep.subr.bf16.mxu0 %v8106_v18 }
0x2143   : > { %7584 = vmatmul.mubr.msk.bf16.vlgmr.msra.gmra.mrb[156].mxu0 %vm456_vm2, %v9320_v12 }
0x2144   : > { %7594 = vmatpush3.bf16.msra.mxu0 %v5013_v31  ;;  %7595 = vmatprep.mubr.msk.bf16.mxu0 %vm8107_vm0, %v8106_v18 }
0x2145   : > { %7607 = vmatprep.subr.bf16.mxu0 %v8106_v18 }
0x214b   : > { %7596 = vmatmul.mubr.msk.bf16.vlgmr.msra.gmra.mrb[160].mxu0 %vm456_vm2, %v4741_v30 }
0x214c   : > { %7608 = vmatpush3.bf16.msra.mxu0 %v4966_v8  ;;  %7609 = vmatprep.mubr.msk.bf16.mxu0 %vm8107_vm0, %v8106_v18 }
0x214d   : > { %7619 = vmatprep.subr.bf16.mxu0 %v8106_v18 }
0x2153   : > { %7610 = vmatmul.mubr.msk.bf16.vlgmr.msra.gmra.mrb[164].mxu0 %vm456_vm2, %v9320_v12 }
0x2154   : > { %7620 = vmatpush3.bf16.msra.mxu0 %v9141_v60  ;;  %7623 = vmatprep.mubr.msk.bf16.mxu0 %vm8107_vm0, %v8106_v18 }
0x2155   : > { %7621 = vmatprep.subr.bf16.mxu0 %v8106_v18 }
0x2158   : > { %7622 = vmatpush3.bf16.msra.mxu0 %v9150_v1 }
0x2159   : > { %7635 = vmatprep.subr.bf16.mxu0 %v8106_v18 }
0x21e5   : > { %v9363_v6 = vpop.f32.mrb[144].mxu1 }
0x21e6   : > { %v7567_v59 = vpop.f32.mrb[145].mxu1 }
0x21e7   : > { %v4831_v10 = vpop.f32.mrb[146].mxu1 }
0x21e8   : > { %v7568_v42 = vpop.f32.mrb[147].mxu1 }
0x21ed   : > { %v9365_v50 = vpop.f32.mrb[148].mxu1 }
0x21ee   : > { %v7579_v27 = vpop.f32.mrb[149].mxu1 }
0x21ef   : > { %v4918_v38 = vpop.f32.mrb[150].mxu1 }
0x21f0   : > { %v7580_v20 = vpop.f32.mrb[151].mxu1 }
0x2206   : > { %v9367_v60 = vpop.f32.mrb[148].mxu0 }
0x2207   : > { %v7561_v9 = vpop.f32.mrb[149].mxu0 }
0x2208   : > { %v9369_v40 = vpop.f32.mrb[150].mxu0  ;;  %v5002_v22 = vpop.f32.mrb[152].mxu1 }
0x2209   : > { %v7562_v26 = vpop.f32.mrb[151].mxu0  ;;  %v7591_v1 = vpop.f32.mrb[153].mxu1 }
0x220a   : > { %v5005_v57 = vpop.f32.mrb[154].mxu1 }
0x220b   : > { %v7592_v45 = vpop.f32.mrb[155].mxu1 }
0x220e   : > { %v9371_v41 = vpop.f32.mrb[152].mxu0 }
0x220f   : > { %v5321_v19 = vpack.c.bf16 %v9371_v41, %v9363_v6  ;;  %v7573_v4 = vpop.f32.mrb[153].mxu0 }
0x2210   : > { %v4875_v36 = vpop.f32.mrb[154].mxu0 }
0x2211   : > { %v7574_v15 = vpop.f32.mrb[155].mxu0 }
0x2216   : > { %v9375_v23 = vpop.f32.mrb[156].mxu0 }
0x2217   : > { %v5322_v14 = vpack.c.bf16 %v9375_v23, %v9365_v50  ;;  %v7585_v55 = vpop.f32.mrb[157].mxu0 }
0x2218   : > { %v4958_v56 = vpop.f32.mrb[158].mxu0 }
0x2219   : > { %v7586_v0 = vpop.f32.mrb[159].mxu0 }
0x221e   : > { %v5049_v29 = vpop.f32.mrb[160].mxu0 }
0x221f   : > { %v5055_v16 = vpack.c.bf16 %v5049_v29, %v5002_v22  ;;  %v7597_v51 = vpop.f32.mrb[161].mxu0 }
0x2220   : > { %v5052_v17 = vpop.f32.mrb[162].mxu0 }
0x2221   : > { %7604 = vmatmul.mubr.msk.bf16.vlgmr.msra.gmra.mrb[156].mxu1 %vm921_vm6, %v5055_v16  ;;  %v7598_v49 = vpop.f32.mrb[163].mxu0 }
0x2222   : > { %7614 = vmatpush3.bf16.msra.mxu1 %v5013_v31  ;;  %7615 = vmatprep.mubr.msk.bf16.mxu1 %vm8107_vm0, %v8106_v18 }
0x2223   : > { %7627 = vmatprep.subr.bf16.mxu1 %v8106_v18 }
0x2226   : > { %v5136_v30 = vpop.f32.mrb[164].mxu0 }
0x2227   : > { %v7611_v33 = vpop.f32.mrb[165].mxu0 }
0x2228   : > { %v5139_v13 = vpop.f32.mrb[166].mxu0 }
0x2229   : > { %7616 = vmatmul.mubr.msk.bf16.vlgmr.msra.gmra.mrb[160].mxu1 %vm456_vm2, %v9320_v12  ;;  %v7612_v43 = vpop.f32.mrb[167].mxu0  ;;  %v9447_v13 = vld [vmem:[%s8230_s21 + $0x60] sm:$0xff] }
0x222a   : > { %7628 = vmatpush3.bf16.msra.mxu1 %v9175_v48  ;;  %7631 = vmatprep.mubr.msk.bf16.mxu1 %vm8107_vm0, %v8106_v18 }
0x222b   : > { %7629 = vmatprep.subr.bf16.mxu1 %v8106_v18 }
0x222e   : > { %7630 = vmatpush3.bf16.msra.mxu1 %v9184_v24 }
0x222f   : > { %7643 = vmatprep.subr.bf16.mxu1 %v8106_v18 }
0x22f4   : > { %v5093_v11 = vpop.f32.mrb[156].mxu1 }
0x22f5   : > { %v5094_v44 = vadd.f32 %v5093_v11, %v8392_v3  ;;  %v7605_v8 = vpop.f32.mrb[157].mxu1 }
0x22f6   : > { %v5096_v12 = vpop.f32.mrb[158].mxu1  ;;  %v9454_v8 = vld [vmem:[%s8230_s21 + $0x68] sm:$0xff] }
0x22f7   : > { %v5097_v48 = vadd.f32 %v5096_v12, %v8392_v3  ;;  %v7606_v47 = vpop.f32.mrb[159].mxu1  ;;  %v5100_v5 = vmax.f32 %v5094_v44, 0.0  ;;  %v5599_v12 = vmul.f32 %v9447_v13, %v8273_v34 }
0x22f9   : > { %v5101_v63 = vmax.f32 %v5097_v48, 0.0  ;;  %v5600_v48 = vmul.f32 %v9454_v8, %v8273_v34 }
0x22fb   : > { %v5229_v31 = vpack.c.bf16 %v5101_v63, %v5100_v5 }
0x22fc   : > { %v5176_v59 = vpop.f32.mrb[160].mxu1 }
0x22fd   : > { %v5182_v10 = vpack.c.bf16 %v5176_v59, %v5136_v30  ;;  %v7617_v24 = vpop.f32.mrb[161].mxu1 }
0x22fe   : > { %v5179_v42 = vpop.f32.mrb[162].mxu1 }
0x22ff   : > { %7624 = vmatmul.mubr.msk.bf16.vlgmr.msra.gmra.mrb[168].mxu0 %vm921_vm6, %v5182_v10  ;;  %v7618_v27 = vpop.f32.mrb[163].mxu1 }
0x2300   : > { %7636 = vmatpush3.bf16.msra.mxu0 %v9194_v62  ;;  %7639 = vmatprep.mubr.msk.bf16.mxu0 %vm8107_vm0, %v8106_v18 }
0x2301   : > { %7637 = vmatprep.subr.bf16.mxu0 %v8106_v18 }
0x2304   : > { %7638 = vmatpush3.bf16.msra.mxu0 %v9203_v35 }
0x2305   : > { %7655 = vmatprep.subr.bf16.mxu0 %v8106_v18 }
0x2307   : > { %7640 = vmatmul.mubr.msk.bf16.vlgmr.msra.gmra.mrb[172].mxu0 %vm921_vm6, %v5229_v31 }
0x2308   : > { %7656 = vmatpush3.bf16.msra.mxu0 %v9211_v32  ;;  %7659 = vmatprep.mubr.msk.bf16.mxu0 %vm8107_vm0, %v8106_v18 }
0x2309   : > { %7657 = vmatprep.subr.bf16.mxu0 %v8106_v18 }
0x230c   : > { %7658 = vmatpush3.bf16.msra.mxu0 %v9220_v21 }
0x230d   : > { %7663 = vmatprep.subr.bf16.mxu0 %v8106_v18 }
0x23d2   : > { %v5220_v62 = vpop.f32.mrb[168].mxu0 }
0x23d3   : > { %v5221_v38 = vadd.f32 %v5220_v62, %v8433_v25  ;;  %v7625_v20 = vpop.f32.mrb[169].mxu0 }
0x23d4   : > { %v5223_v35 = vpop.f32.mrb[170].mxu0 }
0x23d5   : > { %v5224_v9 = vadd.f32 %v5223_v35, %v8433_v25  ;;  %v7626_v22 = vpop.f32.mrb[171].mxu0  ;;  %v5227_v26 = vmax.f32 %v5221_v38, 0.0 }
0x23d7   : > { %v5228_v1 = vmax.f32 %v5224_v9, 0.0 }
0x23d9   : > { %v5230_v32 = vpack.c.bf16 %v5228_v1, %v5227_v26 }
0x23da   : > { %v5312_v57 = vpop.f32.mrb[172].mxu0 }
0x23db   : > { %7632 = vmatmul.mubr.msk.bf16.vlgmr.msra.gmra.mrb[164].mxu1 %vm921_vm6, %v5230_v32  ;;  %v7641_v45 = vpop.f32.mrb[173].mxu0 }
0x23dc   : > { %v5315_v4 = vpop.f32.mrb[174].mxu0  ;;  %7644 = vmatpush3.bf16.msra.mxu1 %v8440_v46  ;;  %7645 = vmatprep.mubr.msk.bf16.mxu1 %vm8107_vm0, %v8106_v18 }
0x23dd   : > { %v7642_v21 = vpop.f32.mrb[175].mxu0  ;;  %7649 = vmatprep.subr.bf16.mxu1 %v8106_v18 }
0x23e3   : > { %7646 = vmatmul.mubr.msk.bf16.vlgmr.msra.gmra.mrb[168].mxu1 %vm1225_vm8, %v5322_v14 }
0x23e4   : > { %7650 = vmatpush3.bf16.msra.mxu1 %v8450_v53  ;;  %7651 = vmatprep.mubr.msk.bf16.mxu1 %vm8107_vm0, %v8106_v18 }
0x23e5   : > { %7671 = vmatprep.subr.bf16.mxu1 %v8106_v18 }
0x23ef   : > { %7652 = vmatmul.mubr.msk.bf16.vlgmr.msra.gmra.mrb[168].mxu1 %vm1225_vm8, %v5321_v19 }
0x23f0   : > { %7673 = vmatprep.mubr.msk.bf16.mxu1 %vm8107_vm0, %v8106_v18 }
0x24ae   : > { %v5268_v36 = vpop.f32.mrb[164].mxu1 }
0x24af   : > { %v5313_v15 = vadd.f32 %v5312_v57, %v5268_v36  ;;  %v7633_v50 = vpop.f32.mrb[165].mxu1 }
0x24b0   : > { %v5271_v23 = vpop.f32.mrb[166].mxu1 }
0x24b1   : > { %v5316_v14 = vadd.f32 %v5315_v4, %v5271_v23  ;;  %v7634_v55 = vpop.f32.mrb[167].mxu1  ;;  %v9429_v56 = vadd.f32 %v5313_v15, %v8485_v54 }
0x24b3   : > { %v9432_v0 = vadd.f32 %v5316_v14, %v8485_v54 }
0x24b5   : > { %v5411_v6 = vpack.c.bf16 %v9432_v0, %v9429_v56 }
0x24b7   : > { %7660 = vmatmul.mubr.msk.bf16.vlgmr.msra.gmra.mrb[176].mxu0 %vm921_vm6, %v5411_v6 }
0x24b8   : > { %7664 = vmatpush3.bf16.msra.mxu0 %v9293_v61  ;;  %7667 = vmatprep.mubr.msk.bf16.mxu0 %vm8107_vm0, %v8106_v18 }
0x24b9   : > { %7665 = vmatprep.subr.bf16.mxu0 %v8106_v18 }
0x24bc   : > { %7666 = vmatpush3.bf16.msra.mxu0 %v9299_v58 }
0x24bd   : > { %7677 = vmatprep.subr.bf16.mxu0 %v8106_v18 }
0x24c2   : > { %v5404_v41 = vpop.f32.mrb[168].mxu1 }
0x24c3   : > { %v7653_v19 = vpop.f32.mrb[169].mxu1  ;;  %v5486_v32 = vadd.f32 %v5404_v41, %v8536_v2 }
0x24c4   : > { %v5407_v29 = vpop.f32.mrb[170].mxu1 }
0x24c5   : > { %v7654_v16 = vpop.f32.mrb[171].mxu1  ;;  %v5487_v45 = vadd.f32 %v5407_v29, %v8536_v2 }
0x258a   : > { %v5449_v51 = vpop.f32.mrb[176].mxu0 }
0x258b   : > { %v9443_v17 = vadd.f32 %v5449_v51, %v5404_v41  ;;  %v5488_v49 = vadd.f32 %v5449_v51, %v8495_v7  ;;  %v7661_v30 = vpop.f32.mrb[177].mxu0 }
0x258c   : > { %v5452_v33 = vpop.f32.mrb[178].mxu0 }
0x258d   : > { %v9449_v43 = vadd.f32 %v5452_v33, %v5407_v29  ;;  %v5489_v11 = vadd.f32 %v5452_v33, %v8495_v7  ;;  %5492 = vrot.lane.b32.xlu1 %v5488_v49, %s8111_s14  ;;  %v7662_v44 = vpop.f32.mrb[179].mxu0  ;;  %v5458_v47 = vadd.f32 %v9443_v17, %v8522_v37 }
0x258f   : > { %5494 = vrot.lane.b32.xlu0 %v5489_v11, %s8111_s14  ;;  %v5459_v5 = vadd.f32 %v9449_v43, %v8522_v37  ;;  %v6738_v63 = vmul.f32 -1.442695, %v5458_v47  ;;  %v5473_v33 = vadd.f32 %v9449_v43, %v8546_v39 }
0x2591   : > { %5603 = vrot.lane.b32.xlu1 %v5599_v12, %s8109_s11  ;;  %v6739_v31 = vmul.f32 -1.442695, %v5459_v5  ;;  %8002 = vpow2.f32 %v6738_v63  ;;  %v6741_v11 = vmul.f32 -1.442695, %v5473_v33 }
0x2593   : > { %5605 = vrot.lane.b32.xlu0 %v5600_v48, %s8109_s11  ;;  %8004 = vpow2.f32 %v6739_v31 }
0x259b   : > { %v8003_v59 = vpop.eup %8002 }
0x259c   : > { %v5466_v24 = vadd.f32 1.0, %v8003_v59 }
0x259d   : > { %v8005_v10 = vpop.eup %8004 }
0x259e   : > { %v5467_v42 = vadd.f32 1.0, %v8005_v10  ;;  %8006 = vrcp.f32 %v5466_v24 }
0x25a0   : > { %8008 = vrcp.f32 %v5467_v42 }
0x25a8   : > { %v8007_v27 = vpop.eup %8006 }
0x25aa   : > { %v8009_v38 = vpop.eup %8008 }
0x25ff   : > { %v5493_v34 = vpop.permute.xlu1 %5492 }
0x2600   : > { %v5498_v62 = vmul.f32 %v8007_v27, %v5493_v34 }
0x2601   : > { %v5495_v20 = vpop.permute.xlu0 %5494 }
0x2602   : > { %v5499_v35 = vmul.f32 %v8009_v38, %v5495_v20  ;;  %5502 = vrot.lane.b32.xlu1 %v5498_v62, %s8111_s14 }
0x2603   : > { %v5604_v22 = vpop.permute.xlu1 %5603 }
0x2604   : > { %5504 = vrot.lane.b32.xlu0 %v5499_v35, %s8111_s14  ;;  %v5609_v1 = vsel %vm616_vm5, %v5604_v22, 0.0 }
0x2605   : > { %v5606_v9 = vpop.permute.xlu0 %5605 }
0x2606   : > { %v5612_v26 = vsel %vm616_vm5, %v5606_v9, 0.0 }
0x2623   : > { %5613 = vadd.xlane.f32.xlu0 %v5612_v26 }
0x2626   : > { %5610 = vadd.xlane.f32.xlu1 %v5609_v1 }
0x2674   : > { %v5503_v57 = vpop.permute.xlu1 %5502 }
0x2675   : > { %v5508_v4 = vadd.f32 %v5503_v57, %v5486_v32  ;;  %v6745_v32 = vld [vmem:[%s9711_s1 + $0x30] sm:$0xff] }
0x2676   : > { %v5505_v21 = vpop.permute.xlu0 %5504 }
0x2677   : > { %8010 = vtanh.f32 %v5508_v4  ;;  %v5509_v36 = vadd.f32 %v5505_v21, %v5487_v45  ;;  %v5595_v4 = vpack.c.bf16 %v6745_v32, %v6745_v32  ;;  %v6746_v21 = vld [vmem:[%s9712_s2 + $0x30] sm:$0xff] }
0x2679   : > { %8012 = vtanh.f32 %v5509_v36  ;;  %v9501_v36 = vpack.c.bf16 %v6746_v21, %v6746_v21  ;;  %v8075_v21 = vld [vmem:[%s9713_s3 + $0x40] sm:$0xff]  }
0x2681   : > { %v8011_v15 = vpop.eup %8010 }
0x2682   : > { %5516 = vrot.lane.b32.xlu0 %v8011_v15, %s8113_s16 }
0x2683   : > { %v8013_v50 = vpop.eup %8012 }
0x2684   : > { %5518 = vrot.lane.b32.xlu1 %v8013_v50, %s8113_s16 }
0x2686   : > { %5528 = vrot.lane.b32.xlu0 %v9432_v0, %s8112_s15 }
0x2688   : > { %5526 = vrot.lane.b32.xlu1 %v9429_v56, %s8112_s15  ;;  %v5472_v56 = vadd.f32 %v9443_v17, %v8546_v39 }
0x26b0   : > { %v5614_v23 = vpop.xlane.xlu0 %5613 }
0x26b1   : > { %v5616_v14 = vadd.f32 %v5614_v23, %v8289_v52 }
0x26b3   : > { %v6748_v55 = vmul.f32 -1.442695, %v5616_v14  ;;  %v5611_v6 = vpop.xlane.xlu1 %5610 }
0x26b4   : > { %v5615_v41 = vadd.f32 %v5611_v6, %v8289_v52  ;;  %v6740_v52 = vmul.f32 -1.442695, %v5472_v56 }
0x26b5   : > { %8014 = vpow2.f32 %v6748_v55 }
0x26b6   : > { %v6747_v19 = vmul.f32 -1.442695, %v5615_v41 }
0x26b8   : > { %8016 = vpow2.f32 %v6747_v19  ;;  %v8070_v19 = vld [vmem:[%s9713_s3 + $0x8] sm:$0xff]  }
0x26bf   : > { %v8015_v29 = vpop.eup %8014 }
0x26c0   : > { %v5624_v16 = vadd.f32 1.0, %v8015_v29  ;;  %v8071_v29 = vld [vmem:[%s9713_s3 + $0x10] sm:$0xff]  }
0x26c2   : > { %v8017_v51 = vpop.eup %8016  ;;  %8018 = vrcp.f32 %v5624_v16 }
0x26c3   : > { %v5623_v49 = vadd.f32 1.0, %v8017_v51 }
0x26c5   : > { %8020 = vrcp.f32 %v5623_v49  ;;  %v8072_v49 = vld [vmem:[%s9713_s3 + $0x18] sm:$0xff]  }
0x26c6   : > { %8022 = vpow2.f32 %v6740_v52 }
0x26c7   : > { %8024 = vpow2.f32 %v6741_v11 }
0x26cc   : > { %v8019_v0 = vpop.eup %8018 }
0x26cd   : > { %5636 = vperm.xlu0 %7840, %v8019_v0   ;;  %v8073_v0 = vld [vmem:[%s9713_s3 + $0x20] sm:$0xff]  }
0x26cf   : > { %v8021_v30 = vpop.eup %8020 }
0x26d0   : > { %5631 = vperm.xlu1 %7841, %v8021_v30   ;;  %v8023_v44 = vpop.eup %8022 }
0x26d1   : > { %v8025_v12 = vpop.eup %8024  ;;  %v5480_v48 = vadd.f32 1.0, %v8023_v44 }
0x26d2   : > { %v5481_v47 = vadd.f32 1.0, %v8025_v12 }
0x26d3   : > { %8026 = vrcp.f32 %v5480_v48 }
0x26d4   : > { %8028 = vrcp.f32 %v5481_v47 }
0x26dd   : > { %v8027_v63 = vpop.eup %8026 }
0x26de   : > { %v8029_v31 = vpop.eup %8028  ;;  %v5512_v24 = vsub.f32 1.0, %v8027_v63 }
0x26df   : > { %v5513_v17 = vsub.f32 1.0, %v8029_v31 }
0x26f4   : > { %v5517_v5 = vpop.permute.xlu0 %5516 }
0x26f5   : > { %v5522_v43 = vmul.f32 %v5517_v5, %v5512_v24 }
0x26f6   : > { %v5519_v59 = vpop.permute.xlu1 %5518 }
0x26f7   : > { %v5523_v34 = vmul.f32 %v5519_v59, %v5513_v17 }
0x26f8   : > { %v5529_v10 = vpop.permute.xlu0 %5528 }
0x26f9   : > { %v5533_v42 = vmul.f32 %v8029_v31, %v5529_v10 }
0x26fa   : > { %v5527_v27 = vpop.permute.xlu1 %5526 }
0x26fb   : > { %v5532_v62 = vmul.f32 %v8027_v63, %v5527_v27  ;;  %v5535_v38 = vadd.f32 %v5533_v42, %v5523_v34 }
0x26fd   : > { %v5534_v20 = vadd.f32 %v5532_v62, %v5522_v43  ;;  %v5862_v22 = vpack.c.bf16 %v5535_v38, %v5535_v38 }
0x26ff   : > { %v5536_v35 = vpack.c.bf16 %v5535_v38, %v5534_v20  ;;  %v5815_v9 = vpack.c.bf16 %v5534_v20, %v5534_v20 }
0x2701   : > { %5817 = vrot.lane.b32.xlu0 %v5815_v9, %s8113_s16  ;;  %5538 = vrot.lane.b32.xlu1 %v5536_v35, %s8113_s16 }
0x2705   : > { %5864 = vrot.lane.b32.xlu1 %v5862_v22, %s8113_s16 }
0x274c   : > { %v5637_v15 = vpop.permute.xlu0 %5636 }
0x274d   : > { %v5640_v50 = vmul.f32 %v9454_v8, %v5637_v15 }
0x274f   : > { %v5632_v26 = vpop.permute.xlu1 %5631  ;;  %v5688_v23 = vpack.c.bf16 %v5640_v50, %v5640_v50 }
0x2750   : > { %v5639_v1 = vmul.f32 %v9447_v13, %v5632_v26 }
0x2751   : > { %v5690_v6 = vsel %vm460_vm1, %v5688_v23, 0 }
0x2752   : > { %v5641_v57 = vpack.c.bf16 %v5639_v1, %v5639_v1 }
0x2754   : > { %v5646_v45 = vsel %vm460_vm1, %v5641_v57, 0 }
0x2755   : > { %7672 = vmatpush3.bf16.msra.mxu1 %v5646_v45 }
0x2756   : > { %7683 = vmatprep.subr.bf16.mxu1 %v8106_v18 }
0x2758   : > { %7674 = vmatmul.mubr.msk.bf16.vlgmr.msra.gmra.mrb[172].mxu1 %vm456_vm2, %v5595_v4 }
0x2759   : > { %7684 = vmatpush3.bf16.msra.mxu1 %v5646_v45  ;;  %7685 = vmatprep.mubr.msk.bf16.mxu1 %vm8107_vm0, %v8106_v18 }
0x275a   : > { %7695 = vmatprep.subr.bf16.mxu1 %v8106_v18 }
0x2760   : > { %7686 = vmatmul.mubr.msk.bf16.vlgmr.msra.gmra.mrb[176].mxu1 %vm456_vm2, %v9501_v36 }
0x2761   : > { %7697 = vmatprep.mubr.msk.bf16.mxu1 %vm8107_vm0, %v8106_v18 }
0x2773   : > { %v5539_v14 = vpop.permute.xlu1 %5538  ;;  %v5818_v55 = vpop.permute.xlu0 %5817 }
0x2774   : > { %v5820_v41 = vsel %vm460_vm1, %v5818_v55, 0  ;;  %7668 = vmatmul.mubr.msk.bf16.vlgmr.msra.gmra.mrb[180].mxu0 %vm921_vm6, %v5539_v14 }
0x2775   : > { %7678 = vmatpush3.bf16.msra.mxu0 %v5690_v6  ;;  %7696 = vmatpush3.bf16.msra.mxu1 %v5820_v41 }
0x2776   : > { %7679 = vmatprep.mubr.msk.bf16.mxu0 %vm8107_vm0, %v8106_v18  ;;  %7689 = vmatprep.subr.bf16.mxu0 %v8106_v18 }
0x2777   : > { %7707 = vmatprep.subr.bf16.mxu1 %v8106_v18  ;;  %v5865_v16 = vpop.permute.xlu1 %5864 }
0x2778   : > { %7698 = vmatmul.mubr.msk.bf16.vlgmr.msra.gmra.mrb[180].mxu1 %vm456_vm2, %v5595_v4  ;;  %v5867_v51 = vsel %vm460_vm1, %v5865_v16, 0 }
0x2779   : > { %7708 = vmatpush3.bf16.msra.mxu1 %v8070_v19  ;;  %7711 = vmatprep.mubr.msk.bf16.mxu1 %vm8107_vm0, %v8106_v18 }
0x277a   : > { %7709 = vmatprep.subr.bf16.mxu1 %v8106_v18 }
0x277c   : > { %7680 = vmatmul.mubr.msk.bf16.vlgmr.msra.gmra.mrb[184].mxu0 %vm456_vm2, %v5595_v4 }
0x277d   : > { %7690 = vmatpush3.bf16.msra.mxu0 %v5690_v6  ;;  %7691 = vmatprep.mubr.msk.bf16.mxu0 %vm8107_vm0, %v8106_v18 }
0x277e   : > { %7701 = vmatprep.subr.bf16.mxu0 %v8106_v18  ;;  %7710 = vmatpush3.bf16.msra.mxu1 %v8071_v29 }
0x277f   : > { %7721 = vmatprep.subr.bf16.mxu1 %v8106_v18 }
0x2784   : > { %7692 = vmatmul.mubr.msk.bf16.vlgmr.msra.gmra.mrb[188].mxu0 %vm456_vm2, %v9501_v36 }
0x2785   : > { %7702 = vmatpush3.bf16.msra.mxu0 %v5867_v51  ;;  %7703 = vmatprep.mubr.msk.bf16.mxu0 %vm8107_vm0, %v8106_v18 }
0x2786   : > { %7715 = vmatprep.subr.bf16.mxu0 %v8106_v18 }
0x278c   : > { %7704 = vmatmul.mubr.msk.bf16.vlgmr.msra.gmra.mrb[192].mxu0 %vm456_vm2, %v5595_v4  ;;  %v8074_v4 = vld [vmem:[%s9713_s3 + $0x38] sm:$0xff]  }
0x278d   : > { %7716 = vmatpush3.bf16.msra.mxu0 %v5820_v41  ;;  %7717 = vmatprep.mubr.msk.bf16.mxu0 %vm8107_vm0, %v8106_v18 }
0x278e   : > { %7727 = vmatprep.subr.bf16.mxu0 %v8106_v18 }
0x2794   : > { %7718 = vmatmul.mubr.msk.bf16.vlgmr.msra.gmra.mrb[196].mxu0 %vm456_vm2, %v9501_v36 }
0x2795   : > { %7728 = vmatpush3.bf16.msra.mxu0 %v8072_v49  ;;  %7731 = vmatprep.mubr.msk.bf16.mxu0 %vm8107_vm0, %v8106_v18 }
0x2796   : > { %7729 = vmatprep.subr.bf16.mxu0 %v8106_v18 }
0x2799   : > { %7730 = vmatpush3.bf16.msra.mxu0 %v8073_v0 }
0x279a   : > { %7743 = vmatprep.subr.bf16.mxu0 %v8106_v18 }
0x282b   : > { %v9552_v30 = vpop.f32.mrb[172].mxu1 }
0x282c   : > { %v7675_v56 = vpop.f32.mrb[173].mxu1 }
0x282d   : > { %v5685_v33 = vpop.f32.mrb[174].mxu1 }
0x282e   : > { %v7676_v52 = vpop.f32.mrb[175].mxu1 }
0x2833   : > { %v9554_v11 = vpop.f32.mrb[176].mxu1 }
0x2834   : > { %v7687_v44 = vpop.f32.mrb[177].mxu1 }
0x2835   : > { %v5772_v12 = vpop.f32.mrb[178].mxu1 }
0x2836   : > { %v7688_v48 = vpop.f32.mrb[179].mxu1  ;;  %v8076_v12 = vld [vmem:[%s9713_s3 + $0x28] sm:$0xff]  }
0x2837   : > { %v8078_v48 = vld [vmem:[%s9714_s4 + $0x10] sm:$0xff]  }
0x2847   : > { %v9556_v47 = vpop.f32.mrb[180].mxu0 }
0x2848   : > { %v7669_v5 = vpop.f32.mrb[181].mxu0 }
0x2849   : > { %v9558_v63 = vpop.f32.mrb[182].mxu0  ;;  %v8079_v5 = vld [vmem:[%s9714_s4 + $0x18] sm:$0xff]  }
0x284a   : > { %v7670_v31 = vpop.f32.mrb[183].mxu0 }
0x284b   : > { %v5856_v59 = vpop.f32.mrb[180].mxu1 }
0x284c   : > { %v7699_v10 = vpop.f32.mrb[181].mxu1 }
0x284d   : > { %v5859_v24 = vpop.f32.mrb[182].mxu1 }
0x284e   : > { %v7700_v17 = vpop.f32.mrb[183].mxu1 }
0x284f   : > { %v9560_v42 = vpop.f32.mrb[184].mxu0 }
0x2850   : > { %v6175_v27 = vpack.c.bf16 %v9560_v42, %v9552_v30  ;;  %v7681_v43 = vpop.f32.mrb[185].mxu0 }
0x2851   : > { %v5729_v34 = vpop.f32.mrb[186].mxu0 }
0x2852   : > { %v7682_v62 = vpop.f32.mrb[187].mxu0 }
0x2857   : > { %v9564_v38 = vpop.f32.mrb[188].mxu0 }
0x2858   : > { %v6176_v20 = vpack.c.bf16 %v9564_v38, %v9554_v11  ;;  %v7693_v35 = vpop.f32.mrb[189].mxu0 }
0x2859   : > { %v5812_v9 = vpop.f32.mrb[190].mxu0 }
0x285a   : > { %v7694_v22 = vpop.f32.mrb[191].mxu0 }
0x285f   : > { %v5903_v26 = vpop.f32.mrb[192].mxu0 }
0x2860   : > { %v5909_v1 = vpack.c.bf16 %v5903_v26, %v5856_v59  ;;  %v7705_v32 = vpop.f32.mrb[193].mxu0 }
0x2861   : > { %v5906_v57 = vpop.f32.mrb[194].mxu0 }
0x2862   : > { %7712 = vmatmul.mubr.msk.bf16.vlgmr.msra.gmra.mrb[184].mxu1 %vm921_vm6, %v5909_v1  ;;  %v7706_v45 = vpop.f32.mrb[195].mxu0 }
0x2863   : > { %7722 = vmatpush3.bf16.msra.mxu1 %v5867_v51  ;;  %7723 = vmatprep.mubr.msk.bf16.mxu1 %vm8107_vm0, %v8106_v18 }
0x2864   : > { %7735 = vmatprep.subr.bf16.mxu1 %v8106_v18 }
0x2867   : > { %v5990_v15 = vpop.f32.mrb[196].mxu0 }
0x2868   : > { %v7719_v50 = vpop.f32.mrb[197].mxu0 }
0x286a   : > { %7724 = vmatmul.mubr.msk.bf16.vlgmr.msra.gmra.mrb[188].mxu1 %vm456_vm2, %v9501_v36  ;;  %v5993_v36 = vpop.f32.mrb[198].mxu0 }
0x286b   : > { %7736 = vmatpush3.bf16.msra.mxu1 %v8074_v4  ;;  %7739 = vmatprep.mubr.msk.bf16.mxu1 %vm8107_vm0, %v8106_v18  ;;  %v7720_v23 = vpop.f32.mrb[199].mxu0 }
0x286c   : > { %7737 = vmatprep.subr.bf16.mxu1 %v8106_v18 }
0x286f   : > { %7738 = vmatpush3.bf16.msra.mxu1 %v8075_v21 }
0x2870   : > { %7751 = vmatprep.subr.bf16.mxu1 %v8106_v18 }
0x2935   : > { %v5947_v14 = vpop.f32.mrb[184].mxu1 }
0x2936   : > { %v5948_v55 = vadd.f32 %v5947_v14, %v8392_v3  ;;  %v7713_v6 = vpop.f32.mrb[185].mxu1 }
0x2937   : > { %v5950_v41 = vpop.f32.mrb[186].mxu1 }
0x2938   : > { %v5951_v19 = vadd.f32 %v5950_v41, %v8392_v3  ;;  %v7714_v29 = vpop.f32.mrb[187].mxu1  ;;  %v5954_v16 = vmax.f32 %v5948_v55, 0.0  ;;  %v8077_v3 = vld [vmem:[%s9713_s3 + $0x30] sm:$0xff]  }
0x293a   : > { %v5955_v51 = vmax.f32 %v5951_v19, 0.0 }
0x293c   : > { %v6083_v49 = vpack.c.bf16 %v5955_v51, %v5954_v16 }
0x293d   : > { %v6030_v0 = vpop.f32.mrb[188].mxu1 }
0x293e   : > { %v6036_v56 = vpack.c.bf16 %v6030_v0, %v5990_v15  ;;  %v7725_v33 = vpop.f32.mrb[189].mxu1 }
0x293f   : > { %v6033_v52 = vpop.f32.mrb[190].mxu1 }
0x2940   : > { %7732 = vmatmul.mubr.msk.bf16.vlgmr.msra.gmra.mrb[200].mxu0 %vm921_vm6, %v6036_v56  ;;  %v7726_v44 = vpop.f32.mrb[191].mxu1 }
0x2941   : > { %7744 = vmatpush3.bf16.msra.mxu0 %v8076_v12  ;;  %7747 = vmatprep.mubr.msk.bf16.mxu0 %vm8107_vm0, %v8106_v18 }
0x2942   : > { %7745 = vmatprep.subr.bf16.mxu0 %v8106_v18 }
0x2945   : > { %7746 = vmatpush3.bf16.msra.mxu0 %v8077_v3 }
0x2946   : > { %7763 = vmatprep.subr.bf16.mxu0 %v8106_v18 }
0x2948   : > { %7748 = vmatmul.mubr.msk.bf16.vlgmr.msra.gmra.mrb[204].mxu0 %vm921_vm6, %v6083_v49 }
0x2949   : > { %7764 = vmatpush3.bf16.msra.mxu0 %v8078_v48  ;;  %7767 = vmatprep.mubr.msk.bf16.mxu0 %vm8107_vm0, %v8106_v18 }
0x294a   : > { %7765 = vmatprep.subr.bf16.mxu0 %v8106_v18 }
0x294d   : > { %7766 = vmatpush3.bf16.msra.mxu0 %v8079_v5 }
0x294e   : > { %7771 = vmatprep.subr.bf16.mxu0 %v8106_v18 }
0x2a13   : > { %v6074_v31 = vpop.f32.mrb[200].mxu0 }
0x2a14   : > { %v6075_v59 = vadd.f32 %v6074_v31, %v8433_v25  ;;  %v7733_v10 = vpop.f32.mrb[201].mxu0 }
0x2a15   : > { %v6077_v24 = vpop.f32.mrb[202].mxu0 }
0x2a16   : > { %v6078_v17 = vadd.f32 %v6077_v24, %v8433_v25  ;;  %v7734_v43 = vpop.f32.mrb[203].mxu0  ;;  %v6081_v34 = vmax.f32 %v6075_v59, 0.0  ;;  %v444_v59 = vld [vmem:[%s9716_s6] sm:$0xff] }
0x2a18   : > { %v6082_v62 = vmax.f32 %v6078_v17, 0.0 }
0x2a1a   : > { %v6084_v35 = vpack.c.bf16 %v6082_v62, %v6081_v34 }
0x2a1b   : > { %v6166_v9 = vpop.f32.mrb[204].mxu0 }
0x2a1c   : > { %7740 = vmatmul.mubr.msk.bf16.vlgmr.msra.gmra.mrb[192].mxu1 %vm921_vm6, %v6084_v35  ;;  %v7749_v22 = vpop.f32.mrb[205].mxu0 }
0x2a1d   : > { %v6169_v26 = vpop.f32.mrb[206].mxu0  ;;  %7752 = vmatpush3.bf16.msra.mxu1 %v8440_v46  ;;  %7753 = vmatprep.mubr.msk.bf16.mxu1 %vm8107_vm0, %v8106_v18 }
0x2a1e   : > { %v7750_v1 = vpop.f32.mrb[207].mxu0  ;;  %7757 = vmatprep.subr.bf16.mxu1 %v8106_v18 }
0x2a24   : > { %7754 = vmatmul.mubr.msk.bf16.vlgmr.msra.gmra.mrb[196].mxu1 %vm1225_vm8, %v6176_v20 }
0x2a25   : > { %7758 = vmatpush3.bf16.msra.mxu1 %v8450_v53  ;;  %7759 = vmatprep.mubr.msk.bf16.mxu1 %vm8107_vm0, %v8106_v18 }
0x2a30   : > { %7760 = vmatmul.mubr.msk.bf16.vlgmr.msra.gmra.mrb[196].mxu1 %vm1225_vm8, %v6175_v27 }
0x2aef   : > { %v6122_v25 = vpop.f32.mrb[192].mxu1 }
0x2af0   : > { %v6167_v46 = vadd.f32 %v6166_v9, %v6122_v25  ;;  %v7741_v32 = vpop.f32.mrb[193].mxu1 }
0x2af1   : > { %v6125_v57 = vpop.f32.mrb[194].mxu1 }
0x2af2   : > { %v6170_v45 = vadd.f32 %v6169_v26, %v6125_v57  ;;  %v7742_v4 = vpop.f32.mrb[195].mxu1  ;;  %v6173_v11 = vadd.f32 %v6167_v46, %v8485_v54 }
0x2af4   : > { %v6174_v38 = vadd.f32 %v6170_v45, %v8485_v54 }
0x2af6   : > { %v6265_v20 = vpack.c.bf16 %v6174_v38, %v6173_v11 }
0x2af8   : > { %7768 = vmatmul.mubr.msk.bf16.vlgmr.msra.gmra.mrb[208].mxu0 %vm921_vm6, %v6265_v20 }
0x2af9   : > { %7772 = vmatpush3.bf16.msra.mxu0 %v9293_v61  ;;  %7775 = vmatprep.mubr.msk.bf16.mxu0 %vm8107_vm0, %v8106_v18 }
0x2afa   : > { %7773 = vmatprep.subr.bf16.mxu0 %v8106_v18 }
0x2afd   : > { %7774 = vmatpush3.bf16.msra.mxu0 %v9299_v58 }
0x2b03   : > { %v6258_v53 = vpop.f32.mrb[196].mxu1 }
0x2b04   : > { %v7761_v30 = vpop.f32.mrb[197].mxu1 }
0x2b05   : > { %v6261_v42 = vpop.f32.mrb[198].mxu1  ;;  %v4724_v30 = vadd.f32 %v9367_v60, %v8253_v28 }
0x2b06   : > { %v7762_v27 = vpop.f32.mrb[199].mxu1  ;;  %v6341_v44 = vadd.f32 %v6261_v42, %v8536_v2 }
0x2b07   : > { %v4727_v27 = vadd.f32 %v9369_v40, %v8253_v28 }
0x2bcb   : > { %v6303_v21 = vpop.f32.mrb[208].mxu0 }
0x2bcc   : > { %v6310_v15 = vadd.f32 %v6303_v21, %v6258_v53  ;;  %v6342_v54 = vadd.f32 %v6303_v21, %v8495_v7  ;;  %v7769_v50 = vpop.f32.mrb[209].mxu0  ;;  %v5578_v21 = vadd.f32 %v9556_v47, %v8253_v28 }
0x2bcd   : > { %v6306_v36 = vpop.f32.mrb[210].mxu0  ;;  %v8080_v50 = vld [vmem:[%s8230_s21 + $0x50] sm:$0xff] }
0x2bce   : > { %v6311_v23 = vadd.f32 %v6306_v36, %v6261_v42  ;;  %v6343_v61 = vadd.f32 %v6306_v36, %v8495_v7  ;;  %6346 = vrot.lane.b32.xlu0 %v6342_v54, %s8111_s14  ;;  %v7770_v14 = vpop.f32.mrb[211].mxu0  ;;  %v6312_v18 = vadd.f32 %v6310_v15, %v8522_v37 }
0x2bd0   : > { %6348 = vrot.lane.b32.xlu1 %v6343_v61, %s8111_s14  ;;  %v6313_v58 = vadd.f32 %v6311_v23, %v8522_v37  ;;  %v6764_v55 = vmul.f32 -1.442695, %v6312_v18  ;;  %v6340_v37 = vadd.f32 %v6258_v53, %v8536_v2  ;;  %v6326_v2 = vadd.f32 %v6310_v15, %v8546_v39 }
0x2bd1   : > { %v6327_v10 = vadd.f32 %v6311_v23, %v8546_v39  ;;  %v5581_v15 = vadd.f32 %v9558_v63, %v8253_v28  ;;  %v8081_v23 = vld [vmem:[%s8230_s21 + $0x58] sm:$0xff]  ;;  %v6769_v63 = vld [vmem:[%s8230_s21 + $0x70] sm:$0xff] }
0x2bd2   : > { %v6765_v6 = vmul.f32 -1.442695, %v6313_v58  ;;  %8030 = vpow2.f32 %v6764_v55  ;;  %v6766_v24 = vmul.f32 -1.442695, %v6326_v2 }
0x2bd3   : > { %v6767_v17 = vmul.f32 -1.442695, %v6327_v10 }
0x2bd4   : > { %8032 = vpow2.f32 %v6765_v6 }
0x2bdc   : > { %v8031_v41 = vpop.eup %8030 }
0x2bdd   : > { %v6320_v29 = vadd.f32 1.0, %v8031_v41 }
0x2bde   : > { %v8033_v19 = vpop.eup %8032 }
0x2bdf   : > { %v6321_v16 = vadd.f32 1.0, %v8033_v19  ;;  %8034 = vrcp.f32 %v6320_v29 }
0x2be1   : > { %8036 = vrcp.f32 %v6321_v16 }
0x2be9   : > { %v8035_v7 = vpop.eup %8034 }
0x2beb   : > { %v8037_v0 = vpop.eup %8036 }
0x2c40   : > { %v6347_v51 = vpop.permute.xlu0 %6346 }
0x2c41   : > { %v6352_v49 = vmul.f32 %v8035_v7, %v6347_v51  ;;  %v6770_v51 = vld [vmem:[%s8230_s21 + $0x78] sm:$0xff] }
0x2c42   : > { %v6349_v56 = vpop.permute.xlu1 %6348 }
0x2c43   : > { %v6353_v33 = vmul.f32 %v8037_v0, %v6349_v56  ;;  %6356 = vrot.lane.b32.xlu0 %v6352_v49, %s8111_s14 }
0x2c45   : > { %6358 = vrot.lane.b32.xlu1 %v6353_v33, %s8111_s14 }
0x2cb5   : > { %v6357_v52 = vpop.permute.xlu0 %6356 }
0x2cb6   : > { %v6362_v12 = vadd.f32 %v6357_v52, %v6340_v37 }
0x2cb7   : > { %v6359_v3 = vpop.permute.xlu1 %6358 }
0x2cb8   : > { %8038 = vtanh.f32 %v6362_v12  ;;  %v6363_v48 = vadd.f32 %v6359_v3, %v6341_v44 }
0x2cba   : > { %8040 = vtanh.f32 %v6363_v48 }
0x2cbb   : > { %8042 = vpow2.f32 %v6766_v24 }
0x2cbc   : > { %8044 = vpow2.f32 %v6767_v17 }
0x2cc2   : > { %v8039_v5 = vpop.eup %8038 }
0x2cc3   : > { %6370 = vrot.lane.b32.xlu0 %v8039_v5, %s8113_s16 }
0x2cc4   : > { %v8041_v31 = vpop.eup %8040 }
0x2cc5   : > { %6372 = vrot.lane.b32.xlu1 %v8041_v31, %s8113_s16  ;;  %v8043_v43 = vpop.eup %8042 }
0x2cc6   : > { %v8045_v34 = vpop.eup %8044  ;;  %v6334_v62 = vadd.f32 1.0, %v8043_v43 }
0x2cc7   : > { %6380 = vrot.lane.b32.xlu0 %v6173_v11, %s8112_s15  ;;  %v6335_v35 = vadd.f32 1.0, %v8045_v34 }
0x2cc8   : > { %8046 = vrcp.f32 %v6334_v62 }
0x2cc9   : > { %6382 = vrot.lane.b32.xlu1 %v6174_v38, %s8112_s15  ;;  %8048 = vrcp.f32 %v6335_v35  ;;  %s7807_s15 = smul.u32 48, %s338_s17  ;;  %s6776_s17 = sshll.u32 (%p8184_p5), %s6571_s27, 4 }
0x2cca   : > { %s6462_s30 = scalar_lea.vmem (%p8184_p5), %s9717_s7, %s6776_s17 }
0x2ccb   : > { %s9668_s24 = scalar_lea.vmem [#allocation3], %s7807_s15 }
0x2ccd   : > { %447 = vperm.xlu1 %7841, %v444_v59  }
0x2cd2   : > { %v8047_v22 = vpop.eup %8046 }
0x2cd3   : > { %v8049_v26 = vpop.eup %8048  ;;  %v6366_v46 = vsub.f32 1.0, %v8047_v22 }
0x2cd4   : > { %v6367_v32 = vsub.f32 1.0, %v8049_v26 }
0x2d35   : > { %v6371_v9 = vpop.permute.xlu0 %6370 }
0x2d36   : > { %v6376_v45 = vmul.f32 %v6371_v9, %v6366_v46 }
0x2d37   : > { %v6373_v1 = vpop.permute.xlu1 %6372 }
0x2d38   : > { %v6377_v4 = vmul.f32 %v6373_v1, %v6367_v32 }
0x2d39   : > { %v6381_v25 = vpop.permute.xlu0 %6380 }
0x2d3a   : > { %v6386_v57 = vmul.f32 %v8047_v22, %v6381_v25 }
0x2d3b   : > { %v6383_v39 = vpop.permute.xlu1 %6382 }
0x2d3c   : > { %v6387_v11 = vmul.f32 %v8049_v26, %v6383_v39  ;;  %v6388_v38 = vadd.f32 %v6386_v57, %v6376_v45 }
0x2d3e   : > { %v6389_v20 = vadd.f32 %v6387_v11, %v6377_v4 }
0x2d40   : > { %v6390_v53 = vpack.c.bf16 %v6389_v20, %v6388_v38 }
0x2d42   : > { %6392 = vrot.lane.b32.xlu0 %v6390_v53, %s8113_s16 }
0x2d4c   : > { %v448_v42 = vpop.permute.xlu1 %447 }
0x2d4d   : > { %v450_v54 = vsub.f32 1.0, %v448_v42  ;;  %v4733_v36 = vmul.f32 %v8080_v50, %v448_v42  ;;  %v4734_v61 = vmul.f32 %v8081_v23, %v448_v42  ;;  %v5587_v14 = vmul.f32 %v9447_v13, %v448_v42 }
0x2d4e   : > { %v5588_v60 = vmul.f32 %v9454_v8, %v448_v42  ;;  %v6441_v49 = vmul.f32 %v6769_v63, %v448_v42  ;;  %v6442_v52 = vmul.f32 %v6770_v51, %v448_v42 }
0x2d4f   : > { %v4735_v18 = vmul.f32 %v4724_v30, %v450_v54  ;;  %v4736_v58 = vmul.f32 %v4727_v27, %v450_v54  ;;  %v5589_v55 = vmul.f32 %v5578_v21, %v450_v54  ;;  %v5590_v40 = vmul.f32 %v5581_v15, %v450_v54 }
0x2d51   : > { %v4737_v6 = vadd.f32 %v4735_v18, %v4733_v36  ;;  %v4738_v47 = vadd.f32 %v4736_v58, %v4734_v61  ;;  %v5591_v41 = vadd.f32 %v5589_v55, %v5587_v14  ;;  %v5592_v19 = vadd.f32 %v5590_v40, %v5588_v60 }
0x2d53   : > { %6447 = vst.msk [vmem:[%s9668_s24] sm:$0xff] %vm1225_vm8, %v4737_v6  ;;  %6448 = vst.msk [vmem:[%s9668_s24 + $0x8] sm:$0xff] %vm1225_vm8, %v4738_v47 }
0x2d54   : > { %6449 = vst.msk [vmem:[%s9668_s24 + $0x10] sm:$0xff] %vm1225_vm8, %v5591_v41  ;;  %6450 = vst.msk [vmem:[%s9668_s24 + $0x18] sm:$0xff] %vm1225_vm8, %v5592_v19 }
0x2d5a   : > { %v6502_v3 = vld [vmem:[%s9668_s24 + $0x8] sm:$0xff] (%p8184_p5) }
0x2d5b   : > { %v6504_v48 = vld [vmem:[%s9668_s24 + $0x10] sm:$0xff] (%p8184_p5)  ;;  %v6506_v5 = vld [vmem:[%s9668_s24 + $0x18] sm:$0xff] (%p8184_p5)  ;;  %6503 = vst [vmem:[%s6462_s30 + $0x8] sm:$0xff] (%p8184_p5), %v6502_v3 }
0x2d5c   : > { %6505 = vst [vmem:[%s6462_s30 + $0x20] sm:$0xff] (%p8184_p5), %v6504_v48  ;;  %6507 = vst [vmem:[%s6462_s30 + $0x28] sm:$0xff] (%p8184_p5), %v6506_v5 }
0x2db4   : > { %v6393_v13 = vpop.permute.xlu0 %6392 }
0x2db5   : > { %7776 = vmatmul.mubr.msk.bf16.vlgmr.msra.gmra.mrb[212].mxu0 %vm921_vm6, %v6393_v13 }
0x2e88   : > { %v6431_v8 = vpop.f32.mrb[212].mxu0 }
0x2e89   : > { %v6432_v29 = vadd.f32 %v6431_v8, %v8253_v28  ;;  %v7777_v16 = vpop.f32.mrb[213].mxu0 }
0x2e8a   : > { %v6434_v7 = vpop.f32.mrb[214].mxu0 }
0x2e8b   : > { %v6443_v0 = vmul.f32 %v6432_v29, %v450_v54  ;;  %v6435_v56 = vadd.f32 %v6434_v7, %v8253_v28  ;;  %v7778_v33 = vpop.f32.mrb[215].mxu0  ;;  %6459 = sbr.rel (!%p8184_p5) target bundleno = 11930 (0x2e9a), region = 90  ;;  %v6500_v28 = vld [vmem:[%s9668_s24] sm:$0xff] (%p8184_p5) }
0x2e8c   : > { %6501 = vst [vmem:[%s6462_s30] sm:$0xff] (%p8184_p5), %v6500_v28 }
0x2e8d   : > { %v6445_v37 = vadd.f32 %v6443_v0, %v6441_v49  ;;  %v6444_v44 = vmul.f32 %v6435_v56, %v450_v54 }
0x2e8f   : > { %6451 = vst.msk [vmem:[%s9668_s24 + $0x20] sm:$0xff] %vm1225_vm8, %v6445_v37  ;;  %v6446_v12 = vadd.f32 %v6444_v44, %v6442_v52 }
0x2e91   : > { %6452 = vst.msk [vmem:[%s9668_s24 + $0x28] sm:$0xff] %vm1225_vm8, %v6446_v12 }
0x2e96   : > { %v6508_v31 = vld [vmem:[%s9668_s24 + $0x20] sm:$0xff] }
0x2e97   : > { %6509 = vst [vmem:[%s6462_s30 + $0x40] sm:$0xff] %v6508_v31 }
0x2e98   : > { %v6510_v59 = vld [vmem:[%s9668_s24 + $0x28] sm:$0xff] }
0x2e99   : > { %6511 = vst [vmem:[%s6462_s30 + $0x48] sm:$0xff] %v6510_v59 }
0x2e9a PF: > { %p14_p10 = scmp.ge.s32.totalorder %s8171_s28, 4   ;;  %s9719_s24 = smov %s8100_s25 }
0x2e9b   : > { %s9720_s25 = smov %s8182_s8  ;;  %s9721_s26 = smov %s8171_s28 }
0x2e9c   :  { %16 = sbr.rel (!%p14_p10) target bundleno = 2 (0x2), region = 178 }

</bundles_post_ra>
